<compile_context>
chip_gen: v6e
topology: v6e:2x2x1
jax: 0.10.0
libtpu: 0.0.40
codegen_flags: <defaults>
</compile_context>

<pallas_src>
import functools

import jax
import jax.numpy as jnp
import numpy as np
from jax.experimental import pallas as pl
from jax.experimental.pallas import tpu as pltpu

KSIZE = 7
PAD = 3
BN_EPS = 1e-5


def _vmem_capacity_bytes():
    """Physical VMEM of the local TPU (fallback: v7x-sized 64 MiB)."""
    try:
        return int(pltpu.get_tpu_info().vmem_capacity_bytes)
    except Exception:
        return 64 << 20


def _choose_tiles(n, c, hw, block_budget, relax_multistep):
    """Pick (tb, tc, n_pad, c_pad).

    Second-to-last block dims must be a multiple of 8 or the full dim
    ((8, 128) layout rule). If no divisor of C / N satisfies both the layout
    rule and the VMEM block budget, the dim is padded wrapper-side instead of
    falling back to the full dim (which could blow past the VMEM limit).
    """
    per_ch = hw * 4  # f32 accumulation width (conservative for sub-32-bit inputs)

    # --- channel tile ---
    c_cands = [d for d in range(c, 0, -1) if c % d == 0 and (d == c or d % 8 == 0)]
    fit_c = [d for d in c_cands if d * per_ch <= block_budget]
    if fit_c:
        tc, c_pad = max(fit_c), c
    else:
        tc = max(8, (block_budget // per_ch) // 8 * 8)
        c_pad = -(-c // tc) * tc

    # --- batch tile ---
    blk = tc * per_ch
    b_cands = [d for d in range(n, 0, -1) if n % d == 0 and (d == n or d % 8 == 0)]
    fit_b = [d for d in b_cands if d * blk <= block_budget]
    if fit_b:
        n_pad = n
        # Prefer >=2 steps on the parallel axis (keeps both v7x TensorCores
        # busy); on big-VMEM parts only once blocks are large enough to
        # amortize the per-grid-step overhead.
        min_blk = 0 if relax_multistep else (1 << 20)
        multi = [d for d in fit_b if n // d >= 2 and d * blk >= min_blk]
        tb = max(multi) if (n >= 2 and multi) else max(fit_b)
    else:
        tb = n if n < 8 else 8
        n_pad = -(-n // tb) * tb
    return tb, tc, n_pad, c_pad


def _spatial_attention_kernel(w_ref, shift_ref, mask_ref, x_ref, o_ref,
                              sum_ref, max_ref, *, width, n_real_channels):
    """Grid = (batch tiles, channel tiles); channel axis last ("arbitrary").

    w_ref    : SMEM (98,)    f32  conv weights with BN scale (and 1/C for the
                                  mean channel) folded in; [avg 49, max 49]
    shift_ref: SMEM (1,)     f32  folded BatchNorm shift
    mask_ref : VMEM (49, HW) f32  per-tap zero-padding validity masks
    x_ref    : VMEM (TB, TC, HW)  lane-dense input block
    o_ref    : VMEM (TB, HW)      lane-dense output block
    sum_ref  : VMEM (TB, HW) f32  running channel sum (persists over C steps)
    max_ref  : VMEM (TB, HW) f32  running channel max
    """
    c_step = pl.program_id(1)
    tb, tc, hw = x_ref.shape

    # ---- channel reduction over this block: full-width sublane reduce ----
    xf = x_ref[...].astype(jnp.float32)                     # (TB, TC, HW)
    part_sum = jnp.sum(xf, axis=1)                          # (TB, HW)
    if n_real_channels is not None:
        # Channel dim was zero-padded wrapper-side: zeros are fine for the sum
        # but must be excluded from the max.
        ch = jax.lax.broadcasted_iota(jnp.int32, xf.shape, 1) + c_step * tc
        part_max = jnp.max(jnp.where(ch < n_real_channels, xf, -jnp.inf), axis=1)
    else:
        part_max = jnp.max(xf, axis=1)

    @pl.when(c_step == 0)
    def _():
        sum_ref[...] = part_sum
        max_ref[...] = part_max

    @pl.when(c_step != 0)
    def _():
        sum_ref[...] = sum_ref[...] + part_sum
        max_ref[...] = jnp.maximum(max_ref[...], part_max)

    # ---- last channel step: 7x7 conv (+ folded BN) + sigmoid, lane-dense ----
    @pl.when(c_step == pl.num_programs(1) - 1)
    def _():
        # Bound vreg pressure: run the 49-tap conv over batch-row chunks.
        rows = tb if (tb <= 8 or tb * hw * 4 <= (32 << 10)) else 8

        def conv_chunk(a, m):
            rb = a.shape[0]
            stacked = (rb % 8) == 0          # one roll per tap instead of two
            feat = jnp.concatenate([a, m], axis=0) if stacked else None
            acc = jnp.full(a.shape, shift_ref[0], jnp.float32)
            for ky in range(KSIZE):
                for kx in range(KSIZE):
                    k = ky * KSIZE + kx
                    off = (ky - PAD) * width + (kx - PAD)
                    shift = (-off) % hw
                    if stacked:
                        s = feat if shift == 0 else pltpu.roll(feat, shift, axis=1)
                        a_s, m_s = s[:rb], s[rb:]
                    else:
                        a_s = a if shift == 0 else pltpu.roll(a, shift, axis=1)
                        m_s = m if shift == 0 else pltpu.roll(m, shift, axis=1)
                    tap = a_s * w_ref[k] + m_s * w_ref[KSIZE * KSIZE + k]
                    acc = acc + tap * mask_ref[k:k + 1, :]
            return acc

        for r0 in range(0, tb, rows):
            rb = min(rows, tb - r0)
            acc = conv_chunk(sum_ref[r0:r0 + rb, :], max_ref[r0:r0 + rb, :])
            o_ref[r0:r0 + rb, :] = jax.nn.sigmoid(acc).astype(o_ref.dtype)


def spatial_attention(x, conv_w, gamma, beta, running_mean, running_var):
    """x: (N, C, H, W) ; conv_w: (1, 2, 7, 7) f32 ; BN params are scalars."""
    N, C, H, W = x.shape
    HW = H * W
    itemsize = jnp.dtype(x.dtype).itemsize

    # Fold BN (inference mode) and the 1/C of the channel-mean into the weights.
    scale = gamma / jnp.sqrt(running_var + BN_EPS)
    shift = beta - running_mean * scale
    w_avg = conv_w[0, 0].astype(jnp.float32) * (scale / C)
    w_max = conv_w[0, 1].astype(jnp.float32) * scale
    w_flat = jnp.concatenate([w_avg.reshape(-1), w_max.reshape(-1)]).astype(jnp.float32)
    shift_arr = jnp.reshape(shift, (1,)).astype(jnp.float32)

    # Precomputed per-tap zero-padding validity masks (f32, lane-dense): the
    # kernel does roll + mask instead of halo handling, with no int compares.
    h_idx = np.repeat(np.arange(H), W)
    w_idx = np.tile(np.arange(W), H)
    masks_np = np.zeros((KSIZE * KSIZE, HW), np.float32)
    for ky in range(KSIZE):
        dy = ky - PAD
        for kx in range(KSIZE):
            dx = kx - PAD
            valid = ((h_idx + dy >= 0) & (h_idx + dy < H)
                     & (w_idx + dx >= 0) & (w_idx + dx < W))
            masks_np[ky * KSIZE + kx] = valid.astype(np.float32)
    masks = jnp.asarray(masks_np)

    # Generation-aware tiling: bigger blocks on 128-MiB-VMEM parts (v5e/v6e),
    # tighter budget + guaranteed 2-way batch parallelism preference on v7x.
    vmem_cap = _vmem_capacity_bytes()
    is_small_vmem = vmem_cap < (100 << 20)          # v7x-class part
    block_budget = (6 << 20) if is_small_vmem else (12 << 20)
    tb, tc, n_pad, c_pad = _choose_tiles(N, C, HW, block_budget,
                                         relax_multistep=is_small_vmem)

    x_flat = x.reshape(N, C, HW)                    # lane-dense view (free)
    if c_pad != C:
        # Zero pad: correct for the channel sum; the max excludes it in-kernel.
        x_flat = jnp.pad(x_flat, ((0, 0), (0, c_pad - C), (0, 0)))
    if n_pad != N:
        x_flat = jnp.pad(x_flat, ((0, n_pad - N), (0, 0), (0, 0)))

    grid = (n_pad // tb, c_pad // tc)

    # VMEM budget from the double-buffered blocks + persistent scratch
    # (+ headroom for an f32 widening of sub-32-bit inputs during the reduce).
    x_blk = tb * tc * HW * itemsize
    o_blk = tb * HW * itemsize
    m_blk = masks.size * 4
    vmem_need = 2 * (x_blk + o_blk + m_blk) + 2 * tb * HW * 4
    if itemsize < 4:
        vmem_need += tb * tc * HW * 4
    vmem_limit = int(min(max(2 * vmem_need, 16 << 20), int(vmem_cap * 0.6)))

    cost = pl.CostEstimate(
        flops=int(N * HW * (2 * C + 5 * KSIZE * KSIZE + 2)),
        transcendentals=int(N * HW),
        bytes_accessed=int(x.size * itemsize + N * HW * itemsize),
    )

    kernel = functools.partial(
        _spatial_attention_kernel,
        width=W,
        n_real_channels=(C if c_pad != C else None),
    )

    out_flat = pl.pallas_call(
        kernel,
        out_shape=jax.ShapeDtypeStruct((n_pad, HW), x.dtype),
        grid_spec=pltpu.PrefetchScalarGridSpec(
            num_scalar_prefetch=0,
            grid=grid,
            in_specs=[
                pl.BlockSpec(memory_space=pltpu.SMEM),               # folded conv weights
                pl.BlockSpec(memory_space=pltpu.SMEM),               # folded BN shift
                pl.BlockSpec((KSIZE * KSIZE, HW), lambda b, c: (0, 0)),  # tap masks
                pl.BlockSpec((tb, tc, HW), lambda b, c: (b, c, 0)),
            ],
            out_specs=pl.BlockSpec((tb, HW), lambda b, c: (b, 0)),
            scratch_shapes=[
                pltpu.VMEM((tb, HW), jnp.float32),                   # running channel sum
                pltpu.VMEM((tb, HW), jnp.float32),                   # running channel max
            ],
        ),
        compiler_params=pltpu.CompilerParams(
            dimension_semantics=("parallel", "arbitrary"),
            vmem_limit_bytes=vmem_limit,
        ),
        cost_estimate=cost,
    )(w_flat, shift_arr, masks, x_flat)

    if n_pad != N:
        out_flat = out_flat[:N]
    return out_flat.reshape(N, 1, H, W)


def _reference(x, conv_w, gamma, beta, running_mean, running_var):
    """Pure-JAX reference of the same forward pass."""
    avg = jnp.mean(x, axis=1, keepdims=True)
    mx = jnp.max(x, axis=1, keepdims=True)
    feat = jnp.concatenate([avg, mx], axis=1)
    y = jax.lax.conv_general_dilated(
        feat, conv_w, window_strides=(1, 1), padding=[(PAD, PAD), (PAD, PAD)],
        dimension_numbers=("NCHW", "OIHW", "NCHW"))
    scale = gamma / jnp.sqrt(running_var + BN_EPS)
    shift = beta - running_mean * scale
    return jax.nn.sigmoid(y * scale + shift)


if __name__ == "__main__":
    key = jax.random.PRNGKey(0)
    k_x, k_w = jax.random.split(key)

    N, C, H, W = 2, 4, 16, 16
    x = jax.random.normal(k_x, (N, C, H, W), dtype=jnp.float32)

    # Deterministic parameter init (Conv2d(2, 1, 7, bias=False) + BatchNorm2d(1)).
    fan_in = 2 * KSIZE * KSIZE
    conv_w = jax.random.normal(k_w, (1, 2, KSIZE, KSIZE), dtype=jnp.float32)
    conv_w = conv_w * jnp.float32(np.sqrt(2.0 / fan_in))         # kaiming-ish
    gamma = jnp.float32(1.0)
    beta = jnp.float32(0.0)
    running_mean = jnp.float32(0.0)
    running_var = jnp.float32(1.0)

    out = spatial_attention(x, conv_w, gamma, beta, running_mean, running_var)
    out = jax.block_until_ready(out)

    ref = _reference(x, conv_w, gamma, beta, running_mean, running_var)
    np.testing.assert_allclose(np.asarray(out), np.asarray(ref),
                               rtol=1e-5, atol=1e-5)
    print("KERNEL_OK")
</pallas_src>

<mosaic_0001>
module attributes {stable_mosaic.version = 11 : i64} {
  func.func @_spatial_attention_kernel(%arg0: i32, %arg1: i32, %arg2: memref<98xf32, #tpu.memory_space<smem>>, %arg3: memref<1xf32, #tpu.memory_space<smem>>, %arg4: memref<49x256xf32, #tpu.memory_space<vmem>>, %arg5: memref<2x4x256xf32, #tpu.memory_space<vmem>>, %arg6: memref<2x256xf32, #tpu.memory_space<vmem>>, %arg7: memref<2x256xf32, #tpu.memory_space<vmem>>, %arg8: memref<2x256xf32, #tpu.memory_space<vmem>>) attributes {dimension_semantics = [#tpu.dimension_semantics<parallel>, #tpu.dimension_semantics<arbitrary>], iteration_bounds = array<i64: 1, 1>, scalar_prefetch = 0 : i64, scratch_operands = 2 : i64, tpu.core_type = #tpu.core_type<tc>, window_params = [{transform_indices = @transform_0, window_bounds = array<i64: 98>}, {transform_indices = @transform_1, window_bounds = array<i64: 1>}, {pipeline_mode = #tpu.pipeline_mode<synchronous>, transform_indices = @transform_2, window_bounds = array<i64: 49, 256>}, {transform_indices = @transform_3, window_bounds = array<i64: 2, 4, 256>}, {transform_indices = @transform_4, window_bounds = array<i64: 2, 256>}]} {
    %c0 = arith.constant 0 : index
    %c0_0 = arith.constant 0 : index
    %c0_1 = arith.constant 0 : index
    %0 = vector.load %arg5[%c0, %c0_0, %c0_1] : memref<2x4x256xf32, #tpu.memory_space<vmem>>, vector<2x4x256xf32>
    %cst = arith.constant dense<0.000000e+00> : vector<2x256xf32>
    %1 = vector.multi_reduction <add>, %0, %cst [1] : vector<2x4x256xf32> to vector<2x256xf32>
    %cst_2 = arith.constant dense<0xFF800000> : vector<2x256xf32>
    %2 = vector.multi_reduction <maximumf>, %0, %cst_2 [1] : vector<2x4x256xf32> to vector<2x256xf32>
    %c0_i32 = arith.constant 0 : i32
    %3 = arith.cmpi eq, %arg1, %c0_i32 : i32
    %4 = arith.extui %3 : i1 to i32
    %c0_i32_3 = arith.constant 0 : i32
    %5 = arith.cmpi ne, %4, %c0_i32_3 : i32
    scf.if %5 {
      %c0_8 = arith.constant 0 : index
      %c0_9 = arith.constant 0 : index
      %12 = vector.load %arg7[%c0_8, %c0_9] : memref<2x256xf32, #tpu.memory_space<vmem>>, vector<2x256xf32>
      tpu.vector_store %arg7[%c0_8, %c0_9], %1 {strides = array<i32>} : memref<2x256xf32, #tpu.memory_space<vmem>>, vector<2x256xf32>,
      %c0_10 = arith.constant 0 : index
      %c0_11 = arith.constant 0 : index
      %13 = vector.load %arg8[%c0_10, %c0_11] : memref<2x256xf32, #tpu.memory_space<vmem>>, vector<2x256xf32>
      tpu.vector_store %arg8[%c0_10, %c0_11], %2 {strides = array<i32>} : memref<2x256xf32, #tpu.memory_space<vmem>>, vector<2x256xf32>,
    } else {
    }
    %c0_i32_4 = arith.constant 0 : i32
    %6 = arith.cmpi ne, %arg1, %c0_i32_4 : i32
    %7 = arith.extui %6 : i1 to i32
    %c0_i32_5 = arith.constant 0 : i32
    %8 = arith.cmpi ne, %7, %c0_i32_5 : i32
    scf.if %8 {
      %c0_8 = arith.constant 0 : index
      %c0_9 = arith.constant 0 : index
      %12 = vector.load %arg7[%c0_8, %c0_9] : memref<2x256xf32, #tpu.memory_space<vmem>>, vector<2x256xf32>
      %13 = arith.addf %12, %1 : vector<2x256xf32>
      %c0_10 = arith.constant 0 : index
      %c0_11 = arith.constant 0 : index
      %14 = vector.load %arg7[%c0_10, %c0_11] : memref<2x256xf32, #tpu.memory_space<vmem>>, vector<2x256xf32>
      tpu.vector_store %arg7[%c0_10, %c0_11], %13 {strides = array<i32>} : memref<2x256xf32, #tpu.memory_space<vmem>>, vector<2x256xf32>,
      %c0_12 = arith.constant 0 : index
      %c0_13 = arith.constant 0 : index
      %15 = vector.load %arg8[%c0_12, %c0_13] : memref<2x256xf32, #tpu.memory_space<vmem>>, vector<2x256xf32>
      %16 = arith.maximumf %15, %2 : vector<2x256xf32>
      %c0_14 = arith.constant 0 : index
      %c0_15 = arith.constant 0 : index
      %17 = vector.load %arg8[%c0_14, %c0_15] : memref<2x256xf32, #tpu.memory_space<vmem>>, vector<2x256xf32>
      tpu.vector_store %arg8[%c0_14, %c0_15], %16 {strides = array<i32>} : memref<2x256xf32, #tpu.memory_space<vmem>>, vector<2x256xf32>,
    } else {
    }
    %c0_i32_6 = arith.constant 0 : i32
    %9 = arith.cmpi eq, %arg1, %c0_i32_6 : i32
    %10 = arith.extui %9 : i1 to i32
    %c0_i32_7 = arith.constant 0 : i32
    %11 = arith.cmpi ne, %10, %c0_i32_7 : i32
    scf.if %11 {
      %c0_8 = arith.constant 0 : index
      %c0_9 = arith.constant 0 : index
      %12 = vector.load %arg7[%c0_8, %c0_9] : memref<2x256xf32, #tpu.memory_space<vmem>>, vector<2x256xf32>
      %c0_10 = arith.constant 0 : index
      %c0_11 = arith.constant 0 : index
      %13 = vector.load %arg8[%c0_10, %c0_11] : memref<2x256xf32, #tpu.memory_space<vmem>>, vector<2x256xf32>
      %c0_12 = arith.constant 0 : index
      %14 = memref.load %arg3[%c0_12] : memref<1xf32, #tpu.memory_space<smem>>
      %15 = vector.broadcast %14 : f32 to vector<2x256xf32>
      %c51_i32 = arith.constant 51 : i32
      %16 = tpu.dynamic_rotate %12 by %c51_i32 dim 1 : vector<2x256xf32>, i32 -> vector<2x256xf32>
      %c51_i32_13 = arith.constant 51 : i32
      %17 = tpu.dynamic_rotate %13 by %c51_i32_13 dim 1 : vector<2x256xf32>, i32 -> vector<2x256xf32>
      %c0_14 = arith.constant 0 : index
      %18 = memref.load %arg2[%c0_14] : memref<98xf32, #tpu.memory_space<smem>>
      %19 = vector.broadcast %18 : f32 to vector<2x256xf32>
      %20 = arith.mulf %16, %19 : vector<2x256xf32>
      %c49 = arith.constant 49 : index
      %21 = memref.load %arg2[%c49] : memref<98xf32, #tpu.memory_space<smem>>
      %22 = vector.broadcast %21 : f32 to vector<2x256xf32>
      %23 = arith.mulf %17, %22 : vector<2x256xf32>
      %24 = arith.addf %20, %23 : vector<2x256xf32>
      %c0_15 = arith.constant 0 : index
      %c0_16 = arith.constant 0 : index
      %25 = vector.load %arg4[%c0_15, %c0_16] : memref<49x256xf32, #tpu.memory_space<vmem>>, vector<1x256xf32>
      %26 = vector.broadcast %25 : vector<1x256xf32> to vector<2x256xf32>
      %27 = arith.mulf %24, %26 : vector<2x256xf32>
      %28 = arith.addf %15, %27 : vector<2x256xf32>
      %c50_i32 = arith.constant 50 : i32
      %29 = tpu.dynamic_rotate %12 by %c50_i32 dim 1 : vector<2x256xf32>, i32 -> vector<2x256xf32>
      %c50_i32_17 = arith.constant 50 : i32
      %30 = tpu.dynamic_rotate %13 by %c50_i32_17 dim 1 : vector<2x256xf32>, i32 -> vector<2x256xf32>
      %c1 = arith.constant 1 : index
      %31 = memref.load %arg2[%c1] : memref<98xf32, #tpu.memory_space<smem>>
      %32 = vector.broadcast %31 : f32 to vector<2x256xf32>
      %33 = arith.mulf %29, %32 : vector<2x256xf32>
      %c50 = arith.constant 50 : index
      %34 = memref.load %arg2[%c50] : memref<98xf32, #tpu.memory_space<smem>>
      %35 = vector.broadcast %34 : f32 to vector<2x256xf32>
      %36 = arith.mulf %30, %35 : vector<2x256xf32>
      %37 = arith.addf %33, %36 : vector<2x256xf32>
      %c1_18 = arith.constant 1 : index
      %c0_19 = arith.constant 0 : index
      %38 = vector.load %arg4[%c1_18, %c0_19] : memref<49x256xf32, #tpu.memory_space<vmem>>, vector<1x256xf32>
      %39 = vector.broadcast %38 : vector<1x256xf32> to vector<2x256xf32>
      %40 = arith.mulf %37, %39 : vector<2x256xf32>
      %41 = arith.addf %28, %40 : vector<2x256xf32>
      %c49_i32 = arith.constant 49 : i32
      %42 = tpu.dynamic_rotate %12 by %c49_i32 dim 1 : vector<2x256xf32>, i32 -> vector<2x256xf32>
      %c49_i32_20 = arith.constant 49 : i32
      %43 = tpu.dynamic_rotate %13 by %c49_i32_20 dim 1 : vector<2x256xf32>, i32 -> vector<2x256xf32>
      %c2 = arith.constant 2 : index
      %44 = memref.load %arg2[%c2] : memref<98xf32, #tpu.memory_space<smem>>
      %45 = vector.broadcast %44 : f32 to vector<2x256xf32>
      %46 = arith.mulf %42, %45 : vector<2x256xf32>
      %c51 = arith.constant 51 : index
      %47 = memref.load %arg2[%c51] : memref<98xf32, #tpu.memory_space<smem>>
      %48 = vector.broadcast %47 : f32 to vector<2x256xf32>
      %49 = arith.mulf %43, %48 : vector<2x256xf32>
      %50 = arith.addf %46, %49 : vector<2x256xf32>
      %c2_21 = arith.constant 2 : index
      %c0_22 = arith.constant 0 : index
      %51 = vector.load %arg4[%c2_21, %c0_22] : memref<49x256xf32, #tpu.memory_space<vmem>>, vector<1x256xf32>
      %52 = vector.broadcast %51 : vector<1x256xf32> to vector<2x256xf32>
      %53 = arith.mulf %50, %52 : vector<2x256xf32>
      %54 = arith.addf %41, %53 : vector<2x256xf32>
      %c48_i32 = arith.constant 48 : i32
      %55 = tpu.dynamic_rotate %12 by %c48_i32 dim 1 : vector<2x256xf32>, i32 -> vector<2x256xf32>
      %c48_i32_23 = arith.constant 48 : i32
      %56 = tpu.dynamic_rotate %13 by %c48_i32_23 dim 1 : vector<2x256xf32>, i32 -> vector<2x256xf32>
      %c3 = arith.constant 3 : index
      %57 = memref.load %arg2[%c3] : memref<98xf32, #tpu.memory_space<smem>>
      %58 = vector.broadcast %57 : f32 to vector<2x256xf32>
      %59 = arith.mulf %55, %58 : vector<2x256xf32>
      %c52 = arith.constant 52 : index
      %60 = memref.load %arg2[%c52] : memref<98xf32, #tpu.memory_space<smem>>
      %61 = vector.broadcast %60 : f32 to vector<2x256xf32>
      %62 = arith.mulf %56, %61 : vector<2x256xf32>
      %63 = arith.addf %59, %62 : vector<2x256xf32>
      %c3_24 = arith.constant 3 : index
      %c0_25 = arith.constant 0 : index
      %64 = vector.load %arg4[%c3_24, %c0_25] : memref<49x256xf32, #tpu.memory_space<vmem>>, vector<1x256xf32>
      %65 = vector.broadcast %64 : vector<1x256xf32> to vector<2x256xf32>
      %66 = arith.mulf %63, %65 : vector<2x256xf32>
      %67 = arith.addf %54, %66 : vector<2x256xf32>
      %c47_i32 = arith.constant 47 : i32
      %68 = tpu.dynamic_rotate %12 by %c47_i32 dim 1 : vector<2x256xf32>, i32 -> vector<2x256xf32>
      %c47_i32_26 = arith.constant 47 : i32
      %69 = tpu.dynamic_rotate %13 by %c47_i32_26 dim 1 : vector<2x256xf32>, i32 -> vector<2x256xf32>
      %c4 = arith.constant 4 : index
      %70 = memref.load %arg2[%c4] : memref<98xf32, #tpu.memory_space<smem>>
      %71 = vector.broadcast %70 : f32 to vector<2x256xf32>
      %72 = arith.mulf %68, %71 : vector<2x256xf32>
      %c53 = arith.constant 53 : index
      %73 = memref.load %arg2[%c53] : memref<98xf32, #tpu.memory_space<smem>>
      %74 = vector.broadcast %73 : f32 to vector<2x256xf32>
      %75 = arith.mulf %69, %74 : vector<2x256xf32>
      %76 = arith.addf %72, %75 : vector<2x256xf32>
      %c4_27 = arith.constant 4 : index
      %c0_28 = arith.constant 0 : index
      %77 = vector.load %arg4[%c4_27, %c0_28] : memref<49x256xf32, #tpu.memory_space<vmem>>, vector<1x256xf32>
      %78 = vector.broadcast %77 : vector<1x256xf32> to vector<2x256xf32>
      %79 = arith.mulf %76, %78 : vector<2x256xf32>
      %80 = arith.addf %67, %79 : vector<2x256xf32>
      %c46_i32 = arith.constant 46 : i32
      %81 = tpu.dynamic_rotate %12 by %c46_i32 dim 1 : vector<2x256xf32>, i32 -> vector<2x256xf32>
      %c46_i32_29 = arith.constant 46 : i32
      %82 = tpu.dynamic_rotate %13 by %c46_i32_29 dim 1 : vector<2x256xf32>, i32 -> vector<2x256xf32>
      %c5 = arith.constant 5 : index
      %83 = memref.load %arg2[%c5] : memref<98xf32, #tpu.memory_space<smem>>
      %84 = vector.broadcast %83 : f32 to vector<2x256xf32>
      %85 = arith.mulf %81, %84 : vector<2x256xf32>
      %c54 = arith.constant 54 : index
      %86 = memref.load %arg2[%c54] : memref<98xf32, #tpu.memory_space<smem>>
      %87 = vector.broadcast %86 : f32 to vector<2x256xf32>
      %88 = arith.mulf %82, %87 : vector<2x256xf32>
      %89 = arith.addf %85, %88 : vector<2x256xf32>
      %c5_30 = arith.constant 5 : index
      %c0_31 = arith.constant 0 : index
      %90 = vector.load %arg4[%c5_30, %c0_31] : memref<49x256xf32, #tpu.memory_space<vmem>>, vector<1x256xf32>
      %91 = vector.broadcast %90 : vector<1x256xf32> to vector<2x256xf32>
      %92 = arith.mulf %89, %91 : vector<2x256xf32>
      %93 = arith.addf %80, %92 : vector<2x256xf32>
      %c45_i32 = arith.constant 45 : i32
      %94 = tpu.dynamic_rotate %12 by %c45_i32 dim 1 : vector<2x256xf32>, i32 -> vector<2x256xf32>
      %c45_i32_32 = arith.constant 45 : i32
      %95 = tpu.dynamic_rotate %13 by %c45_i32_32 dim 1 : vector<2x256xf32>, i32 -> vector<2x256xf32>
      %c6 = arith.constant 6 : index
      %96 = memref.load %arg2[%c6] : memref<98xf32, #tpu.memory_space<smem>>
      %97 = vector.broadcast %96 : f32 to vector<2x256xf32>
      %98 = arith.mulf %94, %97 : vector<2x256xf32>
      %c55 = arith.constant 55 : index
      %99 = memref.load %arg2[%c55] : memref<98xf32, #tpu.memory_space<smem>>
      %100 = vector.broadcast %99 : f32 to vector<2x256xf32>
      %101 = arith.mulf %95, %100 : vector<2x256xf32>
      %102 = arith.addf %98, %101 : vector<2x256xf32>
      %c6_33 = arith.constant 6 : index
      %c0_34 = arith.constant 0 : index
      %103 = vector.load %arg4[%c6_33, %c0_34] : memref<49x256xf32, #tpu.memory_space<vmem>>, vector<1x256xf32>
      %104 = vector.broadcast %103 : vector<1x256xf32> to vector<2x256xf32>
      %105 = arith.mulf %102, %104 : vector<2x256xf32>
      %106 = arith.addf %93, %105 : vector<2x256xf32>
      %c35_i32 = arith.constant 35 : i32
      %107 = tpu.dynamic_rotate %12 by %c35_i32 dim 1 : vector<2x256xf32>, i32 -> vector<2x256xf32>
      %c35_i32_35 = arith.constant 35 : i32
      %108 = tpu.dynamic_rotate %13 by %c35_i32_35 dim 1 : vector<2x256xf32>, i32 -> vector<2x256xf32>
      %c7 = arith.constant 7 : index
      %109 = memref.load %arg2[%c7] : memref<98xf32, #tpu.memory_space<smem>>
      %110 = vector.broadcast %109 : f32 to vector<2x256xf32>
      %111 = arith.mulf %107, %110 : vector<2x256xf32>
      %c56 = arith.constant 56 : index
      %112 = memref.load %arg2[%c56] : memref<98xf32, #tpu.memory_space<smem>>
      %113 = vector.broadcast %112 : f32 to vector<2x256xf32>
      %114 = arith.mulf %108, %113 : vector<2x256xf32>
      %115 = arith.addf %111, %114 : vector<2x256xf32>
      %c7_36 = arith.constant 7 : index
      %c0_37 = arith.constant 0 : index
      %116 = vector.load %arg4[%c7_36, %c0_37] : memref<49x256xf32, #tpu.memory_space<vmem>>, vector<1x256xf32>
      %117 = vector.broadcast %116 : vector<1x256xf32> to vector<2x256xf32>
      %118 = arith.mulf %115, %117 : vector<2x256xf32>
      %119 = arith.addf %106, %118 : vector<2x256xf32>
      %c34_i32 = arith.constant 34 : i32
      %120 = tpu.dynamic_rotate %12 by %c34_i32 dim 1 : vector<2x256xf32>, i32 -> vector<2x256xf32>
      %c34_i32_38 = arith.constant 34 : i32
      %121 = tpu.dynamic_rotate %13 by %c34_i32_38 dim 1 : vector<2x256xf32>, i32 -> vector<2x256xf32>
      %c8 = arith.constant 8 : index
      %122 = memref.load %arg2[%c8] : memref<98xf32, #tpu.memory_space<smem>>
      %123 = vector.broadcast %122 : f32 to vector<2x256xf32>
      %124 = arith.mulf %120, %123 : vector<2x256xf32>
      %c57 = arith.constant 57 : index
      %125 = memref.load %arg2[%c57] : memref<98xf32, #tpu.memory_space<smem>>
      %126 = vector.broadcast %125 : f32 to vector<2x256xf32>
      %127 = arith.mulf %121, %126 : vector<2x256xf32>
      %128 = arith.addf %124, %127 : vector<2x256xf32>
      %c8_39 = arith.constant 8 : index
      %c0_40 = arith.constant 0 : index
      %129 = vector.load %arg4[%c8_39, %c0_40] : memref<49x256xf32, #tpu.memory_space<vmem>>, vector<1x256xf32>
      %130 = vector.broadcast %129 : vector<1x256xf32> to vector<2x256xf32>
      %131 = arith.mulf %128, %130 : vector<2x256xf32>
      %132 = arith.addf %119, %131 : vector<2x256xf32>
      %c33_i32 = arith.constant 33 : i32
      %133 = tpu.dynamic_rotate %12 by %c33_i32 dim 1 : vector<2x256xf32>, i32 -> vector<2x256xf32>
      %c33_i32_41 = arith.constant 33 : i32
      %134 = tpu.dynamic_rotate %13 by %c33_i32_41 dim 1 : vector<2x256xf32>, i32 -> vector<2x256xf32>
      %c9 = arith.constant 9 : index
      %135 = memref.load %arg2[%c9] : memref<98xf32, #tpu.memory_space<smem>>
      %136 = vector.broadcast %135 : f32 to vector<2x256xf32>
      %137 = arith.mulf %133, %136 : vector<2x256xf32>
      %c58 = arith.constant 58 : index
      %138 = memref.load %arg2[%c58] : memref<98xf32, #tpu.memory_space<smem>>
      %139 = vector.broadcast %138 : f32 to vector<2x256xf32>
      %140 = arith.mulf %134, %139 : vector<2x256xf32>
      %141 = arith.addf %137, %140 : vector<2x256xf32>
      %c9_42 = arith.constant 9 : index
      %c0_43 = arith.constant 0 : index
      %142 = vector.load %arg4[%c9_42, %c0_43] : memref<49x256xf32, #tpu.memory_space<vmem>>, vector<1x256xf32>
      %143 = vector.broadcast %142 : vector<1x256xf32> to vector<2x256xf32>
      %144 = arith.mulf %141, %143 : vector<2x256xf32>
      %145 = arith.addf %132, %144 : vector<2x256xf32>
      %c32_i32 = arith.constant 32 : i32
      %146 = tpu.dynamic_rotate %12 by %c32_i32 dim 1 : vector<2x256xf32>, i32 -> vector<2x256xf32>
      %c32_i32_44 = arith.constant 32 : i32
      %147 = tpu.dynamic_rotate %13 by %c32_i32_44 dim 1 : vector<2x256xf32>, i32 -> vector<2x256xf32>
      %c10 = arith.constant 10 : index
      %148 = memref.load %arg2[%c10] : memref<98xf32, #tpu.memory_space<smem>>
      %149 = vector.broadcast %148 : f32 to vector<2x256xf32>
      %150 = arith.mulf %146, %149 : vector<2x256xf32>
      %c59 = arith.constant 59 : index
      %151 = memref.load %arg2[%c59] : memref<98xf32, #tpu.memory_space<smem>>
      %152 = vector.broadcast %151 : f32 to vector<2x256xf32>
      %153 = arith.mulf %147, %152 : vector<2x256xf32>
      %154 = arith.addf %150, %153 : vector<2x256xf32>
      %c10_45 = arith.constant 10 : index
      %c0_46 = arith.constant 0 : index
      %155 = vector.load %arg4[%c10_45, %c0_46] : memref<49x256xf32, #tpu.memory_space<vmem>>, vector<1x256xf32>
      %156 = vector.broadcast %155 : vector<1x256xf32> to vector<2x256xf32>
      %157 = arith.mulf %154, %156 : vector<2x256xf32>
      %158 = arith.addf %145, %157 : vector<2x256xf32>
      %c31_i32 = arith.constant 31 : i32
      %159 = tpu.dynamic_rotate %12 by %c31_i32 dim 1 : vector<2x256xf32>, i32 -> vector<2x256xf32>
      %c31_i32_47 = arith.constant 31 : i32
      %160 = tpu.dynamic_rotate %13 by %c31_i32_47 dim 1 : vector<2x256xf32>, i32 -> vector<2x256xf32>
      %c11 = arith.constant 11 : index
      %161 = memref.load %arg2[%c11] : memref<98xf32, #tpu.memory_space<smem>>
      %162 = vector.broadcast %161 : f32 to vector<2x256xf32>
      %163 = arith.mulf %159, %162 : vector<2x256xf32>
      %c60 = arith.constant 60 : index
      %164 = memref.load %arg2[%c60] : memref<98xf32, #tpu.memory_space<smem>>
      %165 = vector.broadcast %164 : f32 to vector<2x256xf32>
      %166 = arith.mulf %160, %165 : vector<2x256xf32>
      %167 = arith.addf %163, %166 : vector<2x256xf32>
      %c11_48 = arith.constant 11 : index
      %c0_49 = arith.constant 0 : index
      %168 = vector.load %arg4[%c11_48, %c0_49] : memref<49x256xf32, #tpu.memory_space<vmem>>, vector<1x256xf32>
      %169 = vector.broadcast %168 : vector<1x256xf32> to vector<2x256xf32>
      %170 = arith.mulf %167, %169 : vector<2x256xf32>
      %171 = arith.addf %158, %170 : vector<2x256xf32>
      %c30_i32 = arith.constant 30 : i32
      %172 = tpu.dynamic_rotate %12 by %c30_i32 dim 1 : vector<2x256xf32>, i32 -> vector<2x256xf32>
      %c30_i32_50 = arith.constant 30 : i32
      %173 = tpu.dynamic_rotate %13 by %c30_i32_50 dim 1 : vector<2x256xf32>, i32 -> vector<2x256xf32>
      %c12 = arith.constant 12 : index
      %174 = memref.load %arg2[%c12] : memref<98xf32, #tpu.memory_space<smem>>
      %175 = vector.broadcast %174 : f32 to vector<2x256xf32>
      %176 = arith.mulf %172, %175 : vector<2x256xf32>
      %c61 = arith.constant 61 : index
      %177 = memref.load %arg2[%c61] : memref<98xf32, #tpu.memory_space<smem>>
      %178 = vector.broadcast %177 : f32 to vector<2x256xf32>
      %179 = arith.mulf %173, %178 : vector<2x256xf32>
      %180 = arith.addf %176, %179 : vector<2x256xf32>
      %c12_51 = arith.constant 12 : index
      %c0_52 = arith.constant 0 : index
      %181 = vector.load %arg4[%c12_51, %c0_52] : memref<49x256xf32, #tpu.memory_space<vmem>>, vector<1x256xf32>
      %182 = vector.broadcast %181 : vector<1x256xf32> to vector<2x256xf32>
      %183 = arith.mulf %180, %182 : vector<2x256xf32>
      %184 = arith.addf %171, %183 : vector<2x256xf32>
      %c29_i32 = arith.constant 29 : i32
      %185 = tpu.dynamic_rotate %12 by %c29_i32 dim 1 : vector<2x256xf32>, i32 -> vector<2x256xf32>
      %c29_i32_53 = arith.constant 29 : i32
      %186 = tpu.dynamic_rotate %13 by %c29_i32_53 dim 1 : vector<2x256xf32>, i32 -> vector<2x256xf32>
      %c13 = arith.constant 13 : index
      %187 = memref.load %arg2[%c13] : memref<98xf32, #tpu.memory_space<smem>>
      %188 = vector.broadcast %187 : f32 to vector<2x256xf32>
      %189 = arith.mulf %185, %188 : vector<2x256xf32>
      %c62 = arith.constant 62 : index
      %190 = memref.load %arg2[%c62] : memref<98xf32, #tpu.memory_space<smem>>
      %191 = vector.broadcast %190 : f32 to vector<2x256xf32>
      %192 = arith.mulf %186, %191 : vector<2x256xf32>
      %193 = arith.addf %189, %192 : vector<2x256xf32>
      %c13_54 = arith.constant 13 : index
      %c0_55 = arith.constant 0 : index
      %194 = vector.load %arg4[%c13_54, %c0_55] : memref<49x256xf32, #tpu.memory_space<vmem>>, vector<1x256xf32>
      %195 = vector.broadcast %194 : vector<1x256xf32> to vector<2x256xf32>
      %196 = arith.mulf %193, %195 : vector<2x256xf32>
      %197 = arith.addf %184, %196 : vector<2x256xf32>
      %c19_i32 = arith.constant 19 : i32
      %198 = tpu.dynamic_rotate %12 by %c19_i32 dim 1 : vector<2x256xf32>, i32 -> vector<2x256xf32>
      %c19_i32_56 = arith.constant 19 : i32
      %199 = tpu.dynamic_rotate %13 by %c19_i32_56 dim 1 : vector<2x256xf32>, i32 -> vector<2x256xf32>
      %c14 = arith.constant 14 : index
      %200 = memref.load %arg2[%c14] : memref<98xf32, #tpu.memory_space<smem>>
      %201 = vector.broadcast %200 : f32 to vector<2x256xf32>
      %202 = arith.mulf %198, %201 : vector<2x256xf32>
      %c63 = arith.constant 63 : index
      %203 = memref.load %arg2[%c63] : memref<98xf32, #tpu.memory_space<smem>>
      %204 = vector.broadcast %203 : f32 to vector<2x256xf32>
      %205 = arith.mulf %199, %204 : vector<2x256xf32>
      %206 = arith.addf %202, %205 : vector<2x256xf32>
      %c14_57 = arith.constant 14 : index
      %c0_58 = arith.constant 0 : index
      %207 = vector.load %arg4[%c14_57, %c0_58] : memref<49x256xf32, #tpu.memory_space<vmem>>, vector<1x256xf32>
      %208 = vector.broadcast %207 : vector<1x256xf32> to vector<2x256xf32>
      %209 = arith.mulf %206, %208 : vector<2x256xf32>
      %210 = arith.addf %197, %209 : vector<2x256xf32>
      %c18_i32 = arith.constant 18 : i32
      %211 = tpu.dynamic_rotate %12 by %c18_i32 dim 1 : vector<2x256xf32>, i32 -> vector<2x256xf32>
      %c18_i32_59 = arith.constant 18 : i32
      %212 = tpu.dynamic_rotate %13 by %c18_i32_59 dim 1 : vector<2x256xf32>, i32 -> vector<2x256xf32>
      %c15 = arith.constant 15 : index
      %213 = memref.load %arg2[%c15] : memref<98xf32, #tpu.memory_space<smem>>
      %214 = vector.broadcast %213 : f32 to vector<2x256xf32>
      %215 = arith.mulf %211, %214 : vector<2x256xf32>
      %c64 = arith.constant 64 : index
      %216 = memref.load %arg2[%c64] : memref<98xf32, #tpu.memory_space<smem>>
      %217 = vector.broadcast %216 : f32 to vector<2x256xf32>
      %218 = arith.mulf %212, %217 : vector<2x256xf32>
      %219 = arith.addf %215, %218 : vector<2x256xf32>
      %c15_60 = arith.constant 15 : index
      %c0_61 = arith.constant 0 : index
      %220 = vector.load %arg4[%c15_60, %c0_61] : memref<49x256xf32, #tpu.memory_space<vmem>>, vector<1x256xf32>
      %221 = vector.broadcast %220 : vector<1x256xf32> to vector<2x256xf32>
      %222 = arith.mulf %219, %221 : vector<2x256xf32>
      %223 = arith.addf %210, %222 : vector<2x256xf32>
      %c17_i32 = arith.constant 17 : i32
      %224 = tpu.dynamic_rotate %12 by %c17_i32 dim 1 : vector<2x256xf32>, i32 -> vector<2x256xf32>
      %c17_i32_62 = arith.constant 17 : i32
      %225 = tpu.dynamic_rotate %13 by %c17_i32_62 dim 1 : vector<2x256xf32>, i32 -> vector<2x256xf32>
      %c16 = arith.constant 16 : index
      %226 = memref.load %arg2[%c16] : memref<98xf32, #tpu.memory_space<smem>>
      %227 = vector.broadcast %226 : f32 to vector<2x256xf32>
      %228 = arith.mulf %224, %227 : vector<2x256xf32>
      %c65 = arith.constant 65 : index
      %229 = memref.load %arg2[%c65] : memref<98xf32, #tpu.memory_space<smem>>
      %230 = vector.broadcast %229 : f32 to vector<2x256xf32>
      %231 = arith.mulf %225, %230 : vector<2x256xf32>
      %232 = arith.addf %228, %231 : vector<2x256xf32>
      %c16_63 = arith.constant 16 : index
      %c0_64 = arith.constant 0 : index
      %233 = vector.load %arg4[%c16_63, %c0_64] : memref<49x256xf32, #tpu.memory_space<vmem>>, vector<1x256xf32>
      %234 = vector.broadcast %233 : vector<1x256xf32> to vector<2x256xf32>
      %235 = arith.mulf %232, %234 : vector<2x256xf32>
      %236 = arith.addf %223, %235 : vector<2x256xf32>
      %c16_i32 = arith.constant 16 : i32
      %237 = tpu.dynamic_rotate %12 by %c16_i32 dim 1 : vector<2x256xf32>, i32 -> vector<2x256xf32>
      %c16_i32_65 = arith.constant 16 : i32
      %238 = tpu.dynamic_rotate %13 by %c16_i32_65 dim 1 : vector<2x256xf32>, i32 -> vector<2x256xf32>
      %c17 = arith.constant 17 : index
      %239 = memref.load %arg2[%c17] : memref<98xf32, #tpu.memory_space<smem>>
      %240 = vector.broadcast %239 : f32 to vector<2x256xf32>
      %241 = arith.mulf %237, %240 : vector<2x256xf32>
      %c66 = arith.constant 66 : index
      %242 = memref.load %arg2[%c66] : memref<98xf32, #tpu.memory_space<smem>>
      %243 = vector.broadcast %242 : f32 to vector<2x256xf32>
      %244 = arith.mulf %238, %243 : vector<2x256xf32>
      %245 = arith.addf %241, %244 : vector<2x256xf32>
      %c17_66 = arith.constant 17 : index
      %c0_67 = arith.constant 0 : index
      %246 = vector.load %arg4[%c17_66, %c0_67] : memref<49x256xf32, #tpu.memory_space<vmem>>, vector<1x256xf32>
      %247 = vector.broadcast %246 : vector<1x256xf32> to vector<2x256xf32>
      %248 = arith.mulf %245, %247 : vector<2x256xf32>
      %249 = arith.addf %236, %248 : vector<2x256xf32>
      %c15_i32 = arith.constant 15 : i32
      %250 = tpu.dynamic_rotate %12 by %c15_i32 dim 1 : vector<2x256xf32>, i32 -> vector<2x256xf32>
      %c15_i32_68 = arith.constant 15 : i32
      %251 = tpu.dynamic_rotate %13 by %c15_i32_68 dim 1 : vector<2x256xf32>, i32 -> vector<2x256xf32>
      %c18 = arith.constant 18 : index
      %252 = memref.load %arg2[%c18] : memref<98xf32, #tpu.memory_space<smem>>
      %253 = vector.broadcast %252 : f32 to vector<2x256xf32>
      %254 = arith.mulf %250, %253 : vector<2x256xf32>
      %c67 = arith.constant 67 : index
      %255 = memref.load %arg2[%c67] : memref<98xf32, #tpu.memory_space<smem>>
      %256 = vector.broadcast %255 : f32 to vector<2x256xf32>
      %257 = arith.mulf %251, %256 : vector<2x256xf32>
      %258 = arith.addf %254, %257 : vector<2x256xf32>
      %c18_69 = arith.constant 18 : index
      %c0_70 = arith.constant 0 : index
      %259 = vector.load %arg4[%c18_69, %c0_70] : memref<49x256xf32, #tpu.memory_space<vmem>>, vector<1x256xf32>
      %260 = vector.broadcast %259 : vector<1x256xf32> to vector<2x256xf32>
      %261 = arith.mulf %258, %260 : vector<2x256xf32>
      %262 = arith.addf %249, %261 : vector<2x256xf32>
      %c14_i32 = arith.constant 14 : i32
      %263 = tpu.dynamic_rotate %12 by %c14_i32 dim 1 : vector<2x256xf32>, i32 -> vector<2x256xf32>
      %c14_i32_71 = arith.constant 14 : i32
      %264 = tpu.dynamic_rotate %13 by %c14_i32_71 dim 1 : vector<2x256xf32>, i32 -> vector<2x256xf32>
      %c19 = arith.constant 19 : index
      %265 = memref.load %arg2[%c19] : memref<98xf32, #tpu.memory_space<smem>>
      %266 = vector.broadcast %265 : f32 to vector<2x256xf32>
      %267 = arith.mulf %263, %266 : vector<2x256xf32>
      %c68 = arith.constant 68 : index
      %268 = memref.load %arg2[%c68] : memref<98xf32, #tpu.memory_space<smem>>
      %269 = vector.broadcast %268 : f32 to vector<2x256xf32>
      %270 = arith.mulf %264, %269 : vector<2x256xf32>
      %271 = arith.addf %267, %270 : vector<2x256xf32>
      %c19_72 = arith.constant 19 : index
      %c0_73 = arith.constant 0 : index
      %272 = vector.load %arg4[%c19_72, %c0_73] : memref<49x256xf32, #tpu.memory_space<vmem>>, vector<1x256xf32>
      %273 = vector.broadcast %272 : vector<1x256xf32> to vector<2x256xf32>
      %274 = arith.mulf %271, %273 : vector<2x256xf32>
      %275 = arith.addf %262, %274 : vector<2x256xf32>
      %c13_i32 = arith.constant 13 : i32
      %276 = tpu.dynamic_rotate %12 by %c13_i32 dim 1 : vector<2x256xf32>, i32 -> vector<2x256xf32>
      %c13_i32_74 = arith.constant 13 : i32
      %277 = tpu.dynamic_rotate %13 by %c13_i32_74 dim 1 : vector<2x256xf32>, i32 -> vector<2x256xf32>
      %c20 = arith.constant 20 : index
      %278 = memref.load %arg2[%c20] : memref<98xf32, #tpu.memory_space<smem>>
      %279 = vector.broadcast %278 : f32 to vector<2x256xf32>
      %280 = arith.mulf %276, %279 : vector<2x256xf32>
      %c69 = arith.constant 69 : index
      %281 = memref.load %arg2[%c69] : memref<98xf32, #tpu.memory_space<smem>>
      %282 = vector.broadcast %281 : f32 to vector<2x256xf32>
      %283 = arith.mulf %277, %282 : vector<2x256xf32>
      %284 = arith.addf %280, %283 : vector<2x256xf32>
      %c20_75 = arith.constant 20 : index
      %c0_76 = arith.constant 0 : index
      %285 = vector.load %arg4[%c20_75, %c0_76] : memref<49x256xf32, #tpu.memory_space<vmem>>, vector<1x256xf32>
      %286 = vector.broadcast %285 : vector<1x256xf32> to vector<2x256xf32>
      %287 = arith.mulf %284, %286 : vector<2x256xf32>
      %288 = arith.addf %275, %287 : vector<2x256xf32>
      %c3_i32 = arith.constant 3 : i32
      %289 = tpu.dynamic_rotate %12 by %c3_i32 dim 1 : vector<2x256xf32>, i32 -> vector<2x256xf32>
      %c3_i32_77 = arith.constant 3 : i32
      %290 = tpu.dynamic_rotate %13 by %c3_i32_77 dim 1 : vector<2x256xf32>, i32 -> vector<2x256xf32>
      %c21 = arith.constant 21 : index
      %291 = memref.load %arg2[%c21] : memref<98xf32, #tpu.memory_space<smem>>
      %292 = vector.broadcast %291 : f32 to vector<2x256xf32>
      %293 = arith.mulf %289, %292 : vector<2x256xf32>
      %c70 = arith.constant 70 : index
      %294 = memref.load %arg2[%c70] : memref<98xf32, #tpu.memory_space<smem>>
      %295 = vector.broadcast %294 : f32 to vector<2x256xf32>
      %296 = arith.mulf %290, %295 : vector<2x256xf32>
      %297 = arith.addf %293, %296 : vector<2x256xf32>
      %c21_78 = arith.constant 21 : index
      %c0_79 = arith.constant 0 : index
      %298 = vector.load %arg4[%c21_78, %c0_79] : memref<49x256xf32, #tpu.memory_space<vmem>>, vector<1x256xf32>
      %299 = vector.broadcast %298 : vector<1x256xf32> to vector<2x256xf32>
      %300 = arith.mulf %297, %299 : vector<2x256xf32>
      %301 = arith.addf %288, %300 : vector<2x256xf32>
      %c2_i32 = arith.constant 2 : i32
      %302 = tpu.dynamic_rotate %12 by %c2_i32 dim 1 : vector<2x256xf32>, i32 -> vector<2x256xf32>
      %c2_i32_80 = arith.constant 2 : i32
      %303 = tpu.dynamic_rotate %13 by %c2_i32_80 dim 1 : vector<2x256xf32>, i32 -> vector<2x256xf32>
      %c22 = arith.constant 22 : index
      %304 = memref.load %arg2[%c22] : memref<98xf32, #tpu.memory_space<smem>>
      %305 = vector.broadcast %304 : f32 to vector<2x256xf32>
      %306 = arith.mulf %302, %305 : vector<2x256xf32>
      %c71 = arith.constant 71 : index
      %307 = memref.load %arg2[%c71] : memref<98xf32, #tpu.memory_space<smem>>
      %308 = vector.broadcast %307 : f32 to vector<2x256xf32>
      %309 = arith.mulf %303, %308 : vector<2x256xf32>
      %310 = arith.addf %306, %309 : vector<2x256xf32>
      %c22_81 = arith.constant 22 : index
      %c0_82 = arith.constant 0 : index
      %311 = vector.load %arg4[%c22_81, %c0_82] : memref<49x256xf32, #tpu.memory_space<vmem>>, vector<1x256xf32>
      %312 = vector.broadcast %311 : vector<1x256xf32> to vector<2x256xf32>
      %313 = arith.mulf %310, %312 : vector<2x256xf32>
      %314 = arith.addf %301, %313 : vector<2x256xf32>
      %c1_i32 = arith.constant 1 : i32
      %315 = tpu.dynamic_rotate %12 by %c1_i32 dim 1 : vector<2x256xf32>, i32 -> vector<2x256xf32>
      %c1_i32_83 = arith.constant 1 : i32
      %316 = tpu.dynamic_rotate %13 by %c1_i32_83 dim 1 : vector<2x256xf32>, i32 -> vector<2x256xf32>
      %c23 = arith.constant 23 : index
      %317 = memref.load %arg2[%c23] : memref<98xf32, #tpu.memory_space<smem>>
      %318 = vector.broadcast %317 : f32 to vector<2x256xf32>
      %319 = arith.mulf %315, %318 : vector<2x256xf32>
      %c72 = arith.constant 72 : index
      %320 = memref.load %arg2[%c72] : memref<98xf32, #tpu.memory_space<smem>>
      %321 = vector.broadcast %320 : f32 to vector<2x256xf32>
      %322 = arith.mulf %316, %321 : vector<2x256xf32>
      %323 = arith.addf %319, %322 : vector<2x256xf32>
      %c23_84 = arith.constant 23 : index
      %c0_85 = arith.constant 0 : index
      %324 = vector.load %arg4[%c23_84, %c0_85] : memref<49x256xf32, #tpu.memory_space<vmem>>, vector<1x256xf32>
      %325 = vector.broadcast %324 : vector<1x256xf32> to vector<2x256xf32>
      %326 = arith.mulf %323, %325 : vector<2x256xf32>
      %327 = arith.addf %314, %326 : vector<2x256xf32>
      %c24 = arith.constant 24 : index
      %328 = memref.load %arg2[%c24] : memref<98xf32, #tpu.memory_space<smem>>
      %329 = vector.broadcast %328 : f32 to vector<2x256xf32>
      %330 = arith.mulf %12, %329 : vector<2x256xf32>
      %c73 = arith.constant 73 : index
      %331 = memref.load %arg2[%c73] : memref<98xf32, #tpu.memory_space<smem>>
      %332 = vector.broadcast %331 : f32 to vector<2x256xf32>
      %333 = arith.mulf %13, %332 : vector<2x256xf32>
      %334 = arith.addf %330, %333 : vector<2x256xf32>
      %c24_86 = arith.constant 24 : index
      %c0_87 = arith.constant 0 : index
      %335 = vector.load %arg4[%c24_86, %c0_87] : memref<49x256xf32, #tpu.memory_space<vmem>>, vector<1x256xf32>
      %336 = vector.broadcast %335 : vector<1x256xf32> to vector<2x256xf32>
      %337 = arith.mulf %334, %336 : vector<2x256xf32>
      %338 = arith.addf %327, %337 : vector<2x256xf32>
      %c255_i32 = arith.constant 255 : i32
      %339 = tpu.dynamic_rotate %12 by %c255_i32 dim 1 : vector<2x256xf32>, i32 -> vector<2x256xf32>
      %c255_i32_88 = arith.constant 255 : i32
      %340 = tpu.dynamic_rotate %13 by %c255_i32_88 dim 1 : vector<2x256xf32>, i32 -> vector<2x256xf32>
      %c25 = arith.constant 25 : index
      %341 = memref.load %arg2[%c25] : memref<98xf32, #tpu.memory_space<smem>>
      %342 = vector.broadcast %341 : f32 to vector<2x256xf32>
      %343 = arith.mulf %339, %342 : vector<2x256xf32>
      %c74 = arith.constant 74 : index
      %344 = memref.load %arg2[%c74] : memref<98xf32, #tpu.memory_space<smem>>
      %345 = vector.broadcast %344 : f32 to vector<2x256xf32>
      %346 = arith.mulf %340, %345 : vector<2x256xf32>
      %347 = arith.addf %343, %346 : vector<2x256xf32>
      %c25_89 = arith.constant 25 : index
      %c0_90 = arith.constant 0 : index
      %348 = vector.load %arg4[%c25_89, %c0_90] : memref<49x256xf32, #tpu.memory_space<vmem>>, vector<1x256xf32>
      %349 = vector.broadcast %348 : vector<1x256xf32> to vector<2x256xf32>
      %350 = arith.mulf %347, %349 : vector<2x256xf32>
      %351 = arith.addf %338, %350 : vector<2x256xf32>
      %c254_i32 = arith.constant 254 : i32
      %352 = tpu.dynamic_rotate %12 by %c254_i32 dim 1 : vector<2x256xf32>, i32 -> vector<2x256xf32>
      %c254_i32_91 = arith.constant 254 : i32
      %353 = tpu.dynamic_rotate %13 by %c254_i32_91 dim 1 : vector<2x256xf32>, i32 -> vector<2x256xf32>
      %c26 = arith.constant 26 : index
      %354 = memref.load %arg2[%c26] : memref<98xf32, #tpu.memory_space<smem>>
      %355 = vector.broadcast %354 : f32 to vector<2x256xf32>
      %356 = arith.mulf %352, %355 : vector<2x256xf32>
      %c75 = arith.constant 75 : index
      %357 = memref.load %arg2[%c75] : memref<98xf32, #tpu.memory_space<smem>>
      %358 = vector.broadcast %357 : f32 to vector<2x256xf32>
      %359 = arith.mulf %353, %358 : vector<2x256xf32>
      %360 = arith.addf %356, %359 : vector<2x256xf32>
      %c26_92 = arith.constant 26 : index
      %c0_93 = arith.constant 0 : index
      %361 = vector.load %arg4[%c26_92, %c0_93] : memref<49x256xf32, #tpu.memory_space<vmem>>, vector<1x256xf32>
      %362 = vector.broadcast %361 : vector<1x256xf32> to vector<2x256xf32>
      %363 = arith.mulf %360, %362 : vector<2x256xf32>
      %364 = arith.addf %351, %363 : vector<2x256xf32>
      %c253_i32 = arith.constant 253 : i32
      %365 = tpu.dynamic_rotate %12 by %c253_i32 dim 1 : vector<2x256xf32>, i32 -> vector<2x256xf32>
      %c253_i32_94 = arith.constant 253 : i32
      %366 = tpu.dynamic_rotate %13 by %c253_i32_94 dim 1 : vector<2x256xf32>, i32 -> vector<2x256xf32>
      %c27 = arith.constant 27 : index
      %367 = memref.load %arg2[%c27] : memref<98xf32, #tpu.memory_space<smem>>
      %368 = vector.broadcast %367 : f32 to vector<2x256xf32>
      %369 = arith.mulf %365, %368 : vector<2x256xf32>
      %c76 = arith.constant 76 : index
      %370 = memref.load %arg2[%c76] : memref<98xf32, #tpu.memory_space<smem>>
      %371 = vector.broadcast %370 : f32 to vector<2x256xf32>
      %372 = arith.mulf %366, %371 : vector<2x256xf32>
      %373 = arith.addf %369, %372 : vector<2x256xf32>
      %c27_95 = arith.constant 27 : index
      %c0_96 = arith.constant 0 : index
      %374 = vector.load %arg4[%c27_95, %c0_96] : memref<49x256xf32, #tpu.memory_space<vmem>>, vector<1x256xf32>
      %375 = vector.broadcast %374 : vector<1x256xf32> to vector<2x256xf32>
      %376 = arith.mulf %373, %375 : vector<2x256xf32>
      %377 = arith.addf %364, %376 : vector<2x256xf32>
      %c243_i32 = arith.constant 243 : i32
      %378 = tpu.dynamic_rotate %12 by %c243_i32 dim 1 : vector<2x256xf32>, i32 -> vector<2x256xf32>
      %c243_i32_97 = arith.constant 243 : i32
      %379 = tpu.dynamic_rotate %13 by %c243_i32_97 dim 1 : vector<2x256xf32>, i32 -> vector<2x256xf32>
      %c28 = arith.constant 28 : index
      %380 = memref.load %arg2[%c28] : memref<98xf32, #tpu.memory_space<smem>>
      %381 = vector.broadcast %380 : f32 to vector<2x256xf32>
      %382 = arith.mulf %378, %381 : vector<2x256xf32>
      %c77 = arith.constant 77 : index
      %383 = memref.load %arg2[%c77] : memref<98xf32, #tpu.memory_space<smem>>
      %384 = vector.broadcast %383 : f32 to vector<2x256xf32>
      %385 = arith.mulf %379, %384 : vector<2x256xf32>
      %386 = arith.addf %382, %385 : vector<2x256xf32>
      %c28_98 = arith.constant 28 : index
      %c0_99 = arith.constant 0 : index
      %387 = vector.load %arg4[%c28_98, %c0_99] : memref<49x256xf32, #tpu.memory_space<vmem>>, vector<1x256xf32>
      %388 = vector.broadcast %387 : vector<1x256xf32> to vector<2x256xf32>
      %389 = arith.mulf %386, %388 : vector<2x256xf32>
      %390 = arith.addf %377, %389 : vector<2x256xf32>
      %c242_i32 = arith.constant 242 : i32
      %391 = tpu.dynamic_rotate %12 by %c242_i32 dim 1 : vector<2x256xf32>, i32 -> vector<2x256xf32>
      %c242_i32_100 = arith.constant 242 : i32
      %392 = tpu.dynamic_rotate %13 by %c242_i32_100 dim 1 : vector<2x256xf32>, i32 -> vector<2x256xf32>
      %c29 = arith.constant 29 : index
      %393 = memref.load %arg2[%c29] : memref<98xf32, #tpu.memory_space<smem>>
      %394 = vector.broadcast %393 : f32 to vector<2x256xf32>
      %395 = arith.mulf %391, %394 : vector<2x256xf32>
      %c78 = arith.constant 78 : index
      %396 = memref.load %arg2[%c78] : memref<98xf32, #tpu.memory_space<smem>>
      %397 = vector.broadcast %396 : f32 to vector<2x256xf32>
      %398 = arith.mulf %392, %397 : vector<2x256xf32>
      %399 = arith.addf %395, %398 : vector<2x256xf32>
      %c29_101 = arith.constant 29 : index
      %c0_102 = arith.constant 0 : index
      %400 = vector.load %arg4[%c29_101, %c0_102] : memref<49x256xf32, #tpu.memory_space<vmem>>, vector<1x256xf32>
      %401 = vector.broadcast %400 : vector<1x256xf32> to vector<2x256xf32>
      %402 = arith.mulf %399, %401 : vector<2x256xf32>
      %403 = arith.addf %390, %402 : vector<2x256xf32>
      %c241_i32 = arith.constant 241 : i32
      %404 = tpu.dynamic_rotate %12 by %c241_i32 dim 1 : vector<2x256xf32>, i32 -> vector<2x256xf32>
      %c241_i32_103 = arith.constant 241 : i32
      %405 = tpu.dynamic_rotate %13 by %c241_i32_103 dim 1 : vector<2x256xf32>, i32 -> vector<2x256xf32>
      %c30 = arith.constant 30 : index
      %406 = memref.load %arg2[%c30] : memref<98xf32, #tpu.memory_space<smem>>
      %407 = vector.broadcast %406 : f32 to vector<2x256xf32>
      %408 = arith.mulf %404, %407 : vector<2x256xf32>
      %c79 = arith.constant 79 : index
      %409 = memref.load %arg2[%c79] : memref<98xf32, #tpu.memory_space<smem>>
      %410 = vector.broadcast %409 : f32 to vector<2x256xf32>
      %411 = arith.mulf %405, %410 : vector<2x256xf32>
      %412 = arith.addf %408, %411 : vector<2x256xf32>
      %c30_104 = arith.constant 30 : index
      %c0_105 = arith.constant 0 : index
      %413 = vector.load %arg4[%c30_104, %c0_105] : memref<49x256xf32, #tpu.memory_space<vmem>>, vector<1x256xf32>
      %414 = vector.broadcast %413 : vector<1x256xf32> to vector<2x256xf32>
      %415 = arith.mulf %412, %414 : vector<2x256xf32>
      %416 = arith.addf %403, %415 : vector<2x256xf32>
      %c240_i32 = arith.constant 240 : i32
      %417 = tpu.dynamic_rotate %12 by %c240_i32 dim 1 : vector<2x256xf32>, i32 -> vector<2x256xf32>
      %c240_i32_106 = arith.constant 240 : i32
      %418 = tpu.dynamic_rotate %13 by %c240_i32_106 dim 1 : vector<2x256xf32>, i32 -> vector<2x256xf32>
      %c31 = arith.constant 31 : index
      %419 = memref.load %arg2[%c31] : memref<98xf32, #tpu.memory_space<smem>>
      %420 = vector.broadcast %419 : f32 to vector<2x256xf32>
      %421 = arith.mulf %417, %420 : vector<2x256xf32>
      %c80 = arith.constant 80 : index
      %422 = memref.load %arg2[%c80] : memref<98xf32, #tpu.memory_space<smem>>
      %423 = vector.broadcast %422 : f32 to vector<2x256xf32>
      %424 = arith.mulf %418, %423 : vector<2x256xf32>
      %425 = arith.addf %421, %424 : vector<2x256xf32>
      %c31_107 = arith.constant 31 : index
      %c0_108 = arith.constant 0 : index
      %426 = vector.load %arg4[%c31_107, %c0_108] : memref<49x256xf32, #tpu.memory_space<vmem>>, vector<1x256xf32>
      %427 = vector.broadcast %426 : vector<1x256xf32> to vector<2x256xf32>
      %428 = arith.mulf %425, %427 : vector<2x256xf32>
      %429 = arith.addf %416, %428 : vector<2x256xf32>
      %c239_i32 = arith.constant 239 : i32
      %430 = tpu.dynamic_rotate %12 by %c239_i32 dim 1 : vector<2x256xf32>, i32 -> vector<2x256xf32>
      %c239_i32_109 = arith.constant 239 : i32
      %431 = tpu.dynamic_rotate %13 by %c239_i32_109 dim 1 : vector<2x256xf32>, i32 -> vector<2x256xf32>
      %c32 = arith.constant 32 : index
      %432 = memref.load %arg2[%c32] : memref<98xf32, #tpu.memory_space<smem>>
      %433 = vector.broadcast %432 : f32 to vector<2x256xf32>
      %434 = arith.mulf %430, %433 : vector<2x256xf32>
      %c81 = arith.constant 81 : index
      %435 = memref.load %arg2[%c81] : memref<98xf32, #tpu.memory_space<smem>>
      %436 = vector.broadcast %435 : f32 to vector<2x256xf32>
      %437 = arith.mulf %431, %436 : vector<2x256xf32>
      %438 = arith.addf %434, %437 : vector<2x256xf32>
      %c32_110 = arith.constant 32 : index
      %c0_111 = arith.constant 0 : index
      %439 = vector.load %arg4[%c32_110, %c0_111] : memref<49x256xf32, #tpu.memory_space<vmem>>, vector<1x256xf32>
      %440 = vector.broadcast %439 : vector<1x256xf32> to vector<2x256xf32>
      %441 = arith.mulf %438, %440 : vector<2x256xf32>
      %442 = arith.addf %429, %441 : vector<2x256xf32>
      %c238_i32 = arith.constant 238 : i32
      %443 = tpu.dynamic_rotate %12 by %c238_i32 dim 1 : vector<2x256xf32>, i32 -> vector<2x256xf32>
      %c238_i32_112 = arith.constant 238 : i32
      %444 = tpu.dynamic_rotate %13 by %c238_i32_112 dim 1 : vector<2x256xf32>, i32 -> vector<2x256xf32>
      %c33 = arith.constant 33 : index
      %445 = memref.load %arg2[%c33] : memref<98xf32, #tpu.memory_space<smem>>
      %446 = vector.broadcast %445 : f32 to vector<2x256xf32>
      %447 = arith.mulf %443, %446 : vector<2x256xf32>
      %c82 = arith.constant 82 : index
      %448 = memref.load %arg2[%c82] : memref<98xf32, #tpu.memory_space<smem>>
      %449 = vector.broadcast %448 : f32 to vector<2x256xf32>
      %450 = arith.mulf %444, %449 : vector<2x256xf32>
      %451 = arith.addf %447, %450 : vector<2x256xf32>
      %c33_113 = arith.constant 33 : index
      %c0_114 = arith.constant 0 : index
      %452 = vector.load %arg4[%c33_113, %c0_114] : memref<49x256xf32, #tpu.memory_space<vmem>>, vector<1x256xf32>
      %453 = vector.broadcast %452 : vector<1x256xf32> to vector<2x256xf32>
      %454 = arith.mulf %451, %453 : vector<2x256xf32>
      %455 = arith.addf %442, %454 : vector<2x256xf32>
      %c237_i32 = arith.constant 237 : i32
      %456 = tpu.dynamic_rotate %12 by %c237_i32 dim 1 : vector<2x256xf32>, i32 -> vector<2x256xf32>
      %c237_i32_115 = arith.constant 237 : i32
      %457 = tpu.dynamic_rotate %13 by %c237_i32_115 dim 1 : vector<2x256xf32>, i32 -> vector<2x256xf32>
      %c34 = arith.constant 34 : index
      %458 = memref.load %arg2[%c34] : memref<98xf32, #tpu.memory_space<smem>>
      %459 = vector.broadcast %458 : f32 to vector<2x256xf32>
      %460 = arith.mulf %456, %459 : vector<2x256xf32>
      %c83 = arith.constant 83 : index
      %461 = memref.load %arg2[%c83] : memref<98xf32, #tpu.memory_space<smem>>
      %462 = vector.broadcast %461 : f32 to vector<2x256xf32>
      %463 = arith.mulf %457, %462 : vector<2x256xf32>
      %464 = arith.addf %460, %463 : vector<2x256xf32>
      %c34_116 = arith.constant 34 : index
      %c0_117 = arith.constant 0 : index
      %465 = vector.load %arg4[%c34_116, %c0_117] : memref<49x256xf32, #tpu.memory_space<vmem>>, vector<1x256xf32>
      %466 = vector.broadcast %465 : vector<1x256xf32> to vector<2x256xf32>
      %467 = arith.mulf %464, %466 : vector<2x256xf32>
      %468 = arith.addf %455, %467 : vector<2x256xf32>
      %c227_i32 = arith.constant 227 : i32
      %469 = tpu.dynamic_rotate %12 by %c227_i32 dim 1 : vector<2x256xf32>, i32 -> vector<2x256xf32>
      %c227_i32_118 = arith.constant 227 : i32
      %470 = tpu.dynamic_rotate %13 by %c227_i32_118 dim 1 : vector<2x256xf32>, i32 -> vector<2x256xf32>
      %c35 = arith.constant 35 : index
      %471 = memref.load %arg2[%c35] : memref<98xf32, #tpu.memory_space<smem>>
      %472 = vector.broadcast %471 : f32 to vector<2x256xf32>
      %473 = arith.mulf %469, %472 : vector<2x256xf32>
      %c84 = arith.constant 84 : index
      %474 = memref.load %arg2[%c84] : memref<98xf32, #tpu.memory_space<smem>>
      %475 = vector.broadcast %474 : f32 to vector<2x256xf32>
      %476 = arith.mulf %470, %475 : vector<2x256xf32>
      %477 = arith.addf %473, %476 : vector<2x256xf32>
      %c35_119 = arith.constant 35 : index
      %c0_120 = arith.constant 0 : index
      %478 = vector.load %arg4[%c35_119, %c0_120] : memref<49x256xf32, #tpu.memory_space<vmem>>, vector<1x256xf32>
      %479 = vector.broadcast %478 : vector<1x256xf32> to vector<2x256xf32>
      %480 = arith.mulf %477, %479 : vector<2x256xf32>
      %481 = arith.addf %468, %480 : vector<2x256xf32>
      %c226_i32 = arith.constant 226 : i32
      %482 = tpu.dynamic_rotate %12 by %c226_i32 dim 1 : vector<2x256xf32>, i32 -> vector<2x256xf32>
      %c226_i32_121 = arith.constant 226 : i32
      %483 = tpu.dynamic_rotate %13 by %c226_i32_121 dim 1 : vector<2x256xf32>, i32 -> vector<2x256xf32>
      %c36 = arith.constant 36 : index
      %484 = memref.load %arg2[%c36] : memref<98xf32, #tpu.memory_space<smem>>
      %485 = vector.broadcast %484 : f32 to vector<2x256xf32>
      %486 = arith.mulf %482, %485 : vector<2x256xf32>
      %c85 = arith.constant 85 : index
      %487 = memref.load %arg2[%c85] : memref<98xf32, #tpu.memory_space<smem>>
      %488 = vector.broadcast %487 : f32 to vector<2x256xf32>
      %489 = arith.mulf %483, %488 : vector<2x256xf32>
      %490 = arith.addf %486, %489 : vector<2x256xf32>
      %c36_122 = arith.constant 36 : index
      %c0_123 = arith.constant 0 : index
      %491 = vector.load %arg4[%c36_122, %c0_123] : memref<49x256xf32, #tpu.memory_space<vmem>>, vector<1x256xf32>
      %492 = vector.broadcast %491 : vector<1x256xf32> to vector<2x256xf32>
      %493 = arith.mulf %490, %492 : vector<2x256xf32>
      %494 = arith.addf %481, %493 : vector<2x256xf32>
      %c225_i32 = arith.constant 225 : i32
      %495 = tpu.dynamic_rotate %12 by %c225_i32 dim 1 : vector<2x256xf32>, i32 -> vector<2x256xf32>
      %c225_i32_124 = arith.constant 225 : i32
      %496 = tpu.dynamic_rotate %13 by %c225_i32_124 dim 1 : vector<2x256xf32>, i32 -> vector<2x256xf32>
      %c37 = arith.constant 37 : index
      %497 = memref.load %arg2[%c37] : memref<98xf32, #tpu.memory_space<smem>>
      %498 = vector.broadcast %497 : f32 to vector<2x256xf32>
      %499 = arith.mulf %495, %498 : vector<2x256xf32>
      %c86 = arith.constant 86 : index
      %500 = memref.load %arg2[%c86] : memref<98xf32, #tpu.memory_space<smem>>
      %501 = vector.broadcast %500 : f32 to vector<2x256xf32>
      %502 = arith.mulf %496, %501 : vector<2x256xf32>
      %503 = arith.addf %499, %502 : vector<2x256xf32>
      %c37_125 = arith.constant 37 : index
      %c0_126 = arith.constant 0 : index
      %504 = vector.load %arg4[%c37_125, %c0_126] : memref<49x256xf32, #tpu.memory_space<vmem>>, vector<1x256xf32>
      %505 = vector.broadcast %504 : vector<1x256xf32> to vector<2x256xf32>
      %506 = arith.mulf %503, %505 : vector<2x256xf32>
      %507 = arith.addf %494, %506 : vector<2x256xf32>
      %c224_i32 = arith.constant 224 : i32
      %508 = tpu.dynamic_rotate %12 by %c224_i32 dim 1 : vector<2x256xf32>, i32 -> vector<2x256xf32>
      %c224_i32_127 = arith.constant 224 : i32
      %509 = tpu.dynamic_rotate %13 by %c224_i32_127 dim 1 : vector<2x256xf32>, i32 -> vector<2x256xf32>
      %c38 = arith.constant 38 : index
      %510 = memref.load %arg2[%c38] : memref<98xf32, #tpu.memory_space<smem>>
      %511 = vector.broadcast %510 : f32 to vector<2x256xf32>
      %512 = arith.mulf %508, %511 : vector<2x256xf32>
      %c87 = arith.constant 87 : index
      %513 = memref.load %arg2[%c87] : memref<98xf32, #tpu.memory_space<smem>>
      %514 = vector.broadcast %513 : f32 to vector<2x256xf32>
      %515 = arith.mulf %509, %514 : vector<2x256xf32>
      %516 = arith.addf %512, %515 : vector<2x256xf32>
      %c38_128 = arith.constant 38 : index
      %c0_129 = arith.constant 0 : index
      %517 = vector.load %arg4[%c38_128, %c0_129] : memref<49x256xf32, #tpu.memory_space<vmem>>, vector<1x256xf32>
      %518 = vector.broadcast %517 : vector<1x256xf32> to vector<2x256xf32>
      %519 = arith.mulf %516, %518 : vector<2x256xf32>
      %520 = arith.addf %507, %519 : vector<2x256xf32>
      %c223_i32 = arith.constant 223 : i32
      %521 = tpu.dynamic_rotate %12 by %c223_i32 dim 1 : vector<2x256xf32>, i32 -> vector<2x256xf32>
      %c223_i32_130 = arith.constant 223 : i32
      %522 = tpu.dynamic_rotate %13 by %c223_i32_130 dim 1 : vector<2x256xf32>, i32 -> vector<2x256xf32>
      %c39 = arith.constant 39 : index
      %523 = memref.load %arg2[%c39] : memref<98xf32, #tpu.memory_space<smem>>
      %524 = vector.broadcast %523 : f32 to vector<2x256xf32>
      %525 = arith.mulf %521, %524 : vector<2x256xf32>
      %c88 = arith.constant 88 : index
      %526 = memref.load %arg2[%c88] : memref<98xf32, #tpu.memory_space<smem>>
      %527 = vector.broadcast %526 : f32 to vector<2x256xf32>
      %528 = arith.mulf %522, %527 : vector<2x256xf32>
      %529 = arith.addf %525, %528 : vector<2x256xf32>
      %c39_131 = arith.constant 39 : index
      %c0_132 = arith.constant 0 : index
      %530 = vector.load %arg4[%c39_131, %c0_132] : memref<49x256xf32, #tpu.memory_space<vmem>>, vector<1x256xf32>
      %531 = vector.broadcast %530 : vector<1x256xf32> to vector<2x256xf32>
      %532 = arith.mulf %529, %531 : vector<2x256xf32>
      %533 = arith.addf %520, %532 : vector<2x256xf32>
      %c222_i32 = arith.constant 222 : i32
      %534 = tpu.dynamic_rotate %12 by %c222_i32 dim 1 : vector<2x256xf32>, i32 -> vector<2x256xf32>
      %c222_i32_133 = arith.constant 222 : i32
      %535 = tpu.dynamic_rotate %13 by %c222_i32_133 dim 1 : vector<2x256xf32>, i32 -> vector<2x256xf32>
      %c40 = arith.constant 40 : index
      %536 = memref.load %arg2[%c40] : memref<98xf32, #tpu.memory_space<smem>>
      %537 = vector.broadcast %536 : f32 to vector<2x256xf32>
      %538 = arith.mulf %534, %537 : vector<2x256xf32>
      %c89 = arith.constant 89 : index
      %539 = memref.load %arg2[%c89] : memref<98xf32, #tpu.memory_space<smem>>
      %540 = vector.broadcast %539 : f32 to vector<2x256xf32>
      %541 = arith.mulf %535, %540 : vector<2x256xf32>
      %542 = arith.addf %538, %541 : vector<2x256xf32>
      %c40_134 = arith.constant 40 : index
      %c0_135 = arith.constant 0 : index
      %543 = vector.load %arg4[%c40_134, %c0_135] : memref<49x256xf32, #tpu.memory_space<vmem>>, vector<1x256xf32>
      %544 = vector.broadcast %543 : vector<1x256xf32> to vector<2x256xf32>
      %545 = arith.mulf %542, %544 : vector<2x256xf32>
      %546 = arith.addf %533, %545 : vector<2x256xf32>
      %c221_i32 = arith.constant 221 : i32
      %547 = tpu.dynamic_rotate %12 by %c221_i32 dim 1 : vector<2x256xf32>, i32 -> vector<2x256xf32>
      %c221_i32_136 = arith.constant 221 : i32
      %548 = tpu.dynamic_rotate %13 by %c221_i32_136 dim 1 : vector<2x256xf32>, i32 -> vector<2x256xf32>
      %c41 = arith.constant 41 : index
      %549 = memref.load %arg2[%c41] : memref<98xf32, #tpu.memory_space<smem>>
      %550 = vector.broadcast %549 : f32 to vector<2x256xf32>
      %551 = arith.mulf %547, %550 : vector<2x256xf32>
      %c90 = arith.constant 90 : index
      %552 = memref.load %arg2[%c90] : memref<98xf32, #tpu.memory_space<smem>>
      %553 = vector.broadcast %552 : f32 to vector<2x256xf32>
      %554 = arith.mulf %548, %553 : vector<2x256xf32>
      %555 = arith.addf %551, %554 : vector<2x256xf32>
      %c41_137 = arith.constant 41 : index
      %c0_138 = arith.constant 0 : index
      %556 = vector.load %arg4[%c41_137, %c0_138] : memref<49x256xf32, #tpu.memory_space<vmem>>, vector<1x256xf32>
      %557 = vector.broadcast %556 : vector<1x256xf32> to vector<2x256xf32>
      %558 = arith.mulf %555, %557 : vector<2x256xf32>
      %559 = arith.addf %546, %558 : vector<2x256xf32>
      %c211_i32 = arith.constant 211 : i32
      %560 = tpu.dynamic_rotate %12 by %c211_i32 dim 1 : vector<2x256xf32>, i32 -> vector<2x256xf32>
      %c211_i32_139 = arith.constant 211 : i32
      %561 = tpu.dynamic_rotate %13 by %c211_i32_139 dim 1 : vector<2x256xf32>, i32 -> vector<2x256xf32>
      %c42 = arith.constant 42 : index
      %562 = memref.load %arg2[%c42] : memref<98xf32, #tpu.memory_space<smem>>
      %563 = vector.broadcast %562 : f32 to vector<2x256xf32>
      %564 = arith.mulf %560, %563 : vector<2x256xf32>
      %c91 = arith.constant 91 : index
      %565 = memref.load %arg2[%c91] : memref<98xf32, #tpu.memory_space<smem>>
      %566 = vector.broadcast %565 : f32 to vector<2x256xf32>
      %567 = arith.mulf %561, %566 : vector<2x256xf32>
      %568 = arith.addf %564, %567 : vector<2x256xf32>
      %c42_140 = arith.constant 42 : index
      %c0_141 = arith.constant 0 : index
      %569 = vector.load %arg4[%c42_140, %c0_141] : memref<49x256xf32, #tpu.memory_space<vmem>>, vector<1x256xf32>
      %570 = vector.broadcast %569 : vector<1x256xf32> to vector<2x256xf32>
      %571 = arith.mulf %568, %570 : vector<2x256xf32>
      %572 = arith.addf %559, %571 : vector<2x256xf32>
      %c210_i32 = arith.constant 210 : i32
      %573 = tpu.dynamic_rotate %12 by %c210_i32 dim 1 : vector<2x256xf32>, i32 -> vector<2x256xf32>
      %c210_i32_142 = arith.constant 210 : i32
      %574 = tpu.dynamic_rotate %13 by %c210_i32_142 dim 1 : vector<2x256xf32>, i32 -> vector<2x256xf32>
      %c43 = arith.constant 43 : index
      %575 = memref.load %arg2[%c43] : memref<98xf32, #tpu.memory_space<smem>>
      %576 = vector.broadcast %575 : f32 to vector<2x256xf32>
      %577 = arith.mulf %573, %576 : vector<2x256xf32>
      %c92 = arith.constant 92 : index
      %578 = memref.load %arg2[%c92] : memref<98xf32, #tpu.memory_space<smem>>
      %579 = vector.broadcast %578 : f32 to vector<2x256xf32>
      %580 = arith.mulf %574, %579 : vector<2x256xf32>
      %581 = arith.addf %577, %580 : vector<2x256xf32>
      %c43_143 = arith.constant 43 : index
      %c0_144 = arith.constant 0 : index
      %582 = vector.load %arg4[%c43_143, %c0_144] : memref<49x256xf32, #tpu.memory_space<vmem>>, vector<1x256xf32>
      %583 = vector.broadcast %582 : vector<1x256xf32> to vector<2x256xf32>
      %584 = arith.mulf %581, %583 : vector<2x256xf32>
      %585 = arith.addf %572, %584 : vector<2x256xf32>
      %c209_i32 = arith.constant 209 : i32
      %586 = tpu.dynamic_rotate %12 by %c209_i32 dim 1 : vector<2x256xf32>, i32 -> vector<2x256xf32>
      %c209_i32_145 = arith.constant 209 : i32
      %587 = tpu.dynamic_rotate %13 by %c209_i32_145 dim 1 : vector<2x256xf32>, i32 -> vector<2x256xf32>
      %c44 = arith.constant 44 : index
      %588 = memref.load %arg2[%c44] : memref<98xf32, #tpu.memory_space<smem>>
      %589 = vector.broadcast %588 : f32 to vector<2x256xf32>
      %590 = arith.mulf %586, %589 : vector<2x256xf32>
      %c93 = arith.constant 93 : index
      %591 = memref.load %arg2[%c93] : memref<98xf32, #tpu.memory_space<smem>>
      %592 = vector.broadcast %591 : f32 to vector<2x256xf32>
      %593 = arith.mulf %587, %592 : vector<2x256xf32>
      %594 = arith.addf %590, %593 : vector<2x256xf32>
      %c44_146 = arith.constant 44 : index
      %c0_147 = arith.constant 0 : index
      %595 = vector.load %arg4[%c44_146, %c0_147] : memref<49x256xf32, #tpu.memory_space<vmem>>, vector<1x256xf32>
      %596 = vector.broadcast %595 : vector<1x256xf32> to vector<2x256xf32>
      %597 = arith.mulf %594, %596 : vector<2x256xf32>
      %598 = arith.addf %585, %597 : vector<2x256xf32>
      %c208_i32 = arith.constant 208 : i32
      %599 = tpu.dynamic_rotate %12 by %c208_i32 dim 1 : vector<2x256xf32>, i32 -> vector<2x256xf32>
      %c208_i32_148 = arith.constant 208 : i32
      %600 = tpu.dynamic_rotate %13 by %c208_i32_148 dim 1 : vector<2x256xf32>, i32 -> vector<2x256xf32>
      %c45 = arith.constant 45 : index
      %601 = memref.load %arg2[%c45] : memref<98xf32, #tpu.memory_space<smem>>
      %602 = vector.broadcast %601 : f32 to vector<2x256xf32>
      %603 = arith.mulf %599, %602 : vector<2x256xf32>
      %c94 = arith.constant 94 : index
      %604 = memref.load %arg2[%c94] : memref<98xf32, #tpu.memory_space<smem>>
      %605 = vector.broadcast %604 : f32 to vector<2x256xf32>
      %606 = arith.mulf %600, %605 : vector<2x256xf32>
      %607 = arith.addf %603, %606 : vector<2x256xf32>
      %c45_149 = arith.constant 45 : index
      %c0_150 = arith.constant 0 : index
      %608 = vector.load %arg4[%c45_149, %c0_150] : memref<49x256xf32, #tpu.memory_space<vmem>>, vector<1x256xf32>
      %609 = vector.broadcast %608 : vector<1x256xf32> to vector<2x256xf32>
      %610 = arith.mulf %607, %609 : vector<2x256xf32>
      %611 = arith.addf %598, %610 : vector<2x256xf32>
      %c207_i32 = arith.constant 207 : i32
      %612 = tpu.dynamic_rotate %12 by %c207_i32 dim 1 : vector<2x256xf32>, i32 -> vector<2x256xf32>
      %c207_i32_151 = arith.constant 207 : i32
      %613 = tpu.dynamic_rotate %13 by %c207_i32_151 dim 1 : vector<2x256xf32>, i32 -> vector<2x256xf32>
      %c46 = arith.constant 46 : index
      %614 = memref.load %arg2[%c46] : memref<98xf32, #tpu.memory_space<smem>>
      %615 = vector.broadcast %614 : f32 to vector<2x256xf32>
      %616 = arith.mulf %612, %615 : vector<2x256xf32>
      %c95 = arith.constant 95 : index
      %617 = memref.load %arg2[%c95] : memref<98xf32, #tpu.memory_space<smem>>
      %618 = vector.broadcast %617 : f32 to vector<2x256xf32>
      %619 = arith.mulf %613, %618 : vector<2x256xf32>
      %620 = arith.addf %616, %619 : vector<2x256xf32>
      %c46_152 = arith.constant 46 : index
      %c0_153 = arith.constant 0 : index
      %621 = vector.load %arg4[%c46_152, %c0_153] : memref<49x256xf32, #tpu.memory_space<vmem>>, vector<1x256xf32>
      %622 = vector.broadcast %621 : vector<1x256xf32> to vector<2x256xf32>
      %623 = arith.mulf %620, %622 : vector<2x256xf32>
      %624 = arith.addf %611, %623 : vector<2x256xf32>
      %c206_i32 = arith.constant 206 : i32
      %625 = tpu.dynamic_rotate %12 by %c206_i32 dim 1 : vector<2x256xf32>, i32 -> vector<2x256xf32>
      %c206_i32_154 = arith.constant 206 : i32
      %626 = tpu.dynamic_rotate %13 by %c206_i32_154 dim 1 : vector<2x256xf32>, i32 -> vector<2x256xf32>
      %c47 = arith.constant 47 : index
      %627 = memref.load %arg2[%c47] : memref<98xf32, #tpu.memory_space<smem>>
      %628 = vector.broadcast %627 : f32 to vector<2x256xf32>
      %629 = arith.mulf %625, %628 : vector<2x256xf32>
      %c96 = arith.constant 96 : index
      %630 = memref.load %arg2[%c96] : memref<98xf32, #tpu.memory_space<smem>>
      %631 = vector.broadcast %630 : f32 to vector<2x256xf32>
      %632 = arith.mulf %626, %631 : vector<2x256xf32>
      %633 = arith.addf %629, %632 : vector<2x256xf32>
      %c47_155 = arith.constant 47 : index
      %c0_156 = arith.constant 0 : index
      %634 = vector.load %arg4[%c47_155, %c0_156] : memref<49x256xf32, #tpu.memory_space<vmem>>, vector<1x256xf32>
      %635 = vector.broadcast %634 : vector<1x256xf32> to vector<2x256xf32>
      %636 = arith.mulf %633, %635 : vector<2x256xf32>
      %637 = arith.addf %624, %636 : vector<2x256xf32>
      %c205_i32 = arith.constant 205 : i32
      %638 = tpu.dynamic_rotate %12 by %c205_i32 dim 1 : vector<2x256xf32>, i32 -> vector<2x256xf32>
      %c205_i32_157 = arith.constant 205 : i32
      %639 = tpu.dynamic_rotate %13 by %c205_i32_157 dim 1 : vector<2x256xf32>, i32 -> vector<2x256xf32>
      %c48 = arith.constant 48 : index
      %640 = memref.load %arg2[%c48] : memref<98xf32, #tpu.memory_space<smem>>
      %641 = vector.broadcast %640 : f32 to vector<2x256xf32>
      %642 = arith.mulf %638, %641 : vector<2x256xf32>
      %c97 = arith.constant 97 : index
      %643 = memref.load %arg2[%c97] : memref<98xf32, #tpu.memory_space<smem>>
      %644 = vector.broadcast %643 : f32 to vector<2x256xf32>
      %645 = arith.mulf %639, %644 : vector<2x256xf32>
      %646 = arith.addf %642, %645 : vector<2x256xf32>
      %c48_158 = arith.constant 48 : index
      %c0_159 = arith.constant 0 : index
      %647 = vector.load %arg4[%c48_158, %c0_159] : memref<49x256xf32, #tpu.memory_space<vmem>>, vector<1x256xf32>
      %648 = vector.broadcast %647 : vector<1x256xf32> to vector<2x256xf32>
      %649 = arith.mulf %646, %648 : vector<2x256xf32>
      %650 = arith.addf %637, %649 : vector<2x256xf32>
      %651 = arith.negf %650 : vector<2x256xf32>
      %652 = math.exp %651 : vector<2x256xf32>
      %cst_160 = arith.constant 1.000000e+00 : f32
      %653 = vector.broadcast %cst_160 : f32 to vector<2x256xf32>
      %654 = arith.addf %653, %652 : vector<2x256xf32>
      %655 = arith.divf %653, %654 : vector<2x256xf32>
      %c0_161 = arith.constant 0 : index
      %c0_162 = arith.constant 0 : index
      %656 = vector.load %arg6[%c0_161, %c0_162] : memref<2x256xf32, #tpu.memory_space<vmem>>, vector<2x256xf32>
      tpu.vector_store %arg6[%c0_161, %c0_162], %655 {strides = array<i32>} : memref<2x256xf32, #tpu.memory_space<vmem>>, vector<2x256xf32>,
    } else {
    }
    return
  }
  func.func @transform_0(%arg0: i32, %arg1: i32) -> i32 {
    %c0_i32 = arith.constant 0 : i32
    %c0_i32_0 = arith.constant 0 : i32
    return %c0_i32 : i32
  }
  func.func @transform_1(%arg0: i32, %arg1: i32) -> i32 {
    %c0_i32 = arith.constant 0 : i32
    %c0_i32_0 = arith.constant 0 : i32
    return %c0_i32 : i32
  }
  func.func @transform_2(%arg0: i32, %arg1: i32) -> (i32, i32) {
    %c0_i32 = arith.constant 0 : i32
    %c0_i32_0 = arith.constant 0 : i32
    %c0_i32_1 = arith.constant 0 : i32
    return %c0_i32, %c0_i32_0 : i32, i32
  }
  func.func @transform_3(%arg0: i32, %arg1: i32) -> (i32, i32, i32) {
    %c0_i32 = arith.constant 0 : i32
    %c0_i32_0 = arith.constant 0 : i32
    return %arg0, %arg1, %c0_i32 : i32, i32, i32
  }
  func.func @transform_4(%arg0: i32, %arg1: i32) -> (i32, i32) {
    %c0_i32 = arith.constant 0 : i32
    %c0_i32_0 = arith.constant 0 : i32
    return %arg0, %c0_i32 : i32, i32
  }
}

</mosaic_0001>

<bundles_post_ra>
// kernel: tpu_custom_call.1
= control target key start
LH: loop header
LB: loop body
LE: loop exit
PB: predicated region body
PF: predicated region fallthrough
CT: control target
= control target key end

     0   :  { %s4836_s0 = inlined_call_operand.vmem [shape: f32[98], index: 0, kind: input, shape index: {}]   ;;  %s4837_s1 = inlined_call_operand.<no memory space> [shape: f32[1], index: 1, kind: input, shape index: {}]   ;;  %s4838_s2 = inlined_call_operand.hbm [shape: f32[49,256], index: 2, kind: input, shape index: {}]   ;;  %s4839_s3 = inlined_call_operand.hbm [shape: f32[2,4,256], index: 3, kind: input, shape index: {}]   ;;  %s4840_s4 = inlined_call_operand.hbm [shape: f32[2,256], index: 4, kind: output, shape index: {}]  }
   0x1   :  { %4905 = sst [smem:[#allocation54_spill]] %s4840_s4 }
   0x2   :  { %10 = vsyncpa [#allocation8], 0 }
   0x3   :  { %11 = vsyncpa [#allocation6], 0 }
   0x4   :  { %12 = vsyncpa [#allocation11], 0 }
   0x5   :  { %13 = vsyncpa [#allocation7], 0  ;;  %s20_s17 = sshll.u32 %s4836_s0, 4  ;;  %s21_s17 = int_to_ptr.vmem [resolvable:$true] %s20_s17 }
   0x6   :  { %s2467_s18 = scalar_lea.vmem %s21_s17, 16  ;;  %p2472_p1 = scmp.lt.s32.totalorder %s21_s17, %s21_s17 }
   0x7   :  { %p2468_p0 = scmp.ne.s32.totalorder %s21_s17, %s2467_s18  ;;  %p2473_p2 = scmp.lt.s32.totalorder %s2467_s18, %s2467_s18 }
   0x9   :  { %p2474_p3 = por %p2473_p2, %p2472_p1 }
   0xb   :  { %p2475_p4 = pnand %p2474_p3, %p2468_p0 }
   0xd   :  { %2478 = shalt.err (!%p2475_p4)
}
   0xe   :  { %s2547_s19 = smov [#allocation5]   ;;  %s2548_s20 = smov [#allocation9]  }
   0xf   :  { %23 = dma.vmem_to_smem %s21_s17, 16, %s2547_s19, [#allocation8]  }
  0x10   :  { %s31_s21 = sshll.u32 %s2548_s20, 4  ;;  %s32_s21 = int_to_ptr.vmem [resolvable:$true] %s31_s21 }
  0x11   :  { %s2487_s22 = scalar_lea.vmem %s32_s21, 1792  ;;  %p2492_p6 = scmp.lt.s32.totalorder %s32_s21, %s32_s21 }
  0x12   :  { %p2488_p5 = scmp.ne.s32.totalorder %s32_s21, %s2487_s22  ;;  %p2493_p7 = scmp.lt.s32.totalorder %s2487_s22, %s2487_s22 }
  0x14   :  { %p2494_p8 = por %p2493_p7, %p2492_p6 }
  0x16   :  { %p2495_p9 = pnand %p2494_p8, %p2488_p5 }
  0x18   :  { %2498 = shalt.err (!%p2495_p9)
}
  0x19   :  { %s2549_s0 = smov 256   ;;  %s2550_s23 = smov 16  }
  0x1a   :  { %37 = dma.hbm_to_vmem [thread:$0]  %s4838_s2, 1792, %s32_s21, [#allocation6], %s2549_s0, %s2549_s0, %s2550_s23  }
  0x1b   :  { %s2551_s26 = smov [#allocation10]  }
  0x1c   :  { %s43_s27 = sshll.u32 %s2551_s26, 4  ;;  %s44_s27 = int_to_ptr.vmem [resolvable:$true] %s43_s27 }
  0x1d   :  { %s2507_s28 = scalar_lea.vmem %s44_s27, 256  ;;  %p2512_p11 = scmp.lt.s32.totalorder %s44_s27, %s44_s27 }
  0x1e   :  { %p2508_p10 = scmp.ne.s32.totalorder %s44_s27, %s2507_s28  ;;  %p2513_p12 = scmp.lt.s32.totalorder %s2507_s28, %s2507_s28 }
  0x20   :  { %p2514_p13 = por %p2513_p12, %p2512_p11 }
  0x22   :  { %p2515_p0 = pnand %p2514_p13, %p2508_p10 }
  0x24   :  { %2518 = shalt.err (!%p2515_p0)
}
  0x25   :  { %s2552_s29 = smov 128   ;;  %s2553_s30 = smov 8  }
  0x26   :  { %49 = dma.hbm_to_vmem [thread:$0]  %s4839_s3, 256, %s44_s27, [#allocation11], %s2552_s29, %s2552_s29, %s2553_s30  }
  0x27   :  { %2539 = dma.done.wait [#allocation8], 16  }
  0x28   :  { %2540 = vsyncadd [#allocation8], 4294967280 }
  0x29   :  { %2541 = dma.done.wait [#allocation6], 1792  }
  0x2a   :  { %2542 = vsyncadd [#allocation6], 4294965504 }
  0x2b   :  { %2543 = dma.done.wait [#allocation11], 256  }
  0x2c   :  { %2544 = vsyncadd [#allocation11], 4294967040 }
  0x2d   :  { %59 = sfence }
  0x2e   :  { %v60_v0 = vld [vmem:[#allocation10] sm:$0xff]  ;;  %v61_v1 = vld [vmem:[#allocation10 + $0x8] sm:$0xff]  ;;  %vm68_vm0 = vcmask 1043456   ;;  %v137_v2 = vlaneseq  ;;  %v2554_v11 = vmov 1983009808   ;;  %vm154_vm1 = vcmask 1041409  }
  0x2f   :  { %v64_v3 = vcombine.high %v60_v0, %v60_v0  ;;  %v65_v4 = vcombine.high %v61_v1, %v61_v1  ;;  %v97_v5 = vsel %vm68_vm0, %v60_v0, -inf  ;;  %v111_v6 = vsel %vm68_vm0, %v61_v1, -inf  ;;  %s2555_s2 = smov 51   ;;  %s2556_s3 = smov 50  }
  0x30   :  { %v98_v7 = vrot.slane %v97_v5, 4  ;;  %v112_v8 = vrot.slane %v111_v6, 4  ;;  %v135_v12 = vunpack.c.l.s4 %v2554_v11  ;;  %v2643_v17 = vshrl.u32 %v137_v2, 7  ;;  %s2557_s7 = smov 49   ;;  %s2558_s8 = smov 48  }
  0x31   :  { %v104_v9 = vsel %vm68_vm0, %v64_v3, -inf  ;;  %v118_v10 = vsel %vm68_vm0, %v65_v4, -inf  ;;  %v69_v18 = vsel %vm68_vm0, %v60_v0, 0.0  ;;  %v76_v19 = vsel %vm68_vm0, %v64_v3, 0.0  ;;  %s2559_s9 = smov 47   ;;  %s2560_s10 = smov 46  }
  0x32   :  { %v99_v13 = vmax.f32 %v97_v5, %v98_v7  ;;  %v105_v14 = vrot.slane %v104_v9, 4  ;;  %v113_v15 = vmax.f32 %v111_v6, %v112_v8  ;;  %v119_v16 = vrot.slane %v118_v10, 4  ;;  %s2561_s11 = smov 45   ;;  %s2562_s12 = smov 35  }
  0x33   :  { %v136_v24 = vunpack.c.0.s8 %v135_v12  ;;  %v70_v25 = vrot.slane %v69_v18, 4  ;;  %v77_v26 = vrot.slane %v76_v19, 4  ;;  %v83_v27 = vsel %vm68_vm0, %v61_v1, 0.0  ;;  %s2563_s13 = smov 34   ;;  %s2564_s14 = smov 33  }
  0x34   :  { %v100_v20 = vrot.slane %v99_v13, 2  ;;  %v106_v21 = vmax.f32 %v104_v9, %v105_v14  ;;  %v114_v22 = vrot.slane %v113_v15, 2  ;;  %v120_v23 = vmax.f32 %v118_v10, %v119_v16  ;;  %s2565_s15 = smov 32   ;;  %s2566_s16 = smov 31  }
  0x35   :  { %v71_v32 = vadd.f32 %v70_v25, %v69_v18  ;;  %v78_v33 = vadd.f32 %v77_v26, %v76_v19  ;;  %v84_v34 = vrot.slane %v83_v27, 4  ;;  %v90_v35 = vsel %vm68_vm0, %v65_v4, 0.0  ;;  %s2567_s17 = smov 30   ;;  %s2568_s18 = smov 29  }
  0x36   :  { %v101_v28 = vmax.f32 %v99_v13, %v100_v20  ;;  %v107_v29 = vrot.slane %v106_v21, 2  ;;  %v115_v30 = vmax.f32 %v113_v15, %v114_v22  ;;  %v121_v31 = vrot.slane %v120_v23, 2  ;;  %s2569_s19 = smov 19   ;;  %s2570_s20 = smov 18  }
  0x37   :  { %v72_v40 = vrot.slane %v71_v32, 2  ;;  %v79_v41 = vrot.slane %v78_v33, 2  ;;  %v85_v42 = vadd.f32 %v84_v34, %v83_v27  ;;  %v91_v43 = vrot.slane %v90_v35, 4  ;;  %s2571_s21 = smov 17   ;;  %s2572_s22 = smov 15  }
  0x38   :  { %v102_v36 = vrot.slane %v101_v28, 1  ;;  %v108_v37 = vmax.f32 %v106_v21, %v107_v29  ;;  %v116_v38 = vrot.slane %v115_v30, 1  ;;  %v122_v39 = vmax.f32 %v120_v23, %v121_v31  ;;  %s2573_s0 = smov 14   ;;  %s2575_s24 = smov 3  }
  0x39   :  { %v73_v48 = vadd.f32 %v72_v40, %v71_v32  ;;  %v80_v49 = vadd.f32 %v79_v41, %v78_v33  ;;  %v86_v50 = vrot.slane %v85_v42, 2  ;;  %v92_v51 = vadd.f32 %v91_v43, %v90_v35  ;;  %s2576_s25 = smov 2   ;;  %s2832_s26 = sld [smem:[#allocation5 + $0x31]] }
  0x3a   :  { %v103_v44 = vmax.f32 %v101_v28, %v102_v36  ;;  %v109_v45 = vrot.slane %v108_v37, 1  ;;  %v117_v46 = vmax.f32 %v115_v30, %v116_v38  ;;  %v123_v47 = vrot.slane %v122_v39, 1  ;;  %s2837_s27 = sld [smem:[#allocation5 + $0x1]]  ;;  %s2577_s29 = smov 1  }
  0x3b   :  { %v2650_v54 = vsub.s32 %v136_v24, %v2643_v17  ;;  %v74_v55 = vrot.slane %v73_v48, 1  ;;  %v81_v56 = vrot.slane %v80_v49, 1  ;;  %v87_v57 = vadd.f32 %v86_v50, %v85_v42  ;;  %s2839_s28 = sld [smem:[#allocation5 + $0x32]] }
  0x3c   :  { %v110_v52 = vmax.f32 %v108_v37, %v109_v45  ;;  %v124_v53 = vmax.f32 %v122_v39, %v123_v47  ;;  %v93_v58 = vrot.slane %v92_v51, 2  ;;  %vm156_vm2 = vcmask 1043459   ;;  %s2844_s30 = sld [smem:[#allocation5 + $0x2]] }
  0x3d   :  { %4906 = vst [vmem:[#allocation17_spill] sm:$0xff] %v2650_v54  ;;  %v75_v61 = vadd.f32 %v74_v55, %v73_v48  ;;  %v82_v62 = vadd.f32 %v81_v56, %v80_v49  ;;  %v88_v63 = vrot.slane %v87_v57, 1  ;;  %vm158_vm3 = vcmask 1045509   ;;  %s2846_s5 = sld [smem:[#allocation5 + $0x33]] }
  0x3e   :  { %v168_v59 = vcombine.low %v103_v44, %v110_v52  ;;  %v176_v60 = vcombine.low %v117_v46, %v124_v53  ;;  %v94_v0 = vadd.f32 %v93_v58, %v92_v51  ;;  %vm160_vm4 = vcmask 1047559   ;;  %s2851_s6 = sld [smem:[#allocation5 + $0x3]] }
  0x3f   :  { %v89_v4 = vadd.f32 %v88_v63, %v87_v57  ;;  %v133_v8 = vcombine.low %v75_v61, %v82_v62  ;;  %s3015_s4 = sld [smem:[#allocation5 + $0xe]] }
  0x40   :  { %v175_v1 = vrot.slane %v168_v59, %v2650_v54  ;;  %v183_v3 = vrot.slane %v176_v60, %v2650_v54  ;;  %v95_v5 = vrot.slane %v94_v0, 1 }
  0x41   :  { %v140_v14 = vrot.slane %v133_v8, %v2650_v54 }
  0x42   :  { %v186_v6 = vrot.slane %v183_v3, 7  ;;  %v96_v7 = vadd.f32 %v95_v5, %v94_v0 }
  0x44   :  { %v187_v9 = vsel %vm154_vm1, %v186_v6, %v175_v1  ;;  %v141_v11 = vcombine.low %v89_v4, %v96_v7  ;;  %v2899_v7 = vsub.s32 1, %v2643_v17 }
  0x45   :  { %v188_v10 = vsel %vm156_vm2, %v186_v6, %v187_v9  ;;  %v2907_v9 = vld [vmem:[#allocation9 + $0x1] ss:$8 sm:$0x3] }
  0x46   :  { %v189_v12 = vsel %vm158_vm3, %v186_v6, %v188_v10  ;;  %v148_v15 = vrot.slane %v141_v11, %v2650_v54  ;;  %v2911_v10 = vld [vmem:[#allocation9 + $0x2] ss:$8 sm:$0x3]  ;;  %v2919_v11 = vand.u32 127, %v137_v2 }
  0x47   :  { %v190_v13 = vsel %vm160_vm4, %v186_v6, %v189_v12  ;;  %v2896_v6 = vsub.s32 0, %v2643_v17  ;;  %v2984_v54 = vld [vmem:[#allocation9 + $0x7] ss:$8 sm:$0x3] }
  0x48   :  { %192 = vst [vmem:[#allocation3] sm:$0xf] %v190_v13  ;;  %v153_v16 = vrot.slane %v148_v15, 7  ;;  %vm289_vm5 = vcmp.lt.s32.totalorder %v2919_v11, 51  ;;  %4920 = vst [vmem:[#allocation31_spill] sm:$0xff] %v2984_v54  ;;  %vm339_vm6 = vcmp.lt.s32.totalorder %v2919_v11, 50 }
  0x49   :  { %v2974_v13 = vld [vmem:[#allocation9 + $0x6] ss:$8 sm:$0x3]  ;;  %vm379_vm7 = vcmp.lt.s32.totalorder %v2919_v11, 49  ;;  %vm419_vm8 = vcmp.lt.s32.totalorder %v2919_v11, 48  ;;  %vm459_vm9 = vcmp.lt.s32.totalorder %v2919_v11, 47 }
  0x4a   :  { %v155_v18 = vsel %vm154_vm1, %v153_v16, %v140_v14  ;;  %v2923_v14 = vld [vmem:[#allocation9 + $0x3] ss:$8 sm:$0x3]  ;;  %vm499_vm10 = vcmp.lt.s32.totalorder %v2919_v11, 46  ;;  %vm539_vm11 = vcmp.lt.s32.totalorder %v2919_v11, 45  ;;  %vm579_vm12 = vcmp.lt.s32.totalorder %v2919_v11, 35 }
  0x4b   :  { %v157_v19 = vsel %vm156_vm2, %v153_v16, %v155_v18  ;;  %v2947_v18 = vld [vmem:[#allocation9] ss:$8 sm:$0x3]  ;;  %vm619_vm13 = vcmp.lt.s32.totalorder %v2919_v11, 34  ;;  %vm659_vm14 = vcmp.lt.s32.totalorder %v2919_v11, 33  ;;  %vm699_vm15 = vcmp.lt.s32.totalorder %v2919_v11, 32 }
  0x4c   :  { %v159_v20 = vsel %vm158_vm3, %v153_v16, %v157_v19  ;;  %v2998_v19 = vld [vmem:[#allocation9 + $0x10] ss:$8 sm:$0x3]  ;;  %vm739_vm0 = vcmp.lt.s32.totalorder %v2919_v11, 31  ;;  %vm779_vm1 = vcmp.lt.s32.totalorder %v2919_v11, 30  ;;  %vm819_vm2 = vcmp.lt.s32.totalorder %v2919_v11, 29 }
  0x4d   :  { %v161_v21 = vsel %vm160_vm4, %v153_v16, %v159_v20  ;;  %v2933_v20 = vld [vmem:[#allocation9 + $0x4] ss:$8 sm:$0x3]  ;;  %4922 = vst [vmem:[#allocation33_spill] sm:$0xff] %v2998_v19  ;;  %vm859_vm3 = vcmp.lt.s32.totalorder %v2919_v11, 19  ;;  %vm899_vm4 = vcmp.lt.s32.totalorder %v2919_v11, 18 }
  0x4e   :  { %163 = vst [vmem:[#allocation2] sm:$0xf] %v161_v21  ;;  %v3023_v21 = vld [vmem:[#allocation9 + $0x12] ss:$8 sm:$0x3] }
  0x4f   :  { %v2660_v22 = vld.sshfl [vmem:[#allocation3] sm:$0x33 pattern:$0x76325410]  ;;  %4925 = vst [vmem:[#allocation35_spill] sm:$0xff] %v3023_v21 }
  0x50   :  { %303 = vrot.lane.b32.xlu1 %v2660_v22, %s2555_s2  ;;  %v2665_v23 = vcombine.high %v2660_v22, %v2660_v22  ;;  %v3048_v16 = vld [vmem:[#allocation9 + $0x14] ss:$8 sm:$0x3] }
  0x51   :  { %4930 = vst [vmem:[#allocation39_spill] sm:$0xff] %v3048_v16 }
  0x54   :  { %305 = vrot.lane.b32.xlu1 %v2665_v23, %s2555_s2 }
  0x55   :  { %v2667_v24 = vld.sshfl [vmem:[#allocation2] sm:$0x33 pattern:$0x76325410] }
  0x56   :  { %283 = vrot.lane.b32.xlu0 %v2667_v24, %s2555_s2  ;;  %v2673_v25 = vcombine.high %v2667_v24, %v2667_v24 }
  0x58   :  { %337 = vrot.lane.b32.xlu1 %v2673_v25, %s2556_s3 }
  0x5a   :  { %335 = vrot.lane.b32.xlu0 %v2667_v24, %s2556_s3 }
  0x5c   :  { %344 = vrot.lane.b32.xlu1 %v2665_v23, %s2556_s3 }
  0x5e   :  { %342 = vrot.lane.b32.xlu0 %v2660_v22, %s2556_s3  ;;  %s2858_s3 = sld [smem:[#allocation5 + $0x4]] }
  0x60   :  { %377 = vrot.lane.b32.xlu1 %v2673_v25, %s2557_s7 }
  0x62   :  { %375 = vrot.lane.b32.xlu0 %v2667_v24, %s2557_s7 }
  0x64   :  { %384 = vrot.lane.b32.xlu1 %v2665_v23, %s2557_s7 }
  0x66   :  { %382 = vrot.lane.b32.xlu0 %v2660_v22, %s2557_s7  ;;  %s2860_s7 = sld [smem:[#allocation5 + $0x35]] }
  0x68   :  { %417 = vrot.lane.b32.xlu1 %v2673_v25, %s2558_s8 }
  0x6a   :  { %415 = vrot.lane.b32.xlu0 %v2667_v24, %s2558_s8 }
  0x6c   :  { %424 = vrot.lane.b32.xlu1 %v2665_v23, %s2558_s8 }
  0x6e   :  { %422 = vrot.lane.b32.xlu0 %v2660_v22, %s2558_s8  ;;  %s2865_s8 = sld [smem:[#allocation5]] }
  0x70   :  { %457 = vrot.lane.b32.xlu1 %v2673_v25, %s2559_s9 }
  0x72   :  { %455 = vrot.lane.b32.xlu0 %v2667_v24, %s2559_s9 }
  0x74   :  { %464 = vrot.lane.b32.xlu1 %v2665_v23, %s2559_s9 }
  0x76   :  { %462 = vrot.lane.b32.xlu0 %v2660_v22, %s2559_s9  ;;  %s2867_s9 = sld [smem:[#allocation5 + $0x5]] }
  0x78   :  { %497 = vrot.lane.b32.xlu1 %v2673_v25, %s2560_s10 }
  0x7a   :  { %285 = vrot.lane.b32.xlu0 %v2673_v25, %s2555_s2  ;;  %s2853_s2 = sld [smem:[#allocation5 + $0x34]] }
  0x7c   :  { %504 = vrot.lane.b32.xlu1 %v2665_v23, %s2560_s10 }
  0x7e   :  { %495 = vrot.lane.b32.xlu0 %v2667_v24, %s2560_s10 }
  0x80   :  { %537 = vrot.lane.b32.xlu1 %v2673_v25, %s2561_s11 }
  0x82   :  { %502 = vrot.lane.b32.xlu0 %v2660_v22, %s2560_s10  ;;  %s2578_s10 = smov 127  }
  0x84   :  { %544 = vrot.lane.b32.xlu1 %v2665_v23, %s2561_s11 }
  0x86   :  { %535 = vrot.lane.b32.xlu0 %v2667_v24, %s2561_s11 }
  0x88   :  { %577 = vrot.lane.b32.xlu1 %v2673_v25, %s2562_s12 }
  0x8a   :  { %542 = vrot.lane.b32.xlu0 %v2660_v22, %s2561_s11  ;;  %s2872_s11 = sld [smem:[#allocation5 + $0x36]] }
  0x8c   :  { %584 = vrot.lane.b32.xlu1 %v2665_v23, %s2562_s12 }
  0x8e   :  { %575 = vrot.lane.b32.xlu0 %v2667_v24, %s2562_s12 }
  0x90   :  { %617 = vrot.lane.b32.xlu1 %v2673_v25, %s2563_s13 }
  0x92   :  { %582 = vrot.lane.b32.xlu0 %v2660_v22, %s2562_s12  ;;  %s2874_s12 = sld [smem:[#allocation5 + $0x6]] }
  0x94   :  { %624 = vrot.lane.b32.xlu1 %v2665_v23, %s2563_s13 }
  0x96   :  { %615 = vrot.lane.b32.xlu0 %v2667_v24, %s2563_s13 }
  0x98   :  { %657 = vrot.lane.b32.xlu1 %v2673_v25, %s2564_s14 }
  0x9a   :  { %622 = vrot.lane.b32.xlu0 %v2660_v22, %s2563_s13  ;;  %s2879_s13 = sld [smem:[#allocation5 + $0x37]] }
  0x9c   :  { %664 = vrot.lane.b32.xlu1 %v2665_v23, %s2564_s14 }
  0x9e   :  { %655 = vrot.lane.b32.xlu0 %v2667_v24, %s2564_s14 }
  0xa0   :  { %697 = vrot.lane.b32.xlu1 %v2673_v25, %s2565_s15 }
  0xa2   :  { %662 = vrot.lane.b32.xlu0 %v2660_v22, %s2564_s14  ;;  %s2881_s14 = sld [smem:[#allocation5 + $0x7]] }
  0xa4   :  { %704 = vrot.lane.b32.xlu1 %v2665_v23, %s2565_s15 }
  0xa6   :  { %695 = vrot.lane.b32.xlu0 %v2667_v24, %s2565_s15 }
  0xa8   :  { %737 = vrot.lane.b32.xlu1 %v2673_v25, %s2566_s16  ;;  %4910 = sst [smem:[#allocation21_spill]] %s2881_s14 }
  0xa9   :  { %s3025_s14 = sld [smem:[#allocation5 + $0x3f]] }
  0xaa   :  { %702 = vrot.lane.b32.xlu0 %v2660_v22, %s2565_s15  ;;  %s2886_s15 = sld [smem:[#allocation5 + $0x38]] }
  0xac   :  { %744 = vrot.lane.b32.xlu1 %v2665_v23, %s2566_s16 }
  0xae   :  { %735 = vrot.lane.b32.xlu0 %v2667_v24, %s2566_s16 }
  0xb0   :  { %777 = vrot.lane.b32.xlu1 %v2673_v25, %s2567_s17 }
  0xb2   :  { %742 = vrot.lane.b32.xlu0 %v2660_v22, %s2566_s16  ;;  %s2888_s16 = sld [smem:[#allocation5 + $0x8]] }
  0xb4   :  { %784 = vrot.lane.b32.xlu1 %v2665_v23, %s2567_s17 }
  0xb6   :  { %775 = vrot.lane.b32.xlu0 %v2667_v24, %s2567_s17 }
  0xb8   :  { %817 = vrot.lane.b32.xlu1 %v2673_v25, %s2568_s18  ;;  %4911 = sst [smem:[#allocation22_spill]] %s2888_s16 }
  0xb9   :  { %s3039_s16 = sld [smem:[#allocation5 + $0xf]] }
  0xba   :  { %782 = vrot.lane.b32.xlu0 %v2660_v22, %s2567_s17  ;;  %s2893_s17 = sld [smem:[#allocation5 + $0x39]] }
  0xbc   :  { %824 = vrot.lane.b32.xlu1 %v2665_v23, %s2568_s18 }
  0xbe   :  { %815 = vrot.lane.b32.xlu0 %v2667_v24, %s2568_s18 }
  0xbf   :  { %4929 = sst [smem:[#allocation38_spill]] %s3039_s16  ;;  %s4951_s16 = smov 115  }
  0xc0   :  { %857 = vrot.lane.b32.xlu1 %v2673_v25, %s2569_s19 }
  0xc2   :  { %v2728_v26 = vpop.permute.xlu1 %303  ;;  %822 = vrot.lane.b32.xlu0 %v2660_v22, %s2568_s18  ;;  %s2901_s18 = sld [smem:[#allocation5 + $0x9]] }
  0xc4   :  { %864 = vrot.lane.b32.xlu1 %v2665_v23, %s2569_s19 }
  0xc6   :  { %v2732_v27 = vpop.permute.xlu1 %305  ;;  %855 = vrot.lane.b32.xlu0 %v2667_v24, %s2569_s19 }
  0xc8   :  { %v2735_v28 = vpop.permute.xlu0 %283  ;;  %897 = vrot.lane.b32.xlu1 %v2673_v25, %s2570_s20 }
  0xca   :  { %862 = vrot.lane.b32.xlu0 %v2660_v22, %s2569_s19  ;;  %v2739_v29 = vpop.permute.xlu1 %337  ;;  %s4846_s19 = smov 126  }
  0xcc   :  { %v2741_v30 = vpop.permute.xlu0 %335  ;;  %904 = vrot.lane.b32.xlu1 %v2665_v23, %s2570_s20 }
  0xce   :  { %895 = vrot.lane.b32.xlu0 %v2667_v24, %s2570_s20  ;;  %v2745_v31 = vpop.permute.xlu1 %344 }
  0xd0   :  { %v2747_v32 = vpop.permute.xlu0 %342  ;;  %937 = vrot.lane.b32.xlu1 %v2673_v25, %s2571_s21 }
  0xd2   :  { %902 = vrot.lane.b32.xlu0 %v2660_v22, %s2570_s20  ;;  %v2751_v33 = vpop.permute.xlu1 %377  ;;  %s2909_s20 = sld [smem:[#allocation5 + $0x3a]] }
  0xd4   :  { %v2753_v34 = vpop.permute.xlu0 %375  ;;  %944 = vrot.lane.b32.xlu1 %v2665_v23, %s2571_s21 }
  0xd6   :  { %935 = vrot.lane.b32.xlu0 %v2667_v24, %s2571_s21  ;;  %v2757_v35 = vpop.permute.xlu1 %384 }
  0xd8   :  { %v2759_v36 = vpop.permute.xlu0 %382  ;;  %977 = vrot.lane.b32.xlu1 %v2673_v25, %s2550_s23 }
  0xda   :  { %942 = vrot.lane.b32.xlu0 %v2660_v22, %s2571_s21  ;;  %v2764_v37 = vpop.permute.xlu1 %417  ;;  %s2913_s21 = sld [smem:[#allocation5 + $0xa]] }
  0xdc   :  { %v2766_v38 = vpop.permute.xlu0 %415  ;;  %984 = vrot.lane.b32.xlu1 %v2665_v23, %s2550_s23 }
  0xde   :  { %975 = vrot.lane.b32.xlu0 %v2667_v24, %s2550_s23  ;;  %v2772_v39 = vpop.permute.xlu1 %424 }
  0xe0   :  { %v2774_v40 = vpop.permute.xlu0 %422  ;;  %1017 = vrot.lane.b32.xlu1 %v2673_v25, %s2572_s22 }
  0xe2   :  { %982 = vrot.lane.b32.xlu0 %v2660_v22, %s2550_s23  ;;  %v2779_v41 = vpop.permute.xlu1 %457  ;;  %s2574_s23 = smov 13  }
  0xe4   :  { %v2781_v42 = vpop.permute.xlu0 %455  ;;  %1024 = vrot.lane.b32.xlu1 %v2665_v23, %s2572_s22 }
  0xe6   :  { %1015 = vrot.lane.b32.xlu0 %v2667_v24, %s2572_s22  ;;  %v2785_v43 = vpop.permute.xlu1 %464 }
  0xe8   :  { %v2787_v44 = vpop.permute.xlu0 %462  ;;  %1057 = vrot.lane.b32.xlu1 %v2673_v25, %s2573_s0 }
  0xea   :  { %1022 = vrot.lane.b32.xlu0 %v2660_v22, %s2572_s22  ;;  %v2791_v45 = vpop.permute.xlu1 %497  ;;  %s2925_s22 = sld [smem:[#allocation5 + $0x3b]] }
  0xec   :  { %v2793_v46 = vpop.permute.xlu0 %285  ;;  %1064 = vrot.lane.b32.xlu1 %v2665_v23, %s2573_s0 }
  0xed   :  { %v290_v54 = vsel %vm289_vm5, %v2735_v28, %v2793_v46 }
  0xee   :  { %1055 = vrot.lane.b32.xlu0 %v2667_v24, %s2573_s0  ;;  %v2797_v47 = vpop.permute.xlu1 %504 }
  0xf0   :  { %v2799_v48 = vpop.permute.xlu0 %495  ;;  %1097 = vrot.lane.b32.xlu1 %v2673_v25, %s2574_s23 }
  0xf2   :  { %1062 = vrot.lane.b32.xlu0 %v2660_v22, %s2573_s0  ;;  %v2803_v49 = vpop.permute.xlu1 %537  ;;  %s2937_s0 = sld [smem:[#allocation5 + $0xb]] }
  0xf4   :  { %v2805_v50 = vpop.permute.xlu0 %502  ;;  %1104 = vrot.lane.b32.xlu1 %v2665_v23, %s2574_s23 }
  0xf6   :  { %1095 = vrot.lane.b32.xlu0 %v2667_v24, %s2574_s23  ;;  %v2809_v51 = vpop.permute.xlu1 %544 }
  0xf8   :  { %v2811_v52 = vpop.permute.xlu0 %535  ;;  %1137 = vrot.lane.b32.xlu1 %v2673_v25, %s2575_s24  ;;  %4916 = sst [smem:[#allocation27_spill]] %s2937_s0 }
  0xf9   :  { %s3084_s0 = sld [smem:[#allocation5 + $0x40]] }
  0xfa   :  { %1102 = vrot.lane.b32.xlu0 %v2660_v22, %s2574_s23  ;;  %v2815_v53 = vpop.permute.xlu1 %577  ;;  %s2949_s23 = sld [smem:[#allocation5 + $0x3c]] }
  0xfc   :  { %v2817_v55 = vpop.permute.xlu0 %542  ;;  %1144 = vrot.lane.b32.xlu1 %v2665_v23, %s2575_s24 }
  0xfe   :  { %1135 = vrot.lane.b32.xlu0 %v2667_v24, %s2575_s24  ;;  %v2821_v56 = vpop.permute.xlu1 %584 }
 0x100   :  { %v2823_v57 = vpop.permute.xlu0 %575  ;;  %1177 = vrot.lane.b32.xlu1 %v2673_v25, %s2576_s25  ;;  %4917 = sst [smem:[#allocation28_spill]] %s2949_s23 }
 0x101   :  { %s3094_s23 = sld [smem:[#allocation5 + $0x10]] }
 0x102   :  { %1142 = vrot.lane.b32.xlu0 %v2660_v22, %s2575_s24  ;;  %v2827_v58 = vpop.permute.xlu1 %617  ;;  %s2963_s24 = sld [smem:[#allocation5 + $0xc]] }
 0x104   :  { %v2829_v59 = vpop.permute.xlu0 %582  ;;  %1184 = vrot.lane.b32.xlu1 %v2665_v23, %s2576_s25 }
 0x106   :  { %1175 = vrot.lane.b32.xlu0 %v2667_v24, %s2576_s25  ;;  %v2835_v60 = vpop.permute.xlu1 %624 }
 0x107   :  { %4935 = sst [smem:[#allocation44_spill]] %s3094_s23 }
 0x108   :  { %v2841_v61 = vpop.permute.xlu0 %615  ;;  %1217 = vrot.lane.b32.xlu1 %v2673_v25, %s2577_s29  ;;  %4919 = sst [smem:[#allocation30_spill]] %s2963_s24  ;;  %s4885_s24 = smov 115  }
 0x109   :  { %s3345_s23 = sld [smem:[#allocation5 + $0x45]] }
 0x10a   :  { %1182 = vrot.lane.b32.xlu0 %v2660_v22, %s2576_s25  ;;  %v2849_v62 = vpop.permute.xlu1 %657  ;;  %s4850_s25 = smov 125  }
 0x10b   :  { %4907 = vst [vmem:[#allocation18_spill] sm:$0xff] %v2849_v62 }
 0x10c   :  { %v2855_v63 = vpop.permute.xlu0 %622  ;;  %1224 = vrot.lane.b32.xlu1 %v2665_v23, %s2577_s29 }
 0x10e   :  { %1215 = vrot.lane.b32.xlu0 %v2667_v24, %s2577_s29  ;;  %v2863_v0 = vpop.permute.xlu1 %664 }
 0x110   :  { %v2869_v1 = vpop.permute.xlu0 %655  ;;  %1298 = vrot.lane.b32.xlu1 %v2673_v25, %s2578_s10 }
 0x111   :  { %4908 = vst [vmem:[#allocation19_spill] sm:$0xff] %v2869_v1 }
 0x112   :  { %1222 = vrot.lane.b32.xlu0 %v2660_v22, %s2577_s29  ;;  %v2877_v3 = vpop.permute.xlu1 %697  ;;  %s2990_s29 = sld [smem:[#allocation5 + $0xd]] }
 0x113   :  { %4909 = vst [vmem:[#allocation20_spill] sm:$0xff] %v2877_v3  ;;  %v3060_v3 = vld [vmem:[#allocation9 + $0x15] ss:$8 sm:$0x3] }
 0x114   :  { %v2883_v4 = vpop.permute.xlu0 %662  ;;  %1305 = vrot.lane.b32.xlu1 %v2665_v23, %s2578_s10  ;;  %4932 = vst [vmem:[#allocation41_spill] sm:$0xff] %v3060_v3  ;;  %v346_v3 = vsel %vm339_vm6, %v2747_v32, %v2745_v31 }
 0x116   :  { %1296 = vrot.lane.b32.xlu0 %v2667_v24, %s2578_s10  ;;  %v2891_v5 = vpop.permute.xlu1 %704 }
 0x117   :  { %4912 = vst [vmem:[#allocation23_spill] sm:$0xff] %v2891_v5  ;;  %v307_v5 = vsel %vm289_vm5, %v2728_v26, %v2732_v27 }
 0x118   :  { %v2903_v8 = vpop.permute.xlu0 %695  ;;  %1338 = vrot.lane.b32.xlu1 %v2673_v25, %s4846_s19 }
 0x119   :  { %4913 = vst [vmem:[#allocation24_spill] sm:$0xff] %v2903_v8 }
 0x11a   :  { %1303 = vrot.lane.b32.xlu0 %v2660_v22, %s2578_s10  ;;  %v2916_v17 = vpop.permute.xlu1 %737  ;;  %s2976_s10 = sld [smem:[#allocation5 + $0x3d]] }
 0x11b   :  { %4914 = vst [vmem:[#allocation25_spill] sm:$0xff] %v2916_v17  ;;  %v2957_v17 = vld [vmem:[#allocation9 + $0x5] ss:$8 sm:$0x3] }
 0x11c   :  { %v2935_v2 = vpop.permute.xlu0 %702  ;;  %1345 = vrot.lane.b32.xlu1 %v2665_v23, %s4846_s19 }
 0x11d   :  { %4915 = vst [vmem:[#allocation26_spill] sm:$0xff] %v2935_v2  ;;  %v3009_v2 = vld [vmem:[#allocation9 + $0x11] ss:$8 sm:$0x3] }
 0x11e   :  { %1336 = vrot.lane.b32.xlu0 %v2667_v24, %s4846_s19  ;;  %v2961_v15 = vpop.permute.xlu1 %744  ;;  %s3000_s19 = sld [smem:[#allocation5 + $0x3e]] }
 0x11f   :  { %4918 = vst [vmem:[#allocation29_spill] sm:$0xff] %v2961_v15  ;;  %v3092_v15 = vld [vmem:[#allocation9 + $0x16] ss:$8 sm:$0x3] }
 0x120   :  { %v2986_v8 = vpop.permute.xlu0 %735  ;;  %1378 = vrot.lane.b32.xlu1 %v2673_v25, %s4850_s25  ;;  %s4923_s25 = smov 126   ;;  %4934 = vst [vmem:[#allocation43_spill] sm:$0xff] %v3092_v15 }
 0x121   :  { %4921 = vst [vmem:[#allocation32_spill] sm:$0xff] %v2986_v8  ;;  %v3033_v8 = vld [vmem:[#allocation9 + $0x13] ss:$8 sm:$0x3] }
 0x122   :  { %1343 = vrot.lane.b32.xlu0 %v2660_v22, %s4923_s25  ;;  %v3013_v12 = vpop.permute.xlu1 %777  ;;  %4926 = vst [vmem:[#allocation36_spill] sm:$0xff] %v3033_v8  ;;  %s4928_s25 = smov 125   ;;  %v340_v8 = vsel %vm339_vm6, %v2741_v30, %v2739_v29 }
 0x123   :  { %4924 = vst [vmem:[#allocation34_spill] sm:$0xff] %v3013_v12 }
 0x124   :  { %v3035_v62 = vpop.permute.xlu0 %742  ;;  %1385 = vrot.lane.b32.xlu1 %v2665_v23, %s4928_s25 }
 0x125   :  { %4927 = vst [vmem:[#allocation37_spill] sm:$0xff] %v3035_v62  ;;  %v291_v62 = vsel %vm289_vm5, %v2793_v46, %v2735_v28  ;;  %v308_v28 = vsel %vm289_vm5, %v2732_v27, %v2728_v26  ;;  %v347_v26 = vsel %vm339_vm6, %v2745_v31, %v2747_v32  ;;  %v4937_v27 = vstv %s2865_s8  ;;  %s3137_s8 = sld [smem:[#allocation5 + $0x11]] }
 0x126   :  { %1376 = vrot.lane.b32.xlu0 %v2667_v24, %s4928_s25  ;;  %v3058_v12 = vpop.permute.xlu1 %784  ;;  %v311_v16 = vmul.f32 %v4937_v27, %v291_v62  ;;  %v341_v31 = vsel %vm339_vm6, %v2739_v29, %v2741_v30  ;;  %vm939_vm5 = vcmp.lt.s32.totalorder %v2919_v11, 17  ;;  %vm979_vm6 = vcmp.lt.s32.totalorder %v2919_v11, 16 }
 0x127   :  { %4931 = vst [vmem:[#allocation40_spill] sm:$0xff] %v3058_v12  ;;  %v3135_v12 = vld [vmem:[#allocation9 + $0x17] ss:$8 sm:$0x3] }
 0x128   :  { %v3076_v21 = vpop.permute.xlu0 %775  ;;  %1418 = vrot.lane.b32.xlu1 %v2673_v25, %s4885_s24  ;;  %4940 = vst [vmem:[#allocation47_spill] sm:$0xff] %v3135_v12 }
 0x129   :  { %4933 = vst [vmem:[#allocation42_spill] sm:$0xff] %v3076_v21  ;;  %v4944_v21 = vstv %s2839_s28  ;;  %s3175_s28 = sld [smem:[#allocation5 + $0x12]] }
 0x12a   :  { %1383 = vrot.lane.b32.xlu0 %v2660_v22, %s4928_s25  ;;  %v3106_v1 = vpop.permute.xlu1 %817  ;;  %s3123_s25 = sld [smem:[#allocation5 + $0x41]]  ;;  %v354_v32 = vmul.f32 %v4944_v21, %v347_v26  ;;  %v4945_v15 = vmov %v4944_v21 }
 0x12b   :  { %4936 = vst [vmem:[#allocation45_spill] sm:$0xff] %v3106_v1  ;;  %v4938_v1 = vmov %v4937_v27  ;;  %4941 = sst [smem:[#allocation48_spill]] %s3137_s8 }
 0x12c   :  { %v312_v46 = vmul.f32 %v4938_v1, %v290_v54  ;;  %v3125_v19 = vpop.permute.xlu0 %782  ;;  %1425 = vrot.lane.b32.xlu1 %v2665_v23, %s4885_s24  ;;  %v4942_v54 = vstv %s2832_s26  ;;  %s3167_s26 = sld [smem:[#allocation5 + $0x42]] }
 0x12d   :  { %4939 = vst [vmem:[#allocation46_spill] sm:$0xff] %v3125_v19  ;;  %v315_v62 = vmul.f32 %v4942_v54, %v308_v28  ;;  %v4943_v1 = vmov %v4942_v54  ;;  %v355_v19 = vmul.f32 %v4945_v15, %v346_v3  ;;  %v387_v28 = vsel %vm379_vm7, %v2757_v35, %v2759_v36  ;;  %v3200_v3 = vld [vmem:[#allocation9 + $0x21] ss:$8 sm:$0x3]  ;;  %s3387_s8 = sld [smem:[#allocation5 + $0x46]] }
 0x12e   :  { %v316_v27 = vmul.f32 %v4943_v1, %v307_v5  ;;  %v386_v5 = vsel %vm379_vm7, %v2759_v36, %v2757_v35  ;;  %1416 = vrot.lane.b32.xlu0 %v2667_v24, %s4885_s24  ;;  %v3165_v54 = vpop.permute.xlu1 %824  ;;  %v3173_v35 = vld [vmem:[#allocation9 + $0x20] ss:$8 sm:$0x3]  ;;  %v4947_v36 = vstv %s2837_s27  ;;  %s4896_s24 = smov 114   ;;  %s3202_s27 = sld [smem:[#allocation5 + $0x43]] }
 0x12f   :  { %v317_v29 = vadd.f32 %v315_v62, %v311_v16  ;;  %4946 = vst [vmem:[#allocation49_spill] sm:$0xff] %v3173_v35  ;;  %v350_v21 = vmul.f32 %v4947_v36, %v341_v31  ;;  %v4948_v26 = vmov %v4947_v36  ;;  %v380_v16 = vsel %vm379_vm7, %v2753_v34, %v2751_v33 }
 0x130   :  { %v318_v30 = vadd.f32 %v316_v27, %v312_v46  ;;  %v351_v1 = vmul.f32 %v4948_v26, %v340_v8  ;;  %v381_v46 = vsel %vm379_vm7, %v2751_v33, %v2753_v34  ;;  %v3190_v62 = vpop.permute.xlu0 %815  ;;  %1458 = vrot.lane.b32.xlu1 %v2673_v25, %s4896_s24  ;;  %v4949_v8 = vstv %s2846_s5  ;;  %s3212_s5 = sld [smem:[#allocation5 + $0x13]] }
 0x131   :  { %v394_v31 = vmul.f32 %v4949_v8, %v387_v28  ;;  %v4950_v27 = vmov %v4949_v8  ;;  %v356_v33 = vadd.f32 %v354_v32, %v350_v21  ;;  %v4952_v8 = vstv %s2844_s30  ;;  %s3468_s30 = sld [smem:[#allocation5 + $0x18]] }
 0x132   :  { %v395_v36 = vmul.f32 %v4950_v27, %v386_v5  ;;  %v357_v34 = vadd.f32 %v355_v19, %v351_v1  ;;  %1423 = vrot.lane.b32.xlu0 %v2660_v22, %s4951_s16  ;;  %v3206_v12 = vpop.permute.xlu1 %857  ;;  %v390_v27 = vmul.f32 %v4952_v8, %v381_v46  ;;  %v4953_v15 = vmov %v4952_v8  ;;  %v3243_v8 = vld [vmem:[#allocation9 + $0x22] ss:$8 sm:$0x3]  ;;  %v3296_v5 = vld [vmem:[#allocation9 + $0x23] ss:$8 sm:$0x3] }
 0x133   :  { %v391_v26 = vmul.f32 %v4953_v15, %v380_v16  ;;  %v4954_v19 = vrot.slane %v2947_v18, %v2896_v6  ;;  %v4955_v21 = vrot.slane %v2947_v18, %v2899_v7  ;;  %v427_v46 = vsel %vm419_vm8, %v2772_v39, %v2774_v40  ;;  %s3572_s16 = sld [smem:[#allocation5 + $0x49]] }
 0x134   :  { %v3225_v28 = vpop.permute.xlu0 %822  ;;  %1465 = vrot.lane.b32.xlu1 %v2665_v23, %s4896_s24  ;;  %v396_v16 = vadd.f32 %v394_v31, %v390_v27  ;;  %v4957_v31 = vrot.slane %v2907_v9, %v2899_v7  ;;  %vm1019_vm7 = vcmp.lt.s32.totalorder %v2919_v11, 15 }
 0x135   :  { %v331_v32 = vmul.f32 %v4954_v19, %v317_v29  ;;  %v332_v1 = vmul.f32 %v4955_v21, %v318_v30  ;;  %v397_v18 = vadd.f32 %v395_v36, %v391_v26  ;;  %v426_v30 = vsel %vm419_vm8, %v2774_v40, %v2772_v39 }
 0x136   :  { %v4956_v19 = vrot.slane %v2907_v9, %v2896_v6  ;;  %v372_v36 = vmul.f32 %v4957_v31, %v357_v34  ;;  %v420_v26 = vsel %vm419_vm8, %v2766_v38, %v2764_v37  ;;  %v421_v39 = vsel %vm419_vm8, %v2764_v37, %v2766_v38  ;;  %1456 = vrot.lane.b32.xlu0 %v2667_v24, %s4896_s24  ;;  %v3262_v40 = vpop.permute.xlu1 %864  ;;  %s2583_s24 = smov 113  }
 0x137   :  { %v4958_v9 = vstv %s4837_s1  ;;  %s4966_s1 = smov 114   ;;  %vm1059_vm8 = vcmp.lt.s32.totalorder %v2919_v11, 14 }
 0x138   :  { %v371_v21 = vmul.f32 %v4956_v19, %v356_v33  ;;  %v333_v33 = vadd.f32 %v331_v32, %v4958_v9  ;;  %v4959_v34 = vmov %v4958_v9  ;;  %v4960_v19 = vstv %s2853_s2  ;;  %v3278_v35 = vpop.permute.xlu0 %855  ;;  %1498 = vrot.lane.b32.xlu1 %v2673_v25, %s2583_s24  ;;  %s3322_s2 = sld [smem:[#allocation5 + $0x14]] }
 0x139   :  { %v334_v27 = vadd.f32 %v332_v1, %v4959_v34  ;;  %v434_v31 = vmul.f32 %v4960_v19, %v427_v46  ;;  %v4961_v29 = vmov %v4960_v19  ;;  %v4962_v9 = vrot.slane %v2911_v10, %v2896_v6 }
 0x13a   :  { %v435_v15 = vmul.f32 %v4961_v29, %v426_v30  ;;  %v4963_v29 = vrot.slane %v2911_v10, %v2899_v7  ;;  %v4964_v34 = vstv %s2851_s6  ;;  %v466_v32 = vsel %vm459_vm9, %v2787_v44, %v2785_v43  ;;  %1463 = vrot.lane.b32.xlu0 %v2660_v22, %s4966_s1  ;;  %v3308_v10 = vpop.permute.xlu1 %897  ;;  %s3312_s6 = sld [smem:[#allocation5 + $0x44]] }
 0x13b   :  { %v411_v46 = vmul.f32 %v4962_v9, %v396_v16  ;;  %v430_v19 = vmul.f32 %v4964_v34, %v421_v39  ;;  %v4965_v38 = vmov %v4964_v34  ;;  %v467_v16 = vsel %vm459_vm9, %v2785_v43, %v2787_v44  ;;  %s5021_s1 = sld [smem:[#allocation27_spill]] }
 0x13c   :  { %v412_v30 = vmul.f32 %v4963_v29, %v397_v18  ;;  %v431_v37 = vmul.f32 %v4965_v38, %v420_v26  ;;  %v460_v39 = vsel %vm459_vm9, %v2781_v42, %v2779_v41  ;;  %v461_v43 = vsel %vm459_vm9, %v2779_v41, %v2781_v42  ;;  %v3324_v34 = vpop.permute.xlu0 %862  ;;  %1505 = vrot.lane.b32.xlu1 %v2665_v23, %s2583_s24  ;;  %v5006_v18 = vld [vmem:[#allocation26_spill] sm:$0xff] }
 0x13d   :  { %v373_v44 = vadd.f32 %v371_v21, %v333_v33  ;;  %v374_v38 = vadd.f32 %v372_v36, %v334_v27  ;;  %v436_v9 = vadd.f32 %v434_v31, %v430_v19  ;;  %v4967_v41 = vstv %s2860_s7  ;;  %s3363_s7 = sld [smem:[#allocation5 + $0x15]] }
 0x13e   :  { %v437_v29 = vadd.f32 %v435_v15, %v431_v37  ;;  %v474_v42 = vmul.f32 %v4967_v41, %v467_v16  ;;  %v4968_v21 = vmov %v4967_v41  ;;  %v506_v15 = vsel %vm499_vm10, %v2805_v50, %v2797_v47  ;;  %1496 = vrot.lane.b32.xlu0 %v2667_v24, %s2583_s24 }
 0x13f   :  { %v475_v33 = vmul.f32 %v4968_v21, %v466_v32  ;;  %v507_v36 = vsel %vm499_vm10, %v2797_v47, %v2805_v50  ;;  %v4969_v27 = vstv %s2858_s3  ;;  %v500_v19 = vsel %vm499_vm10, %v2799_v48, %v2791_v45  ;;  %v3361_v50 = vpop.permute.xlu1 %904  ;;  %s2584_s3 = smov 112  }
 0x140   :  { %v470_v37 = vmul.f32 %v4969_v27, %v461_v43  ;;  %v4970_v31 = vmov %v4969_v27  ;;  %v501_v47 = vsel %vm499_vm10, %v2791_v45, %v2799_v48  ;;  %v413_v16 = vadd.f32 %v411_v46, %v373_v44  ;;  %1538 = vrot.lane.b32.xlu1 %v2673_v25, %s2584_s3 }
 0x141   :  { %v471_v32 = vmul.f32 %v4970_v31, %v460_v39  ;;  %v414_v43 = vadd.f32 %v412_v30, %v374_v38  ;;  %v546_v39 = vsel %vm539_vm11, %v2817_v55, %v2809_v51  ;;  %v547_v45 = vsel %vm539_vm11, %v2809_v51, %v2817_v55  ;;  %v3383_v31 = vpop.permute.xlu0 %895 }
 0x142   :  { %v4971_v48 = vrot.slane %v2923_v14, %v2896_v6  ;;  %v4972_v46 = vrot.slane %v2923_v14, %v2899_v7  ;;  %v4973_v44 = vstv %s2872_s11  ;;  %v476_v51 = vadd.f32 %v474_v42, %v470_v37  ;;  %s3397_s11 = sld [smem:[#allocation5 + $0x16]]  ;;  %1503 = vrot.lane.b32.xlu0 %v2660_v22, %s2583_s24 }
 0x143   :  { %v514_v38 = vmul.f32 %v4973_v44, %v507_v36  ;;  %v4974_v21 = vmov %v4973_v44  ;;  %v477_v55 = vadd.f32 %v475_v33, %v471_v32  ;;  %v540_v14 = vsel %vm539_vm11, %v2811_v52, %v2803_v49  ;;  %v3411_v44 = vld [vmem:[#allocation9 + $0x24] ss:$8 sm:$0x3]  ;;  %s4988_s24 = sld [smem:[#allocation21_spill]] }
 0x144   :  { %v451_v41 = vmul.f32 %v4971_v48, %v436_v9  ;;  %v452_v30 = vmul.f32 %v4972_v46, %v437_v29  ;;  %v515_v27 = vmul.f32 %v4974_v21, %v506_v15  ;;  %v541_v9 = vsel %vm539_vm11, %v2803_v49, %v2811_v52  ;;  %v3409_v46 = vpop.permute.xlu1 %937  ;;  %4979 = vst [vmem:[#allocation50_spill] sm:$0xff] %v3411_v44  ;;  %v5005_v21 = vld [vmem:[#allocation23_spill] sm:$0xff] }
 0x145   :  { %v4975_v29 = vstv %s2867_s9  ;;  %v4977_v37 = vstv %s2879_s13  ;;  %s3416_s9 = sld [smem:[#allocation5 + $0x47]]  ;;  %1545 = vrot.lane.b32.xlu1 %v2665_v23, %s2584_s3  ;;  %vm1099_vm9 = vcmp.lt.s32.totalorder %v2919_v11, 13  ;;  %vm1139_vm10 = vcmp.lt.s32.totalorder %v2919_v11, 3 }
 0x146   :  { %v510_v15 = vmul.f32 %v4975_v29, %v501_v47  ;;  %v4976_v36 = vmov %v4975_v29  ;;  %v554_v33 = vmul.f32 %v4977_v37, %v547_v45  ;;  %v4978_v32 = vmov %v4977_v37  ;;  %s3428_s13 = sld [smem:[#allocation5 + $0x17]]  ;;  %1536 = vrot.lane.b32.xlu0 %v2667_v24, %s2584_s3 }
 0x147   :  { %v511_v42 = vmul.f32 %v4976_v36, %v500_v19  ;;  %v555_v48 = vmul.f32 %v4978_v32, %v546_v39  ;;  %v453_v49 = vadd.f32 %v451_v41, %v413_v16  ;;  %v454_v52 = vadd.f32 %v452_v30, %v414_v43  ;;  %v3422_v32 = vpop.permute.xlu0 %902  ;;  %v3426_v16 = vld [vmem:[#allocation9 + $0x25] ss:$8 sm:$0x3] }
 0x148   :  { %v516_v19 = vadd.f32 %v514_v38, %v510_v15  ;;  %v4980_v45 = vstv %s2874_s12  ;;  %4982 = vst [vmem:[#allocation51_spill] sm:$0xff] %v3426_v16  ;;  %v4983_v43 = vrot.slane %v2933_v20, %v2896_v6  ;;  %v4984_v30 = vrot.slane %v2933_v20, %v2899_v7  ;;  %v3447_v20 = vld [vmem:[#allocation9 + $0x26] ss:$8 sm:$0x3]  ;;  %s2585_s12 = smov 111  }
 0x149   :  { %v517_v29 = vadd.f32 %v515_v27, %v511_v42  ;;  %v550_v39 = vmul.f32 %v4980_v45, %v541_v9  ;;  %v4981_v36 = vmov %v4980_v45  ;;  %v3443_v42 = vpop.permute.xlu1 %944  ;;  %4985 = vst [vmem:[#allocation52_spill] sm:$0xff] %v3447_v20  ;;  %1578 = vrot.lane.b32.xlu1 %v2673_v25, %s2585_s12  ;;  %v5020_v20 = vld [vmem:[#allocation32_spill] sm:$0xff]  ;;  %vm1179_vm11 = vcmp.lt.s32.totalorder %v2919_v11, 2 }
 0x14a   :  { %v551_v37 = vmul.f32 %v4981_v36, %v540_v14  ;;  %v491_v41 = vmul.f32 %v4983_v43, %v476_v51  ;;  %v492_v38 = vmul.f32 %v4984_v30, %v477_v55  ;;  %1543 = vrot.lane.b32.xlu0 %v2660_v22, %s2584_s3  ;;  %s4179_s3 = sld [smem:[#allocation5 + $0x4c]] }
 0x14b   :  { %v556_v9 = vadd.f32 %v554_v33, %v550_v39  ;;  %v4990_v33 = vrot.slane %v2974_v13, %v2899_v7 }
 0x14c   :  { %v557_v15 = vadd.f32 %v555_v48, %v551_v37  ;;  %v493_v55 = vadd.f32 %v491_v41, %v453_v49  ;;  %v494_v36 = vadd.f32 %v492_v38, %v454_v52  ;;  %v4986_v48 = vrot.slane %v2957_v17, %v2896_v6  ;;  %v3463_v52 = vpop.permute.xlu0 %935 }
 0x14d   :  { %v4987_v37 = vrot.slane %v2957_v17, %v2899_v7  ;;  %v581_v49 = vsel %vm579_vm12, %v2815_v53, %v2823_v57  ;;  %v580_v17 = vsel %vm579_vm12, %v2823_v57, %v2815_v53  ;;  %v586_v53 = vsel %vm579_vm12, %v2829_v59, %v2821_v56  ;;  %1585 = vrot.lane.b32.xlu1 %v2665_v23, %s2585_s12 }
 0x14e   :  { %v531_v39 = vmul.f32 %v4986_v48, %v516_v19  ;;  %v4989_v48 = vrot.slane %v2974_v13, %v2896_v6  ;;  %v572_v43 = vmul.f32 %v4990_v33, %v557_v15  ;;  %v587_v57 = vsel %vm579_vm12, %v2821_v56, %v2829_v59  ;;  %v3498_v13 = vld [vmem:[#allocation9 + $0x30] ss:$8 sm:$0x3]  ;;  %1576 = vrot.lane.b32.xlu0 %v2667_v24, %s2585_s12 }
 0x14f   :  { %v532_v30 = vmul.f32 %v4987_v37, %v517_v29  ;;  %v626_v56 = vsel %vm619_vm13, %v2855_v63, %v2835_v60  ;;  %v627_v59 = vsel %vm619_vm13, %v2835_v60, %v2855_v63  ;;  %vm1219_vm12 = vcmp.lt.s32.totalorder %v2919_v11, 1 }
 0x150   :  { %v571_v37 = vmul.f32 %v4989_v48, %v556_v9  ;;  %v3496_v9 = vpop.permute.xlu1 %977  ;;  %v533_v15 = vadd.f32 %v531_v39, %v493_v55  ;;  %v4991_v48 = vstv %s4988_s24  ;;  %v3514_v55 = vpop.permute.xlu0 %942  ;;  %v4993_v39 = vstv %s2886_s15  ;;  %s4996_s15 = sld [smem:[#allocation22_spill]] }
 0x151   :  { %v534_v33 = vadd.f32 %v532_v30, %v494_v36  ;;  %v590_v38 = vmul.f32 %v4991_v48, %v581_v49  ;;  %v4992_v14 = vmov %v4991_v48  ;;  %v4994_v30 = vmov %v4993_v39  ;;  %v5000_v36 = vld [vmem:[#allocation19_spill] sm:$0xff]  ;;  %s4229_s24 = sld [smem:[#allocation5 + $0x4e]] }
 0x152   :  { %v591_v27 = vmul.f32 %v4992_v14, %v580_v17  ;;  %v594_v14 = vmul.f32 %v4993_v39, %v587_v57  ;;  %v595_v49 = vmul.f32 %v4994_v30, %v586_v53  ;;  %v3523_v17 = vld [vmem:[#allocation9 + $0x27] ss:$8 sm:$0x3]  ;;  %v3529_v60 = vadd.f32 %v571_v37, %v533_v15  ;;  %1583 = vrot.lane.b32.xlu0 %v2660_v22, %s2585_s12  ;;  %s4225_s12 = sld [smem:[#allocation5 + $0x1d]] }
 0x153   :  { %4995 = vst [vmem:[#allocation53_spill] sm:$0xff] %v3523_v17  ;;  %v3531_v63 = vadd.f32 %v572_v43, %v534_v33  ;;  %v620_v57 = vsel %vm619_vm13, %v2841_v61, %v2827_v58  ;;  %v621_v53 = vsel %vm619_vm13, %v2827_v58, %v2841_v61  ;;  %v4997_v37 = vstv %s2893_s17  ;;  %v4999_v61 = vld [vmem:[#allocation18_spill] sm:$0xff]  ;;  %s2586_s17 = smov 110  }
 0x154   :  { %v3543_v39 = vpop.permute.xlu1 %984  ;;  %v634_v43 = vmul.f32 %v4997_v37, %v627_v59  ;;  %v4998_v15 = vmov %v4997_v37  ;;  %v666_v30 = vsel %vm659_vm14, %v2883_v4, %v2863_v0  ;;  %v667_v58 = vsel %vm659_vm14, %v2863_v0, %v2883_v4  ;;  %v3565_v59 = vpop.permute.xlu0 %975  ;;  %1618 = vrot.lane.b32.xlu1 %v2673_v25, %s2586_s17  ;;  %v5019_v0 = vld [vmem:[#allocation25_spill] sm:$0xff] }
 0x155   :  { %v635_v33 = vmul.f32 %v4998_v15, %v626_v56  ;;  %v660_v29 = vsel %vm659_vm14, %v5000_v36, %v4999_v61  ;;  %v661_v56 = vsel %vm659_vm14, %v4999_v61, %v5000_v36  ;;  %v596_v4 = vadd.f32 %v594_v14, %v590_v38 }
 0x156   :  { %v597_v15 = vadd.f32 %v595_v49, %v591_v27  ;;  %v5001_v26 = vstv %s4996_s15  ;;  %v5003_v61 = vstv %s2909_s20  ;;  %v706_v37 = vsel %vm699_vm15, %v5006_v18, %v5005_v21  ;;  %s3619_s20 = sld [smem:[#allocation5 + $0x48]]  ;;  %1616 = vrot.lane.b32.xlu0 %v2667_v24, %s2586_s17 }
 0x157   :  { %v630_v1 = vmul.f32 %v5001_v26, %v621_v53  ;;  %v5002_v45 = vmov %v5001_v26  ;;  %v674_v41 = vmul.f32 %v5003_v61, %v667_v58  ;;  %v5004_v47 = vmov %v5003_v61  ;;  %v5010_v53 = vld [vmem:[#allocation24_spill] sm:$0xff]  ;;  %v5012_v58 = vld [vmem:[#allocation37_spill] sm:$0xff]  ;;  %s4250_s15 = sld [smem:[#allocation5 + $0x1e]] }
 0x158   :  { %v631_v36 = vmul.f32 %v5002_v45, %v620_v57  ;;  %v675_v51 = vmul.f32 %v5004_v47, %v666_v30  ;;  %v707_v48 = vsel %vm699_vm15, %v5005_v21, %v5006_v18  ;;  %v3593_v26 = vpop.permute.xlu1 %1017  ;;  %v5007_v45 = vstv %s2901_s18  ;;  %v5009_v57 = vld [vmem:[#allocation20_spill] sm:$0xff]  ;;  %v5011_v30 = vld [vmem:[#allocation29_spill] sm:$0xff]  ;;  %s5013_s18 = sld [smem:[#allocation28_spill]]  ;;  %1625 = vrot.lane.b32.xlu1 %v2665_v23, %s2586_s17 }
 0x159   :  { %v636_v47 = vadd.f32 %v634_v43, %v630_v1  ;;  %v670_v38 = vmul.f32 %v5007_v45, %v661_v56  ;;  %v5008_v14 = vmov %v5007_v45  ;;  %v700_v18 = vsel %vm699_vm15, %v5010_v53, %v5009_v57  ;;  %v3615_v43 = vpop.permute.xlu0 %982 }
 0x15a   :  { %v637_v27 = vadd.f32 %v635_v33, %v631_v36  ;;  %v671_v49 = vmul.f32 %v5008_v14, %v660_v29  ;;  %v701_v21 = vsel %vm699_vm15, %v5009_v57, %v5010_v53  ;;  %v746_v1 = vsel %vm739_vm0, %v5012_v58, %v5011_v30  ;;  %v5014_v33 = vld [vmem:[#allocation31_spill] sm:$0xff]  ;;  %1623 = vrot.lane.b32.xlu0 %v2660_v22, %s2586_s17  ;;  %s4254_s17 = sld [smem:[#allocation5 + $0x4f]] }
 0x15b   :  { %v747_v29 = vsel %vm739_vm0, %v5011_v30, %v5012_v58  ;;  %v5015_v56 = vrot.slane %v5014_v33, %v2896_v6  ;;  %v5016_v61 = vrot.slane %v5014_v33, %v2899_v7  ;;  %v5017_v14 = vstv %s2925_s22  ;;  %s2587_s22 = smov 109  }
 0x15c   :  { %v714_v57 = vmul.f32 %v5017_v14, %v707_v48  ;;  %v5018_v53 = vmov %v5017_v14  ;;  %v676_v58 = vadd.f32 %v674_v41, %v670_v38  ;;  %v677_v19 = vadd.f32 %v675_v51, %v671_v49  ;;  %v3642_v41 = vpop.permute.xlu1 %1024  ;;  %1658 = vrot.lane.b32.xlu1 %v2673_v25, %s2587_s22 }
 0x15d   :  { %v611_v36 = vmul.f32 %v5015_v56, %v596_v4  ;;  %v612_v45 = vmul.f32 %v5016_v61, %v597_v15  ;;  %v715_v30 = vmul.f32 %v5018_v53, %v706_v37  ;;  %v740_v16 = vsel %vm739_vm0, %v5020_v20, %v5019_v0  ;;  %v5026_v61 = vld [vmem:[#allocation33_spill] sm:$0xff]  ;;  %v3658_v44 = vpop.permute.xlu0 %1015 }
 0x15e   :  { %v741_v4 = vsel %vm739_vm0, %v5019_v0, %v5020_v20  ;;  %v5022_v51 = vstv %s2913_s21  ;;  %v5024_v38 = vstv %s5013_s18  ;;  %v5027_v20 = vrot.slane %v5026_v61, %v2896_v6  ;;  %s5039_s21 = sld [smem:[#allocation30_spill]]  ;;  %1656 = vrot.lane.b32.xlu0 %v2667_v24, %s2587_s22 }
 0x15f   :  { %v710_v48 = vmul.f32 %v5022_v51, %v701_v21  ;;  %v5023_v37 = vmov %v5022_v51  ;;  %v754_v49 = vmul.f32 %v5024_v38, %v747_v29  ;;  %v5025_v33 = vmov %v5024_v38  ;;  %s4275_s18 = sld [smem:[#allocation5 + $0x1f]] }
 0x160   :  { %v711_v15 = vmul.f32 %v5023_v37, %v700_v18  ;;  %v755_v56 = vmul.f32 %v5025_v33, %v746_v1  ;;  %v651_v0 = vmul.f32 %v5027_v20, %v636_v47  ;;  %v5028_v14 = vrot.slane %v5026_v61, %v2899_v7  ;;  %1665 = vrot.lane.b32.xlu1 %v2665_v23, %s2587_s22 }
 0x161   :  { %v1259_v21 = vstv %s3572_s16  ;;  %v716_v29 = vadd.f32 %v714_v57, %v710_v48  ;;  %v5029_v51 = vstv %s5021_s1  ;;  %v614_v33 = vadd.f32 %v612_v45, %v3531_v63  ;;  %s2598_s16 = smov 80   ;;  %s2599_s1 = smov 79  }
 0x162   :  { %v652_v53 = vmul.f32 %v5028_v14, %v637_v27  ;;  %v717_v1 = vadd.f32 %v715_v30, %v711_v15  ;;  %v750_v37 = vmul.f32 %v5029_v51, %v741_v4  ;;  %v5030_v38 = vmov %v5029_v51  ;;  %v5036_v51 = vld [vmem:[#allocation35_spill] sm:$0xff]  ;;  %1663 = vrot.lane.b32.xlu0 %v2660_v22, %s2587_s22  ;;  %s4300_s22 = sld [smem:[#allocation5 + $0x20]] }
 0x163   :  { %v751_v47 = vmul.f32 %v5030_v38, %v740_v16  ;;  %v613_v27 = vadd.f32 %v611_v36, %v3529_v60  ;;  %v5031_v61 = vrot.slane %v3009_v2, %v2896_v6  ;;  %v5032_v57 = vrot.slane %v3009_v2, %v2899_v7  ;;  %v3680_v16 = vpop.permute.xlu1 %1057  ;;  %v5033_v60 = vld [vmem:[#allocation40_spill] sm:$0xff]  ;;  %v5034_v36 = vld [vmem:[#allocation46_spill] sm:$0xff] }
 0x164   :  { %v756_v4 = vadd.f32 %v754_v49, %v750_v37  ;;  %v786_v63 = vsel %vm779_vm1, %v5034_v36, %v5033_v60  ;;  %v787_v2 = vsel %vm779_vm1, %v5033_v60, %v5034_v36  ;;  %v654_v45 = vadd.f32 %v652_v53, %v614_v33  ;;  %v2463_v49 = vld [vmem:[#allocation2] sm:$0xf]  ;;  %v5040_v53 = vld [vmem:[#allocation34_spill] sm:$0xff] }
 0x165   :  { %v691_v20 = vmul.f32 %v5031_v61, %v676_v58  ;;  %v692_v30 = vmul.f32 %v5032_v57, %v677_v19  ;;  %v757_v48 = vadd.f32 %v755_v56, %v751_v47  ;;  %v653_v19 = vadd.f32 %v651_v0, %v613_v27  ;;  %v3691_v58 = vpop.permute.xlu0 %1022  ;;  %v5041_v27 = vld [vmem:[#allocation42_spill] sm:$0xff] }
 0x166   :  { %v5035_v56 = vstv %s3468_s30  ;;  %v5037_v37 = vrot.slane %v5036_v51, %v2896_v6  ;;  %v5038_v47 = vrot.slane %v5036_v51, %v2899_v7  ;;  %v780_v33 = vsel %vm779_vm1, %v5041_v27, %v5040_v53  ;;  %s2597_s30 = smov 81  }
 0x167   :  { %v3698_v14 = vmul.f32 %v2463_v49, %v5035_v56  ;;  %v781_v61 = vsel %vm779_vm1, %v5040_v53, %v5041_v27  ;;  %v5042_v57 = vstv %s2976_s10  ;;  %v3720_v49 = vpop.permute.xlu1 %1064  ;;  %v5044_v51 = vrot.slane %v3498_v13, %v2899_v7  ;;  %v5046_v27 = vld [vmem:[#allocation36_spill] sm:$0xff]  ;;  %s2588_s10 = smov 99  }
 0x168   :  { %v731_v38 = vmul.f32 %v5037_v37, %v716_v29  ;;  %v732_v0 = vmul.f32 %v5038_v47, %v717_v1  ;;  %v794_v60 = vmul.f32 %v5042_v57, %v787_v2  ;;  %v5043_v36 = vmov %v5042_v57  ;;  %v2464_v1 = vld [vmem:[#allocation3] sm:$0xf]  ;;  %1698 = vrot.lane.b32.xlu1 %v2673_v25, %s2588_s10 }
 0x169   :  { %v795_v29 = vmul.f32 %v5043_v36, %v786_v63  ;;  %v3722_v56 = vmul.f32 %v2464_v1, %v1259_v21  ;;  %v5045_v37 = vrot.slane %v3498_v13, %v2896_v6  ;;  %v693_v53 = vadd.f32 %v691_v20, %v653_v19  ;;  %v5051_v19 = vld [vmem:[#allocation45_spill] sm:$0xff]  ;;  %1696 = vrot.lane.b32.xlu0 %v2667_v24, %s2588_s10 }
 0x16a   :  { %v694_v2 = vadd.f32 %v692_v30, %v654_v45  ;;  %v5047_v63 = vrot.slane %v5046_v27, %v2896_v6  ;;  %v5048_v36 = vrot.slane %v5046_v27, %v2899_v7  ;;  %v5049_v21 = vstv %s5039_s21  ;;  %v3751_v30 = vpop.permute.xlu0 %1055  ;;  %s4304_s21 = sld [smem:[#allocation5 + $0x51]] }
 0x16b   :  { %v3730_v47 = vcombine.low %v5045_v37, %v5044_v51  ;;  %v790_v1 = vmul.f32 %v5049_v21, %v781_v61  ;;  %v5050_v15 = vmov %v5049_v21  ;;  %v826_v13 = vsel %vm819_vm2, %v3225_v28, %v3165_v54 }
 0x16c   :  { %v771_v57 = vmul.f32 %v5047_v63, %v756_v4  ;;  %v772_v18 = vmul.f32 %v5048_v36, %v757_v48  ;;  %v791_v17 = vmul.f32 %v5050_v15, %v780_v33  ;;  %v827_v20 = vsel %vm819_vm2, %v3165_v54, %v3225_v28  ;;  %1705 = vrot.lane.b32.xlu1 %v2665_v23, %s2588_s10 }
 0x16d   :  { %v733_v4 = vadd.f32 %v731_v38, %v693_v53  ;;  %v734_v48 = vadd.f32 %v732_v0, %v694_v2  ;;  %v820_v45 = vsel %vm819_vm2, %v3190_v62, %v5051_v19  ;;  %v821_v54 = vsel %vm819_vm2, %v5051_v19, %v3190_v62  ;;  %v3774_v62 = vpop.permute.xlu1 %1097  ;;  %1703 = vrot.lane.b32.xlu0 %v2660_v22, %s2588_s10  ;;  %s2600_s10 = smov 78  }
 0x16e   :  { %v796_v28 = vadd.f32 %v794_v60, %v790_v1  ;;  %v797_v15 = vadd.f32 %v795_v29, %v791_v17  ;;  %v866_v38 = vsel %vm859_vm3, %v3324_v34, %v3262_v40  ;;  %v867_v0 = vsel %vm859_vm3, %v3262_v40, %v3324_v34 }
 0x16f   :  { %v773_v33 = vadd.f32 %v771_v57, %v733_v4  ;;  %v774_v61 = vadd.f32 %v772_v18, %v734_v48  ;;  %v5052_v60 = vstv %s3000_s19  ;;  %v5054_v37 = vstv %s2990_s29  ;;  %v3792_v18 = vpop.permute.xlu0 %1062  ;;  %s5068_s19 = sld [smem:[#allocation44_spill]]  ;;  %s2590_s29 = smov 97  }
 0x170   :  { %v834_v17 = vmul.f32 %v5052_v60, %v827_v20  ;;  %v5053_v29 = vmov %v5052_v60  ;;  %v830_v53 = vmul.f32 %v5054_v37, %v821_v54  ;;  %v5055_v2 = vmov %v5054_v37 }
 0x171   :  { %v835_v51 = vmul.f32 %v5053_v29, %v826_v13  ;;  %v831_v27 = vmul.f32 %v5055_v2, %v820_v45  ;;  %v860_v40 = vsel %vm859_vm3, %v3278_v35, %v3206_v12  ;;  %v861_v34 = vsel %vm859_vm3, %v3206_v12, %v3278_v35  ;;  %v5058_v35 = vld [vmem:[#allocation39_spill] sm:$0xff] }
 0x172   :  { %v5056_v63 = vstv %s3025_s14  ;;  %v906_v1 = vsel %vm899_vm4, %v3422_v32, %v3361_v50  ;;  %v907_v12 = vsel %vm899_vm4, %v3361_v50, %v3422_v32  ;;  %v5059_v13 = vrot.slane %v5058_v35, %v2896_v6  ;;  %s5061_s14 = sld [smem:[#allocation38_spill]]  ;;  %v3824_v50 = vpop.permute.xlu1 %1104 }
 0x173   :  { %v874_v57 = vmul.f32 %v5056_v63, %v867_v0  ;;  %v5057_v36 = vmov %v5056_v63  ;;  %v5060_v4 = vrot.slane %v5058_v35, %v2899_v7  ;;  %v900_v19 = vsel %vm899_vm4, %v3383_v31, %v3308_v10 }
 0x174   :  { %v875_v21 = vmul.f32 %v5057_v36, %v866_v38  ;;  %v811_v20 = vmul.f32 %v5059_v13, %v796_v28  ;;  %v901_v45 = vsel %vm899_vm4, %v3308_v10, %v3383_v31  ;;  %v836_v32 = vadd.f32 %v834_v17, %v830_v53  ;;  %v3843_v17 = vpop.permute.xlu0 %1095 }
 0x175   :  { %v812_v48 = vmul.f32 %v5060_v4, %v797_v15  ;;  %v837_v54 = vadd.f32 %v835_v51, %v831_v27  ;;  %v5062_v28 = vstv %s3015_s4  ;;  %v5064_v60 = vstv %s3084_s0  ;;  %s2589_s4 = smov 98   ;;  %s5074_s0 = sld [smem:[#allocation48_spill]] }
 0x176   :  { %v870_v15 = vmul.f32 %v5062_v28, %v861_v34  ;;  %v5063_v38 = vmov %v5062_v28  ;;  %v914_v29 = vmul.f32 %v5064_v60, %v907_v12  ;;  %v5065_v37 = vmov %v5064_v60  ;;  %1738 = vrot.lane.b32.xlu1 %v2673_v25, %s2589_s4  ;;  %1736 = vrot.lane.b32.xlu0 %v2667_v24, %s2589_s4 }
 0x177   :  { %v871_v0 = vmul.f32 %v5063_v38, %v860_v40  ;;  %v915_v2 = vmul.f32 %v5065_v37, %v906_v1  ;;  %v946_v10 = vsel %vm939_vm5, %v3514_v55, %v3443_v42  ;;  %v947_v31 = vsel %vm939_vm5, %v3443_v42, %v3514_v55 }
 0x178   :  { %v876_v51 = vadd.f32 %v874_v57, %v870_v15  ;;  %v5066_v27 = vstv %s5061_s14  ;;  %v940_v42 = vsel %vm939_vm5, %v3463_v52, %v3409_v46  ;;  %v941_v55 = vsel %vm939_vm5, %v3409_v46, %v3463_v52  ;;  %v5069_v46 = vld [vmem:[#allocation41_spill] sm:$0xff]  ;;  %s4325_s14 = sld [smem:[#allocation5 + $0x21]] }
 0x179   :  { %v877_v53 = vadd.f32 %v875_v21, %v871_v0  ;;  %v910_v40 = vmul.f32 %v5066_v27, %v901_v45  ;;  %v5067_v34 = vmov %v5066_v27  ;;  %v986_v57 = vsel %vm979_vm6, %v3615_v43, %v3543_v39  ;;  %v3869_v21 = vpop.permute.xlu1 %1137 }
 0x17a   :  { %v911_v63 = vmul.f32 %v5067_v34, %v900_v19  ;;  %v987_v36 = vsel %vm979_vm6, %v3543_v39, %v3615_v43  ;;  %v5070_v52 = vrot.slane %v5069_v46, %v2896_v6  ;;  %v5071_v12 = vrot.slane %v5069_v46, %v2899_v7  ;;  %1745 = vrot.lane.b32.xlu1 %v2665_v23, %s2589_s4 }
 0x17b   :  { %v5072_v13 = vstv %s3123_s25  ;;  %v916_v39 = vadd.f32 %v914_v29, %v910_v40  ;;  %v980_v28 = vsel %vm979_vm6, %v3565_v59, %v3496_v9  ;;  %v5075_v15 = vstv %s5068_s19  ;;  %v5079_v40 = vld [vmem:[#allocation43_spill] sm:$0xff]  ;;  %1743 = vrot.lane.b32.xlu0 %v2660_v22, %s2589_s4  ;;  %s2591_s25 = smov 96   ;;  %s4329_s4 = sld [smem:[#allocation5 + $0x52]] }
 0x17c   :  { %v851_v1 = vmul.f32 %v5070_v52, %v836_v32  ;;  %v852_v35 = vmul.f32 %v5071_v12, %v837_v54  ;;  %v954_v4 = vmul.f32 %v5072_v13, %v947_v31  ;;  %v5073_v19 = vmov %v5072_v13  ;;  %v1103_v54 = vpop.permute.xlu0 %1102  ;;  %s2601_s19 = smov 77  }
 0x17d   :  { %v955_v45 = vmul.f32 %v5073_v19, %v946_v10  ;;  %v917_v43 = vadd.f32 %v915_v2, %v911_v63  ;;  %v981_v32 = vsel %vm979_vm6, %v3496_v9, %v3565_v59  ;;  %v950_v38 = vmul.f32 %v5075_v15, %v941_v55 }
 0x17e   :  { %v5076_v0 = vmov %v5075_v15  ;;  %v5077_v29 = vstv %s3167_s26  ;;  %v813_v31 = vadd.f32 %v811_v20, %v773_v33  ;;  %v814_v27 = vadd.f32 %v812_v48, %v774_v61  ;;  %1778 = vrot.lane.b32.xlu1 %v2673_v25, %s2590_s29  ;;  %v5087_v15 = vld [vmem:[#allocation17_spill] sm:$0xff]  ;;  %s2592_s26 = smov 95  }
 0x17f   :  { %v951_v60 = vmul.f32 %v5076_v0, %v940_v42  ;;  %v994_v37 = vmul.f32 %v5077_v29, %v987_v36  ;;  %v5078_v2 = vmov %v5077_v29  ;;  %v5080_v34 = vrot.slane %v5079_v40, %v2896_v6  ;;  %v3909_v42 = vpop.permute.xlu1 %1144  ;;  %v5088_v0 = vld [vmem:[#allocation49_spill] sm:$0xff]  ;;  %1776 = vrot.lane.b32.xlu0 %v2667_v24, %s2590_s29 }
 0x180   :  { %v995_v10 = vmul.f32 %v5078_v2, %v986_v57  ;;  %v5081_v59 = vrot.slane %v5079_v40, %v2899_v7  ;;  %v956_v55 = vadd.f32 %v954_v4, %v950_v38  ;;  %v5082_v57 = vstv %s5074_s0  ;;  %v3921_v19 = vpop.permute.xlu0 %1135  ;;  %s4350_s0 = sld [smem:[#allocation5 + $0x22]] }
 0x181   :  { %v891_v9 = vmul.f32 %v5080_v34, %v876_v51  ;;  %v957_v36 = vadd.f32 %v955_v45, %v951_v60  ;;  %v990_v33 = vmul.f32 %v5082_v57, %v981_v32  ;;  %v5083_v61 = vmov %v5082_v57  ;;  %v5084_v51 = vld [vmem:[#allocation47_spill] sm:$0xff] }
 0x182   :  { %v892_v63 = vmul.f32 %v5081_v59, %v877_v53  ;;  %v991_v20 = vmul.f32 %v5083_v61, %v980_v28  ;;  %v853_v48 = vadd.f32 %v851_v1, %v813_v31  ;;  %v854_v46 = vadd.f32 %v852_v35, %v814_v27  ;;  %1785 = vrot.lane.b32.xlu1 %v2665_v23, %s2590_s29 }
 0x183   :  { %v5085_v52 = vrot.slane %v5084_v51, %v2896_v6  ;;  %v5086_v53 = vrot.slane %v5084_v51, %v2899_v7  ;;  %v996_v4 = vadd.f32 %v994_v37, %v990_v33  ;;  %v1026_v1 = vsel %vm1019_vm7, %v3691_v58, %v3642_v41  ;;  %v3936_v28 = vpop.permute.xlu1 %1177  ;;  %1783 = vrot.lane.b32.xlu0 %v2660_v22, %s2590_s29  ;;  %s4354_s29 = sld [smem:[#allocation5 + $0x53]] }
 0x184   :  { %v997_v45 = vadd.f32 %v995_v10, %v991_v20  ;;  %v1027_v35 = vsel %vm1019_vm7, %v3642_v41, %v3691_v58  ;;  %v3940_v32 = vadd.f32 %v3722_v56, %v3698_v14  ;;  %v1280_v38 = vrot.slane %v3730_v47, %v5087_v15  ;;  %v1143_v34 = vpop.permute.xlu0 %1142 }
 0x185   :  { %v931_v12 = vmul.f32 %v5085_v52, %v916_v39  ;;  %v932_v13 = vmul.f32 %v5086_v53, %v917_v43  ;;  %v893_v39 = vadd.f32 %v891_v9, %v853_v48  ;;  %v894_v43 = vadd.f32 %v892_v63, %v854_v46 }
 0x186   :  { %v5089_v60 = vrot.slane %v5088_v0, %v2896_v6  ;;  %v5090_v58 = vrot.slane %v5088_v0, %v2899_v7  ;;  %v1020_v37 = vsel %vm1019_vm7, %v3658_v44, %v3593_v26  ;;  %v1021_v14 = vsel %vm1019_vm7, %v3593_v26, %v3658_v44  ;;  %1818 = vrot.lane.b32.xlu1 %v2673_v25, %s2591_s25 }
 0x187   :  { %v5091_v56 = vstv %s3202_s27  ;;  %v1066_v27 = vsel %vm1059_vm8, %v3792_v18, %v3720_v49  ;;  %v1067_v40 = vsel %vm1059_vm8, %v3720_v49, %v3792_v18  ;;  %v933_v44 = vadd.f32 %v931_v12, %v893_v39  ;;  %1816 = vrot.lane.b32.xlu0 %v2667_v24, %s2591_s25  ;;  %s4105_s27 = sld [smem:[#allocation5 + $0x4a]] }
 0x188   :  { %v971_v41 = vmul.f32 %v5089_v60, %v956_v55  ;;  %v972_v29 = vmul.f32 %v5090_v58, %v957_v36  ;;  %v1034_v2 = vmul.f32 %v5091_v56, %v1027_v35  ;;  %v5092_v10 = vmov %v5091_v56 }
 0x189   :  { %v1035_v31 = vmul.f32 %v5092_v10, %v1026_v1  ;;  %v934_v26 = vadd.f32 %v932_v13, %v894_v43  ;;  %v5093_v9 = vrot.slane %v3200_v3, %v2896_v6  ;;  %v5094_v63 = vrot.slane %v3200_v3, %v2899_v7  ;;  %v1185_v3 = vpop.permute.xlu1 %1184 }
 0x18a   :  { %v5095_v36 = vstv %s3175_s28  ;;  %v1060_v18 = vsel %vm1059_vm8, %v3751_v30, %v3680_v16  ;;  %v1061_v61 = vsel %vm1059_vm8, %v3680_v16, %v3751_v30  ;;  %v5097_v20 = vstv %s3312_s6  ;;  %1825 = vrot.lane.b32.xlu1 %v2665_v23, %s2591_s25  ;;  %s4083_s28 = sld [smem:[#allocation5 + $0x19]] }
 0x18b   :  { %v1011_v59 = vmul.f32 %v5093_v9, %v996_v4  ;;  %v1012_v55 = vmul.f32 %v5094_v63, %v997_v45  ;;  %v1030_v57 = vmul.f32 %v5095_v36, %v1021_v14  ;;  %v5096_v33 = vmov %v5095_v36  ;;  %v1176_v4 = vpop.permute.xlu0 %1175  ;;  %1823 = vrot.lane.b32.xlu0 %v2660_v22, %s2591_s25  ;;  %s4151_s6 = sld [smem:[#allocation5 + $0x1a]] }
 0x18c   :  { %v1031_v49 = vmul.f32 %v5096_v33, %v1020_v37  ;;  %v1074_v48 = vmul.f32 %v5097_v20, %v1067_v40  ;;  %v5098_v46 = vmov %v5097_v20  ;;  %v1106_v52 = vsel %vm1099_vm9, %v1103_v54, %v3824_v50  ;;  %s4373_s25 = sld [smem:[#allocation5 + $0x23]] }
 0x18d   :  { %v1075_v51 = vmul.f32 %v5098_v46, %v1066_v27  ;;  %v1107_v12 = vsel %vm1099_vm9, %v3824_v50, %v1103_v54  ;;  %v973_v16 = vadd.f32 %v971_v41, %v933_v44  ;;  %v974_v30 = vadd.f32 %v972_v29, %v934_v26  ;;  %v1218_v37 = vpop.permute.xlu1 %1217 }
 0x18e   :  { %v1036_v53 = vadd.f32 %v1034_v2, %v1030_v57  ;;  %v1037_v13 = vadd.f32 %v1035_v31, %v1031_v49  ;;  %v5099_v45 = vstv %s3212_s5  ;;  %v1100_v50 = vsel %vm1099_vm9, %v3843_v17, %v3774_v62  ;;  %1858 = vrot.lane.b32.xlu1 %v2673_v25, %s2592_s26  ;;  %s2593_s5 = smov 94  }
 0x18f   :  { %v1070_v1 = vmul.f32 %v5099_v45, %v1061_v61  ;;  %v5100_v35 = vmov %v5099_v45  ;;  %v1101_v54 = vsel %vm1099_vm9, %v3774_v62, %v3843_v17  ;;  %v5101_v43 = vstv %s3345_s23  ;;  %1856 = vrot.lane.b32.xlu0 %v2667_v24, %s2592_s26  ;;  %s2594_s23 = smov 93  }
 0x190   :  { %v1071_v39 = vmul.f32 %v5100_v35, %v1060_v18  ;;  %v1114_v0 = vmul.f32 %v5101_v43, %v1107_v12  ;;  %v5102_v60 = vmov %v5101_v43  ;;  %v1146_v58 = vsel %vm1139_vm10, %v1143_v34, %v3909_v42 }
 0x191   :  { %v1115_v41 = vmul.f32 %v5102_v60, %v1106_v52  ;;  %v1147_v29 = vsel %vm1139_vm10, %v3909_v42, %v1143_v34  ;;  %v1013_v14 = vadd.f32 %v1011_v59, %v973_v16  ;;  %v1014_v62 = vadd.f32 %v1012_v55, %v974_v30  ;;  %v1183_v34 = vpop.permute.xlu0 %1182  ;;  %v1225_v18 = vpop.permute.xlu1 %1224 }
 0x192   :  { %v1076_v17 = vadd.f32 %v1074_v48, %v1070_v1  ;;  %v1077_v56 = vadd.f32 %v1075_v51, %v1071_v39  ;;  %v5103_v2 = vstv %s3322_s2  ;;  %v1140_v40 = vsel %vm1139_vm10, %v3921_v19, %v3869_v21  ;;  %1865 = vrot.lane.b32.xlu1 %v2665_v23, %s2592_s26  ;;  %s4156_s2 = sld [smem:[#allocation5 + $0x4b]] }
 0x193   :  { %v1110_v10 = vmul.f32 %v5103_v2, %v1101_v54  ;;  %v5104_v31 = vmov %v5103_v2  ;;  %v1141_v42 = vsel %vm1139_vm10, %v3869_v21, %v3921_v19  ;;  %v5105_v44 = vstv %s3387_s8  ;;  %1863 = vrot.lane.b32.xlu0 %v2660_v22, %s2592_s26  ;;  %s2595_s8 = smov 83   ;;  %s4377_s26 = sld [smem:[#allocation5 + $0x54]] }
 0x194   :  { %v1111_v27 = vmul.f32 %v5104_v31, %v1100_v50  ;;  %v1154_v26 = vmul.f32 %v5105_v44, %v1147_v29  ;;  %v5106_v9 = vmov %v5105_v44  ;;  %v1186_v63 = vsel %vm1179_vm11, %v1183_v34, %v1185_v3  ;;  %v5120_v31 = vld [vmem:[#allocation51_spill] sm:$0xff] }
 0x195   :  { %v1155_v59 = vmul.f32 %v5106_v9, %v1146_v58  ;;  %v1187_v55 = vsel %vm1179_vm11, %v1185_v3, %v1183_v34  ;;  %v5107_v36 = vrot.slane %v3243_v8, %v2896_v6  ;;  %v5108_v19 = vrot.slane %v3243_v8, %v2899_v7  ;;  %v1216_v1 = vpop.permute.xlu0 %1215  ;;  %v1299_v60 = vpop.permute.xlu1 %1298 }
 0x196   :  { %v1116_v33 = vadd.f32 %v1114_v0, %v1110_v10  ;;  %v1117_v49 = vadd.f32 %v1115_v41, %v1111_v27  ;;  %v5109_v61 = vstv %s3363_s7  ;;  %v1180_v3 = vsel %vm1179_vm11, %v1176_v4, %v3936_v28  ;;  %v5117_v41 = vld [vmem:[#allocation50_spill] sm:$0xff]  ;;  %1898 = vrot.lane.b32.xlu1 %v2673_v25, %s2593_s5  ;;  %s4175_s7 = sld [smem:[#allocation5 + $0x1b]] }
 0x197   :  { %v1051_v21 = vmul.f32 %v5107_v36, %v1036_v53  ;;  %v1052_v57 = vmul.f32 %v5108_v19, %v1037_v13  ;;  %v1150_v20 = vmul.f32 %v5109_v61, %v1141_v42  ;;  %v5110_v48 = vmov %v5109_v61  ;;  %1896 = vrot.lane.b32.xlu0 %v2667_v24, %s2593_s5 }
 0x198   :  { %v1151_v46 = vmul.f32 %v5110_v48, %v1140_v40  ;;  %v1181_v8 = vsel %vm1179_vm11, %v3936_v28, %v1176_v4  ;;  %v5111_v51 = vrot.slane %v3296_v5, %v2896_v6  ;;  %v5112_v12 = vrot.slane %v3296_v5, %v2899_v7 }
 0x199   :  { %v5113_v30 = vstv %s3416_s9  ;;  %v1156_v35 = vadd.f32 %v1154_v26, %v1150_v20  ;;  %vm1300_vm13 = vcmp.lt.s32.totalorder %v2919_v11, 127  ;;  %v1282_v5 = vmul.f32 %v1280_v38, %v3940_v32  ;;  %v1223_v10 = vpop.permute.xlu0 %1222  ;;  %v5127_v20 = vld [vmem:[#allocation52_spill] sm:$0xff]  ;;  %s4204_s9 = sld [smem:[#allocation5 + $0x4d]] }
 0x19a   :  { %v1091_v52 = vmul.f32 %v5111_v51, %v1076_v17  ;;  %v1092_v16 = vmul.f32 %v5112_v12, %v1077_v56  ;;  %v1194_v53 = vmul.f32 %v5113_v30, %v1187_v55  ;;  %v5114_v13 = vmov %v5113_v30  ;;  %v1320_v12 = vld [vmem:[#allocation9 + $0x31] ss:$8 sm:$0x3]  ;;  %1905 = vrot.lane.b32.xlu1 %v2665_v23, %s2593_s5 }
 0x19b   :  { %v1195_v45 = vmul.f32 %v5114_v13, %v1186_v63  ;;  %v1157_v28 = vadd.f32 %v1155_v59, %v1151_v46  ;;  %v1053_v4 = vadd.f32 %v1051_v21, %v1013_v14  ;;  %v1054_v39 = vadd.f32 %v1052_v57, %v1014_v62  ;;  %v1306_v57 = vpop.permute.xlu1 %1305  ;;  %1903 = vrot.lane.b32.xlu0 %v2660_v22, %s2593_s5  ;;  %s4407_s5 = sld [smem:[#allocation5 + $0x25]] }
 0x19c   :  { %v5115_v50 = vstv %s3397_s11  ;;  %v5118_v58 = vrot.slane %v5117_v41, %v2896_v6  ;;  %v5119_v17 = vrot.slane %v5117_v41, %v2899_v7  ;;  %v1220_v32 = vsel %vm1219_vm12, %v1216_v1, %v1218_v37  ;;  %s4200_s11 = sld [smem:[#allocation5 + $0x1c]] }
 0x19d   :  { %v1190_v54 = vmul.f32 %v5115_v50, %v1181_v8  ;;  %v5116_v43 = vmov %v5115_v50  ;;  %v1221_v38 = vsel %vm1219_vm12, %v1218_v37, %v1216_v1  ;;  %v1093_v14 = vadd.f32 %v1091_v52, %v1053_v4  ;;  %v1297_v52 = vpop.permute.xlu0 %1296 }
 0x19e   :  { %v1191_v0 = vmul.f32 %v5116_v43, %v1180_v3  ;;  %v1131_v29 = vmul.f32 %v5118_v58, %v1116_v33  ;;  %v1132_v47 = vmul.f32 %v5119_v17, %v1117_v49  ;;  %v1094_v62 = vadd.f32 %v1092_v16, %v1054_v39  ;;  %1938 = vrot.lane.b32.xlu1 %v2673_v25, %s2594_s23 }
 0x19f   :  { %v1196_v56 = vadd.f32 %v1194_v53, %v1190_v54  ;;  %v5121_v27 = vrot.slane %v5120_v31, %v2896_v6  ;;  %v5122_v42 = vrot.slane %v5120_v31, %v2899_v7  ;;  %v1226_v37 = vsel %vm1219_vm12, %v1223_v10, %v1225_v18  ;;  %v1339_v4 = vpop.permute.xlu1 %1338  ;;  %1936 = vrot.lane.b32.xlu0 %v2667_v24, %s2594_s23 }
 0x1a0   :  { %v1197_v2 = vadd.f32 %v1195_v45, %v1191_v0  ;;  %v1227_v44 = vsel %vm1219_vm12, %v1225_v18, %v1223_v10  ;;  %v5123_v26 = vstv %s3428_s13  ;;  %v5125_v55 = vstv %s3619_s20  ;;  %v5130_v45 = vld [vmem:[#allocation53_spill] sm:$0xff]  ;;  %s2596_s13 = smov 82   ;;  %s4279_s20 = sld [smem:[#allocation5 + $0x50]] }
 0x1a1   :  { %v1171_v40 = vmul.f32 %v5121_v27, %v1156_v35  ;;  %v1172_v34 = vmul.f32 %v5122_v42, %v1157_v28  ;;  %v1230_v9 = vmul.f32 %v5123_v26, %v1221_v38  ;;  %v5124_v59 = vmov %v5123_v26  ;;  %v1304_v41 = vpop.permute.xlu0 %1303  ;;  %v1360_v42 = vld [vmem:[#allocation9 + $0x32] ss:$8 sm:$0x3] }
 0x1a2   :  { %v1231_v63 = vmul.f32 %v5124_v59, %v1220_v32  ;;  %v1234_v36 = vmul.f32 %v5125_v55, %v1227_v44  ;;  %v5126_v21 = vmov %v5125_v55  ;;  %v1133_v33 = vadd.f32 %v1131_v29, %v1093_v14  ;;  %1945 = vrot.lane.b32.xlu1 %v2665_v23, %s2594_s23 }
 0x1a3   :  { %v1235_v19 = vmul.f32 %v5126_v21, %v1226_v37  ;;  %v1134_v49 = vadd.f32 %v1132_v47, %v1094_v62  ;;  %v1290_v61 = vrot.slane %v1282_v5, %v5087_v15  ;;  %v5128_v18 = vrot.slane %v5127_v20, %v2896_v6  ;;  %1943 = vrot.lane.b32.xlu0 %v2660_v22, %s2594_s23  ;;  %s4428_s23 = sld [smem:[#allocation5 + $0x57]] }
 0x1a4   :  { %v5129_v46 = vrot.slane %v5127_v20, %v2899_v7  ;;  %v1236_v8 = vadd.f32 %v1234_v36, %v1230_v9  ;;  %v1310_v16 = vstv %s4083_s28  ;;  %v1301_v15 = vsel %vm1300_vm13, %v1297_v52, %v1299_v60  ;;  %s4390_s28 = sld [smem:[#allocation5 + $0x24]] }
 0x1a5   :  { %v1211_v48 = vmul.f32 %v5128_v18, %v1196_v56  ;;  %v1237_v51 = vadd.f32 %v1235_v19, %v1231_v63  ;;  %v1302_v30 = vsel %vm1300_vm13, %v1299_v60, %v1297_v52  ;;  %v1173_v53 = vadd.f32 %v1171_v40, %v1133_v33  ;;  %v1346_v56 = vpop.permute.xlu1 %1345  ;;  %v1337_v31 = vpop.permute.xlu0 %1336 }
 0x1a6   :  { %v1212_v3 = vmul.f32 %v5129_v46, %v1197_v2  ;;  %v1174_v13 = vadd.f32 %v1172_v34, %v1134_v49  ;;  %v5131_v1 = vrot.slane %v5130_v45, %v2896_v6  ;;  %v5132_v28 = vrot.slane %v5130_v45, %v2899_v7  ;;  %1978 = vrot.lane.b32.xlu1 %v2673_v25, %s2595_s8 }
 0x1a7   :  { %v1314_v39 = vstv %s4105_s27  ;;  %v1325_v50 = vrot.slane %v1320_v12, %v2896_v6  ;;  %v1329_v54 = vrot.slane %v1320_v12, %v2899_v7  ;;  %v1213_v43 = vadd.f32 %v1211_v48, %v1173_v53  ;;  %1976 = vrot.lane.b32.xlu0 %v2667_v24, %s2595_s8  ;;  %s4394_s27 = sld [smem:[#allocation5 + $0x55]] }
 0x1a8   :  { %v1251_v35 = vmul.f32 %v5131_v1, %v1236_v8  ;;  %v1252_v5 = vmul.f32 %v5132_v28, %v1237_v51  ;;  %v1214_v0 = vadd.f32 %v1212_v3, %v1174_v13  ;;  %v1291_v60 = vcombine.high %v1290_v61, %v1290_v61 }
 0x1a9   :  { %vm1340_vm14 = vcmp.lt.s32.totalorder %v2919_v11, 126  ;;  %v1311_v58 = vmul.f32 %v1310_v16, %v1301_v15  ;;  %v1312_v29 = vmul.f32 %v1310_v16, %v1302_v30  ;;  %v1307_v17 = vsel %vm1300_vm13, %v1304_v41, %v1306_v57  ;;  %v1379_v9 = vpop.permute.xlu1 %1378  ;;  %v1344_v19 = vpop.permute.xlu0 %1343  ;;  %v1400_v16 = vld [vmem:[#allocation9 + $0x33] ss:$8 sm:$0x3] }
 0x1aa   :  { %v1308_v47 = vsel %vm1300_vm13, %v1306_v57, %v1304_v41  ;;  %v1253_v32 = vadd.f32 %v1251_v35, %v1213_v43  ;;  %v1254_v38 = vadd.f32 %v1252_v5, %v1214_v0  ;;  %v1315_v14 = vmul.f32 %v1314_v39, %v1307_v17  ;;  %1985 = vrot.lane.b32.xlu1 %v2665_v23, %s2595_s8 }
 0x1ab   :  { %v1316_v62 = vmul.f32 %v1314_v39, %v1308_v47  ;;  %v1341_v27 = vsel %vm1340_vm14, %v1337_v31, %v1339_v4  ;;  %v1342_v40 = vsel %vm1340_vm14, %v1339_v4, %v1337_v31  ;;  %v1350_v59 = vstv %s4151_s6  ;;  %1983 = vrot.lane.b32.xlu0 %v2660_v22, %s2595_s8  ;;  %s4411_s6 = sld [smem:[#allocation5 + $0x56]] }
 0x1ac   :  { %v1317_v2 = vadd.f32 %v1315_v14, %v1311_v58  ;;  %v1294_v34 = vadd.f32 %v1290_v61, %v1253_v32  ;;  %v1295_v37 = vadd.f32 %v1291_v60, %v1254_v38  ;;  %v1354_v63 = vstv %s4156_s2  ;;  %v1440_v38 = vld [vmem:[#allocation9 + $0x34] ss:$8 sm:$0x3]  ;;  %s4424_s2 = sld [smem:[#allocation5 + $0x26]] }
 0x1ad   :  { %v1318_v10 = vadd.f32 %v1316_v62, %v1312_v29  ;;  %v1365_v21 = vrot.slane %v1360_v42, %v2896_v6  ;;  %v1369_v57 = vrot.slane %v1360_v42, %v2899_v7  ;;  %v1347_v33 = vsel %vm1340_vm14, %v1344_v19, %v1346_v56  ;;  %v1386_v46 = vpop.permute.xlu1 %1385  ;;  %v1377_v51 = vpop.permute.xlu0 %1376  ;;  %s4479_s8 = sld [smem:[#allocation5 + $0x28]] }
 0x1ae   :  { %v1332_v44 = vmul.f32 %v1325_v50, %v1317_v2  ;;  %v1348_v49 = vsel %vm1340_vm14, %v1346_v56, %v1344_v19  ;;  %vm1380_vm15 = vcmp.lt.s32.totalorder %v2919_v11, 125  ;;  %v1351_v61 = vmul.f32 %v1350_v59, %v1341_v27  ;;  %2018 = vrot.lane.b32.xlu1 %v2673_v25, %s2596_s13 }
 0x1af   :  { %v1333_v26 = vmul.f32 %v1329_v54, %v1318_v10  ;;  %v1352_v20 = vmul.f32 %v1350_v59, %v1342_v40  ;;  %v1355_v18 = vmul.f32 %v1354_v63, %v1347_v33  ;;  %v1356_v48 = vmul.f32 %v1354_v63, %v1348_v49  ;;  %2016 = vrot.lane.b32.xlu0 %v2667_v24, %s2596_s13  ;;  %v1480_v49 = vld [vmem:[#allocation9 + $0x35] ss:$8 sm:$0x3] }
 0x1b0   :  { %v1334_v55 = vadd.f32 %v1332_v44, %v1294_v34  ;;  %v1381_v52 = vsel %vm1380_vm15, %v1377_v51, %v1379_v9  ;;  %v1382_v12 = vsel %vm1380_vm15, %v1379_v9, %v1377_v51  ;;  %v1390_v13 = vstv %s4175_s7  ;;  %s4473_s7 = sld [smem:[#allocation5 + $0x27]] }
 0x1b1   :  { %v1335_v36 = vadd.f32 %v1333_v26, %v1295_v37  ;;  %v1357_v3 = vadd.f32 %v1355_v18, %v1351_v61  ;;  %v1358_v8 = vadd.f32 %v1356_v48, %v1352_v20  ;;  %v1419_v53 = vpop.permute.xlu1 %1418  ;;  %v1394_v45 = vstv %s4179_s3  ;;  %v1384_v5 = vpop.permute.xlu0 %1383  ;;  %s4477_s3 = sld [smem:[#allocation5 + $0x58]] }
 0x1b2   :  { %v1405_v28 = vrot.slane %v1400_v16, %v2896_v6  ;;  %v1409_v4 = vrot.slane %v1400_v16, %v2899_v7  ;;  %v1387_v39 = vsel %vm1380_vm15, %v1384_v5, %v1386_v46  ;;  %v1388_v50 = vsel %vm1380_vm15, %v1386_v46, %v1384_v5  ;;  %2025 = vrot.lane.b32.xlu1 %v2665_v23, %s2596_s13 }
 0x1b3   :  { %v1372_v15 = vmul.f32 %v1365_v21, %v1357_v3  ;;  %v1373_v30 = vmul.f32 %v1369_v57, %v1358_v8  ;;  %vm1420_vm0 = vcmp.lt.s32.totalorder %v2919_v11, 115  ;;  %v1391_v54 = vmul.f32 %v1390_v13, %v1381_v52  ;;  %2023 = vrot.lane.b32.xlu0 %v2660_v22, %s2596_s13  ;;  %s4489_s13 = sld [smem:[#allocation5 + $0x5a]] }
 0x1b4   :  { %v1392_v43 = vmul.f32 %v1390_v13, %v1382_v12  ;;  %v1395_v0 = vmul.f32 %v1394_v45, %v1387_v39  ;;  %v1396_v60 = vmul.f32 %v1394_v45, %v1388_v50  ;;  %v1430_v2 = vstv %s4200_s11  ;;  %v1520_v50 = vld [vmem:[#allocation9 + $0x36] ss:$8 sm:$0x3]  ;;  %s4483_s11 = sld [smem:[#allocation5 + $0x59]] }
 0x1b5   :  { %v1374_v1 = vadd.f32 %v1372_v15, %v1334_v55  ;;  %v1375_v35 = vadd.f32 %v1373_v30, %v1335_v36  ;;  %v1426_v41 = vpop.permute.xlu1 %1425  ;;  %v1417_v17 = vpop.permute.xlu0 %1416  ;;  %v1434_v10 = vstv %s4204_s9  ;;  %v1445_v40 = vrot.slane %v1440_v38, %v2896_v6  ;;  %s4485_s9 = sld [smem:[#allocation5 + $0x29]] }
 0x1b6   :  { %v1397_v58 = vadd.f32 %v1395_v0, %v1391_v54  ;;  %v1398_v29 = vadd.f32 %v1396_v60, %v1392_v43  ;;  %v1421_v47 = vsel %vm1420_vm0, %v1417_v17, %v1419_v53  ;;  %v1422_v32 = vsel %vm1420_vm0, %v1419_v53, %v1417_v17  ;;  %2058 = vrot.lane.b32.xlu1 %v2673_v25, %s2597_s30 }
 0x1b7   :  { %v1449_v34 = vrot.slane %v1440_v38, %v2899_v7  ;;  %vm1460_vm1 = vcmp.lt.s32.totalorder %v2919_v11, 114  ;;  %v1431_v26 = vmul.f32 %v1430_v2, %v1421_v47  ;;  %v1432_v9 = vmul.f32 %v1430_v2, %v1422_v32  ;;  %2056 = vrot.lane.b32.xlu0 %v2667_v24, %s2597_s30 }
 0x1b8   :  { %v1412_v14 = vmul.f32 %v1405_v28, %v1397_v58  ;;  %v1413_v62 = vmul.f32 %v1409_v4, %v1398_v29  ;;  %v1470_v48 = vstv %s4225_s12  ;;  %v1474_v46 = vstv %s4229_s24  ;;  %s4491_s12 = sld [smem:[#allocation5 + $0x2a]] }
 0x1b9   :  { %v1459_v56 = vpop.permute.xlu1 %1458  ;;  %v1424_v42 = vpop.permute.xlu0 %1423  ;;  %v1485_v51 = vrot.slane %v1480_v49, %v2896_v6  ;;  %v1489_v12 = vrot.slane %v1480_v49, %v2899_v7  ;;  %vm1500_vm2 = vcmp.lt.s32.totalorder %v2919_v11, 113  ;;  %v1510_v60 = vstv %s4250_s15  ;;  %s4497_s24 = sld [smem:[#allocation5 + $0x5b]] }
 0x1ba   :  { %v1414_v31 = vadd.f32 %v1412_v14, %v1374_v1  ;;  %v1415_v27 = vadd.f32 %v1413_v62, %v1375_v35  ;;  %v1427_v37 = vsel %vm1420_vm0, %v1424_v42, %v1426_v41  ;;  %v1428_v44 = vsel %vm1420_vm0, %v1426_v41, %v1424_v42  ;;  %2065 = vrot.lane.b32.xlu1 %v2665_v23, %s2597_s30  ;;  %s4514_s15 = sld [smem:[#allocation5 + $0x5c]] }
 0x1bb   :  { %v1435_v59 = vmul.f32 %v1434_v10, %v1427_v37  ;;  %v1436_v63 = vmul.f32 %v1434_v10, %v1428_v44  ;;  %2063 = vrot.lane.b32.xlu0 %v2660_v22, %s2597_s30  ;;  %v1514_v41 = vstv %s4254_s17  ;;  %v1525_v17 = vrot.slane %v1520_v50, %v2896_v6  ;;  %v1560_v44 = vld [vmem:[#allocation9 + $0x37] ss:$8 sm:$0x3]  ;;  %s4501_s30 = sld [smem:[#allocation5 + $0x2b]] }
 0x1bc   :  { %v1529_v32 = vrot.slane %v1520_v50, %v2899_v7  ;;  %vm1540_vm3 = vcmp.lt.s32.totalorder %v2919_v11, 112  ;;  %vm1580_vm4 = vcmp.lt.s32.totalorder %v2919_v11, 111  ;;  %vm1620_vm5 = vcmp.lt.s32.totalorder %v2919_v11, 110  ;;  %s4526_s17 = sld [smem:[#allocation5 + $0x2c]] }
 0x1bd   :  { %v1466_v55 = vpop.permute.xlu1 %1465  ;;  %v1437_v36 = vadd.f32 %v1435_v59, %v1431_v26  ;;  %v1438_v21 = vadd.f32 %v1436_v63, %v1432_v9  ;;  %v1457_v19 = vpop.permute.xlu0 %1456  ;;  %v1550_v63 = vstv %s4275_s18  ;;  %vm1660_vm6 = vcmp.lt.s32.totalorder %v2919_v11, 109  ;;  %s4546_s18 = sld [smem:[#allocation5 + $0x2d]] }
 0x1be   :  { %v1461_v57 = vsel %vm1460_vm1, %v1457_v19, %v1459_v56  ;;  %v1462_v33 = vsel %vm1460_vm1, %v1459_v56, %v1457_v19  ;;  %2098 = vrot.lane.b32.xlu1 %v2673_v25, %s2598_s16  ;;  %v1565_v19 = vrot.slane %v1560_v44, %v2896_v6  ;;  %vm1700_vm7 = vcmp.lt.s32.totalorder %v2919_v11, 99 }
 0x1bf   :  { %v1452_v61 = vmul.f32 %v1445_v40, %v1437_v36  ;;  %v1453_v20 = vmul.f32 %v1449_v34, %v1438_v21  ;;  %v1471_v30 = vmul.f32 %v1470_v48, %v1461_v57  ;;  %v1472_v53 = vmul.f32 %v1470_v48, %v1462_v33  ;;  %2096 = vrot.lane.b32.xlu0 %v2667_v24, %s2598_s16 }
 0x1c0   :  { %v1569_v33 = vrot.slane %v1560_v44, %v2899_v7  ;;  %vm1740_vm8 = vcmp.lt.s32.totalorder %v2919_v11, 98  ;;  %vm1780_vm9 = vcmp.lt.s32.totalorder %v2919_v11, 97  ;;  %vm1820_vm10 = vcmp.lt.s32.totalorder %v2919_v11, 96 }
 0x1c1   :  { %v1499_v18 = vpop.permute.xlu1 %1498  ;;  %v1454_v3 = vadd.f32 %v1452_v61, %v1414_v31  ;;  %v1455_v8 = vadd.f32 %v1453_v20, %v1415_v27  ;;  %v1464_v52 = vpop.permute.xlu0 %1463  ;;  %vm1860_vm11 = vcmp.lt.s32.totalorder %v2919_v11, 95  ;;  %vm1900_vm12 = vcmp.lt.s32.totalorder %v2919_v11, 94 }
 0x1c2   :  { %v1467_v16 = vsel %vm1460_vm1, %v1464_v52, %v1466_v55  ;;  %v1468_v15 = vsel %vm1460_vm1, %v1466_v55, %v1464_v52  ;;  %2105 = vrot.lane.b32.xlu1 %v2665_v23, %s2598_s16  ;;  %v1554_v55 = vstv %s4279_s20  ;;  %vm1940_vm13 = vcmp.lt.s32.totalorder %v2919_v11, 93  ;;  %s4574_s20 = sld [smem:[#allocation5 + $0x5e]] }
 0x1c3   :  { %v1475_v13 = vmul.f32 %v1474_v46, %v1467_v16  ;;  %v1476_v45 = vmul.f32 %v1474_v46, %v1468_v15  ;;  %2103 = vrot.lane.b32.xlu0 %v2660_v22, %s2598_s16  ;;  %v1600_v15 = vld [vmem:[#allocation9 + $0x40] ss:$8 sm:$0x3]  ;;  %s4536_s16 = sld [smem:[#allocation5 + $0x5d]]  ;;  %vm1980_vm14 = vcmp.lt.s32.totalorder %v2919_v11, 83  ;;  %vm2020_vm15 = vcmp.lt.s32.totalorder %v2919_v11, 82 }
 0x1c4   :  { %vm2060_vm0 = vcmp.lt.s32.totalorder %v2919_v11, 81  ;;  %vm2100_vm1 = vcmp.lt.s32.totalorder %v2919_v11, 80 }
 0x1c5   :  { %v1506_v1 = vpop.permute.xlu1 %1505  ;;  %v1477_v35 = vadd.f32 %v1475_v13, %v1471_v30  ;;  %v1478_v28 = vadd.f32 %v1476_v45, %v1472_v53  ;;  %v1497_v5 = vpop.permute.xlu0 %1496  ;;  %v1590_v45 = vstv %s4300_s22  ;;  %s4613_s22 = sld [smem:[#allocation5 + $0x5f]] }
 0x1c6   :  { %v1501_v4 = vsel %vm1500_vm2, %v1497_v5, %v1499_v18  ;;  %v1502_v39 = vsel %vm1500_vm2, %v1499_v18, %v1497_v5  ;;  %2138 = vrot.lane.b32.xlu1 %v2673_v25, %s2599_s1  ;;  %v1605_v5 = vrot.slane %v1600_v15, %v2896_v6 }
 0x1c7   :  { %v1492_v54 = vmul.f32 %v1485_v51, %v1477_v35  ;;  %v1493_v43 = vmul.f32 %v1489_v12, %v1478_v28  ;;  %v1511_v62 = vmul.f32 %v1510_v60, %v1501_v4  ;;  %v1512_v56 = vmul.f32 %v1510_v60, %v1502_v39  ;;  %2136 = vrot.lane.b32.xlu0 %v2667_v24, %s2599_s1 }
 0x1c8   :  { %v1609_v39 = vrot.slane %v1600_v15, %v2899_v7 }
 0x1c9   :  { %v1539_v0 = vpop.permute.xlu1 %1538  ;;  %v1494_v58 = vadd.f32 %v1492_v54, %v1454_v3  ;;  %v1495_v29 = vadd.f32 %v1493_v43, %v1455_v8  ;;  %v1504_v47 = vpop.permute.xlu0 %1503 }
 0x1ca   :  { %v1507_v38 = vsel %vm1500_vm2, %v1504_v47, %v1506_v1  ;;  %v1508_v14 = vsel %vm1500_vm2, %v1506_v1, %v1504_v47  ;;  %2145 = vrot.lane.b32.xlu1 %v2665_v23, %s2599_s1  ;;  %v1594_v1 = vstv %s4304_s21  ;;  %s4681_s21 = sld [smem:[#allocation5 + $0x2f]]  ;;  %vm2140_vm2 = vcmp.lt.s32.totalorder %v2919_v11, 79 }
 0x1cb   :  { %v1515_v2 = vmul.f32 %v1514_v41, %v1507_v38  ;;  %v1516_v10 = vmul.f32 %v1514_v41, %v1508_v14  ;;  %2143 = vrot.lane.b32.xlu0 %v2660_v22, %s2599_s1  ;;  %v1640_v14 = vld [vmem:[#allocation9 + $0x41] ss:$8 sm:$0x3]  ;;  %s4591_s1 = sld [smem:[#allocation5 + $0x2e]] }
 0x1cd   :  { %v1546_v31 = vpop.permute.xlu1 %1545  ;;  %v1517_v27 = vadd.f32 %v1515_v2, %v1511_v62  ;;  %v1518_v40 = vadd.f32 %v1516_v10, %v1512_v56  ;;  %v1537_v42 = vpop.permute.xlu0 %1536  ;;  %v1630_v10 = vstv %s4325_s14  ;;  %s4779_s14 = sld [smem:[#allocation5 + $0x30]] }
 0x1ce   :  { %v1541_v34 = vsel %vm1540_vm3, %v1537_v42, %v1539_v0  ;;  %v1542_v37 = vsel %vm1540_vm3, %v1539_v0, %v1537_v42  ;;  %2178 = vrot.lane.b32.xlu1 %v2673_v25, %s2600_s10 }
 0x1cf   :  { %v1532_v26 = vmul.f32 %v1525_v17, %v1517_v27  ;;  %v1533_v9 = vmul.f32 %v1529_v32, %v1518_v40  ;;  %v1551_v20 = vmul.f32 %v1550_v63, %v1541_v34  ;;  %v1552_v18 = vmul.f32 %v1550_v63, %v1542_v37  ;;  %2176 = vrot.lane.b32.xlu0 %v2667_v24, %s2600_s10 }
 0x1d0   :  { %v1645_v40 = vrot.slane %v1640_v14, %v2896_v6  ;;  %v1649_v34 = vrot.slane %v1640_v14, %v2899_v7 }
 0x1d1   :  { %v1579_v59 = vpop.permute.xlu1 %1578  ;;  %v1534_v36 = vadd.f32 %v1532_v26, %v1494_v58  ;;  %v1535_v21 = vadd.f32 %v1533_v9, %v1495_v29  ;;  %v1544_v57 = vpop.permute.xlu0 %1543 }
 0x1d2   :  { %v1547_v49 = vsel %vm1540_vm3, %v1544_v57, %v1546_v31  ;;  %v1548_v61 = vsel %vm1540_vm3, %v1546_v31, %v1544_v57  ;;  %2185 = vrot.lane.b32.xlu1 %v2665_v23, %s2600_s10  ;;  %v1634_v31 = vstv %s4329_s4  ;;  %vm2180_vm3 = vcmp.lt.s32.totalorder %v2919_v11, 78  ;;  %s4787_s4 = sld [smem:[#allocation5 + $0x61]] }
 0x1d3   :  { %v1555_v48 = vmul.f32 %v1554_v55, %v1547_v49  ;;  %v1556_v46 = vmul.f32 %v1554_v55, %v1548_v61  ;;  %2183 = vrot.lane.b32.xlu0 %v2660_v22, %s2600_s10  ;;  %s4688_s10 = sld [smem:[#allocation5 + $0x60]] }
 0x1d5   :  { %v1586_v3 = vpop.permute.xlu1 %1585  ;;  %v1557_v8 = vadd.f32 %v1555_v48, %v1551_v20  ;;  %v1558_v51 = vadd.f32 %v1556_v46, %v1552_v18  ;;  %v1577_v52 = vpop.permute.xlu0 %1576  ;;  %v1674_v18 = vstv %s4354_s29 }
 0x1d6   :  { %v1581_v12 = vsel %vm1580_vm4, %v1577_v52, %v1579_v59  ;;  %v1582_v16 = vsel %vm1580_vm4, %v1579_v59, %v1577_v52  ;;  %2218 = vrot.lane.b32.xlu1 %v2673_v25, %s2601_s19 }
 0x1d7   :  { %v1572_v30 = vmul.f32 %v1565_v19, %v1557_v8  ;;  %v1573_v53 = vmul.f32 %v1569_v33, %v1558_v51  ;;  %v1591_v43 = vmul.f32 %v1590_v45, %v1581_v12  ;;  %v1592_v0 = vmul.f32 %v1590_v45, %v1582_v16  ;;  %2216 = vrot.lane.b32.xlu0 %v2667_v24, %s2601_s19  ;;  %v1680_v33 = vld [vmem:[#allocation9 + $0x42] ss:$8 sm:$0x3] }
 0x1d8   :  { %v1670_v24 = vstv %s4350_s0  ;;  %v1689_v51 = vrot.slane %v1680_v33, %v2899_v7 }
 0x1d9   :  { %v1619_v13 = vpop.permute.xlu1 %1618  ;;  %v1574_v35 = vadd.f32 %v1572_v30, %v1534_v36  ;;  %v1575_v28 = vadd.f32 %v1573_v53, %v1535_v21  ;;  %v1584_v4 = vpop.permute.xlu0 %1583 }
 0x1da   :  { %v1587_v50 = vsel %vm1580_vm4, %v1584_v4, %v1586_v3  ;;  %v1588_v54 = vsel %vm1580_vm4, %v1586_v3, %v1584_v4  ;;  %2225 = vrot.lane.b32.xlu1 %v2665_v23, %s2601_s19  ;;  %v1685_v3 = vrot.slane %v1680_v33, %v2896_v6  ;;  %vm2220_vm4 = vcmp.lt.s32.totalorder %v2919_v11, 77 }
 0x1db   :  { %v1595_v60 = vmul.f32 %v1594_v1, %v1587_v50  ;;  %v1596_v41 = vmul.f32 %v1594_v1, %v1588_v54  ;;  %2223 = vrot.lane.b32.xlu0 %v2660_v22, %s2601_s19  ;;  %v1710_v54 = vstv %s4373_s25  ;;  %s2602_s19 = smov [#allocation12]  }
 0x1dc   :  { %s2286_s0 = sshll.u32 %s2602_s19, 4  ;;  %s2287_s0 = int_to_ptr.vmem [resolvable:$true] %s2286_s0 }
 0x1dd   :  { %v1626_v58 = vpop.permute.xlu1 %1625  ;;  %v1597_v29 = vadd.f32 %v1595_v60, %v1591_v43  ;;  %v1598_v17 = vadd.f32 %v1596_v41, %v1592_v0  ;;  %v1617_v47 = vpop.permute.xlu0 %1616  ;;  %v1714_v43 = vstv %s4377_s26  ;;  %s2519_s29 = scalar_lea.vmem %s2287_s0, 64  ;;  %p2524_p2 = scmp.lt.s32.totalorder %s2287_s0, %s2287_s0 }
 0x1de   :  { %v1621_v32 = vsel %vm1620_vm5, %v1617_v47, %v1619_v13  ;;  %v1622_v38 = vsel %vm1620_vm5, %v1619_v13, %v1617_v47  ;;  %p2520_p1 = scmp.ne.s32.totalorder %s2287_s0, %s2519_s29  ;;  %p2525_p3 = scmp.lt.s32.totalorder %s2519_s29, %s2519_s29 }
 0x1df   :  { %v1612_v62 = vmul.f32 %v1605_v5, %v1597_v29  ;;  %v1613_v56 = vmul.f32 %v1609_v39, %v1598_v17  ;;  %v1631_v26 = vmul.f32 %v1630_v10, %v1621_v32  ;;  %v1632_v9 = vmul.f32 %v1630_v10, %v1622_v38  ;;  %v1720_v5 = vld [vmem:[#allocation9 + $0x43] ss:$8 sm:$0x3] }
 0x1e0   :  { %v1725_v41 = vrot.slane %v1720_v5, %v2896_v6  ;;  %v1729_v29 = vrot.slane %v1720_v5, %v2899_v7  ;;  %p2526_p4 = por %p2525_p3, %p2524_p2 }
 0x1e1   :  { %v1659_v2 = vpop.permute.xlu1 %1658  ;;  %v1614_v25 = vadd.f32 %v1612_v62, %v1574_v35  ;;  %v1615_v27 = vadd.f32 %v1613_v56, %v1575_v28  ;;  %v1624_v42 = vpop.permute.xlu0 %1623 }
 0x1e2   :  { %v1627_v37 = vsel %vm1620_vm5, %v1624_v42, %v1626_v58  ;;  %v1628_v44 = vsel %vm1620_vm5, %v1626_v58, %v1624_v42  ;;  %p2527_p5 = pnand %p2526_p4, %p2520_p1 }
 0x1e3   :  { %v1635_v59 = vmul.f32 %v1634_v31, %v1627_v37  ;;  %v1636_v63 = vmul.f32 %v1634_v31, %v1628_v44  ;;  %v1750_v44 = vstv %s4390_s28 }
 0x1e5   :  { %v1666_v23 = vpop.permute.xlu1 %1665  ;;  %v1637_v55 = vadd.f32 %v1635_v59, %v1631_v26  ;;  %v1638_v36 = vadd.f32 %v1636_v63, %v1632_v9  ;;  %v1657_v21 = vpop.permute.xlu0 %1656  ;;  %v1754_v26 = vstv %s4394_s27 }
 0x1e6   :  { %v1661_v19 = vsel %vm1660_vm6, %v1657_v21, %v1659_v2  ;;  %v1662_v57 = vsel %vm1660_vm6, %v1659_v2, %v1657_v21 }
 0x1e7   :  { %v1652_v49 = vmul.f32 %v1645_v40, %v1637_v55  ;;  %v1653_v61 = vmul.f32 %v1649_v34, %v1638_v36  ;;  %v1671_v12 = vmul.f32 %v1670_v24, %v1661_v19  ;;  %v1672_v16 = vmul.f32 %v1670_v24, %v1662_v57  ;;  %v1760_v40 = vld [vmem:[#allocation9 + $0x44] ss:$8 sm:$0x3] }
 0x1e8   :  { %v1765_v63 = vrot.slane %v1760_v40, %v2896_v6  ;;  %v1769_v55 = vrot.slane %v1760_v40, %v2899_v7 }
 0x1e9   :  { %v1699_v20 = vpop.permute.xlu1 %1698  ;;  %v1654_v48 = vadd.f32 %v1652_v49, %v1614_v25  ;;  %v1655_v46 = vadd.f32 %v1653_v61, %v1615_v27  ;;  %v1664_v8 = vpop.permute.xlu0 %1663 }
 0x1ea   :  { %v1667_v52 = vsel %vm1660_vm6, %v1664_v8, %v1666_v23  ;;  %v1668_v22 = vsel %vm1660_vm6, %v1666_v23, %v1664_v8 }
 0x1eb   :  { %v1675_v15 = vmul.f32 %v1674_v18, %v1667_v52  ;;  %v1676_v30 = vmul.f32 %v1674_v18, %v1668_v22  ;;  %v1790_v22 = vstv %s4407_s5 }
 0x1ed   :  { %v1706_v53 = vpop.permute.xlu1 %1705  ;;  %v1677_v13 = vadd.f32 %v1675_v15, %v1671_v12  ;;  %v1678_v45 = vadd.f32 %v1676_v30, %v1672_v16  ;;  %v1697_v1 = vpop.permute.xlu0 %1696  ;;  %v1794_v12 = vstv %s4411_s6 }
 0x1ee   :  { %v1701_v35 = vsel %vm1700_vm7, %v1697_v1, %v1699_v20  ;;  %v1702_v28 = vsel %vm1700_vm7, %v1699_v20, %v1697_v1 }
 0x1ef   :  { %v1692_v4 = vmul.f32 %v1685_v3, %v1677_v13  ;;  %v1693_v39 = vmul.f32 %v1689_v51, %v1678_v45  ;;  %v1711_v32 = vmul.f32 %v1710_v54, %v1701_v35  ;;  %v1712_v38 = vmul.f32 %v1710_v54, %v1702_v28  ;;  %v1800_v3 = vld [vmem:[#allocation9 + $0x45] ss:$8 sm:$0x3] }
 0x1f0   :  { %v1805_v30 = vrot.slane %v1800_v3, %v2896_v6  ;;  %v1809_v13 = vrot.slane %v1800_v3, %v2899_v7 }
 0x1f1   :  { %v1739_v50 = vpop.permute.xlu1 %1738  ;;  %v1694_v0 = vadd.f32 %v1692_v4, %v1654_v48  ;;  %v1695_v60 = vadd.f32 %v1693_v39, %v1655_v46  ;;  %v1704_v58 = vpop.permute.xlu0 %1703 }
 0x1f2   :  { %v1707_v17 = vsel %vm1700_vm7, %v1704_v58, %v1706_v53  ;;  %v1708_v47 = vsel %vm1700_vm7, %v1706_v53, %v1704_v58 }
 0x1f3   :  { %v1715_v14 = vmul.f32 %v1714_v43, %v1707_v17  ;;  %v1716_v62 = vmul.f32 %v1714_v43, %v1708_v47  ;;  %v1830_v47 = vstv %s4424_s2 }
 0x1f5   :  { %v1746_v56 = vpop.permute.xlu1 %1745  ;;  %v1717_v2 = vadd.f32 %v1715_v14, %v1711_v32  ;;  %v1718_v10 = vadd.f32 %v1716_v62, %v1712_v38  ;;  %v1737_v31 = vpop.permute.xlu0 %1736  ;;  %v1834_v32 = vstv %s4428_s23 }
 0x1f6   :  { %v1741_v25 = vsel %vm1740_vm8, %v1737_v31, %v1739_v50  ;;  %v1742_v27 = vsel %vm1740_vm8, %v1739_v50, %v1737_v31 }
 0x1f7   :  { %v1732_v42 = vmul.f32 %v1725_v41, %v1717_v2  ;;  %v1733_v34 = vmul.f32 %v1729_v29, %v1718_v10  ;;  %v1751_v19 = vmul.f32 %v1750_v44, %v1741_v25  ;;  %v1752_v57 = vmul.f32 %v1750_v44, %v1742_v27  ;;  %v1840_v29 = vld [vmem:[#allocation9 + $0x46] ss:$8 sm:$0x3] }
 0x1f8   :  { %v1849_v2 = vrot.slane %v1840_v29, %v2899_v7 }
 0x1f9   :  { %v1779_v37 = vpop.permute.xlu1 %1778  ;;  %v1734_v9 = vadd.f32 %v1732_v42, %v1694_v0  ;;  %v1735_v59 = vadd.f32 %v1733_v34, %v1695_v60  ;;  %v1744_v23 = vpop.permute.xlu0 %1743 }
 0x1fa   :  { %v1747_v36 = vsel %vm1740_vm8, %v1744_v23, %v1746_v56  ;;  %v1748_v21 = vsel %vm1740_vm8, %v1746_v56, %v1744_v23  ;;  %v1845_v56 = vrot.slane %v1840_v29, %v2896_v6 }
 0x1fb   :  { %v1755_v33 = vmul.f32 %v1754_v26, %v1747_v36  ;;  %v1756_v49 = vmul.f32 %v1754_v26, %v1748_v21 }
 0x1fd   :  { %v1786_v61 = vpop.permute.xlu1 %1785  ;;  %v1757_v20 = vadd.f32 %v1755_v33, %v1751_v19  ;;  %v1758_v24 = vadd.f32 %v1756_v49, %v1752_v57  ;;  %v1777_v18 = vpop.permute.xlu0 %1776 }
 0x1fe   :  { %v1781_v48 = vsel %vm1780_vm9, %v1777_v18, %v1779_v37  ;;  %v1782_v46 = vsel %vm1780_vm9, %v1779_v37, %v1777_v18 }
 0x1ff   :  { %v1772_v8 = vmul.f32 %v1765_v63, %v1757_v20  ;;  %v1773_v51 = vmul.f32 %v1769_v55, %v1758_v24  ;;  %v1791_v35 = vmul.f32 %v1790_v22, %v1781_v48  ;;  %v1792_v28 = vmul.f32 %v1790_v22, %v1782_v46  ;;  %v4499_v22 = vld [vmem:[#allocation9 + $0x50] ss:$8 sm:$0x3] }
 0x201   :  { %v1819_v52 = vpop.permute.xlu1 %1818  ;;  %v1774_v16 = vadd.f32 %v1772_v8, %v1734_v9  ;;  %v1775_v15 = vadd.f32 %v1773_v51, %v1735_v59  ;;  %v1784_v53 = vpop.permute.xlu0 %1783 }
 0x202   :  { %v1787_v45 = vsel %vm1780_vm9, %v1784_v53, %v1786_v61  ;;  %v1788_v1 = vsel %vm1780_vm9, %v1786_v61, %v1784_v53 }
 0x203   :  { %v1795_v5 = vmul.f32 %v1794_v12, %v1787_v45  ;;  %v1796_v4 = vmul.f32 %v1794_v12, %v1788_v1  ;;  %v1910_v1 = vstv %s4479_s8 }
 0x205   :  { %v1826_v39 = vpop.permute.xlu1 %1825  ;;  %v1797_v50 = vadd.f32 %v1795_v5, %v1791_v35  ;;  %v1798_v54 = vadd.f32 %v1796_v4, %v1792_v28  ;;  %v1817_v43 = vpop.permute.xlu0 %1816  ;;  %v1925_v35 = vrot.slane %v4499_v22, %v2896_v6  ;;  %v1929_v28 = vrot.slane %v4499_v22, %v2899_v7  ;;  %v4524_v5 = vld [vmem:[#allocation9 + $0x52] ss:$8 sm:$0x3] }
 0x206   :  { %v1821_v0 = vsel %vm1820_vm10, %v1817_v43, %v1819_v52  ;;  %v1822_v60 = vsel %vm1820_vm10, %v1819_v52, %v1817_v43  ;;  %v4495_v52 = vld [vmem:[#allocation9 + $0x47] ss:$8 sm:$0x3]  ;;  %v1950_v43 = vstv %s4485_s9 }
 0x207   :  { %v1812_v41 = vmul.f32 %v1805_v30, %v1797_v50  ;;  %v1813_v58 = vmul.f32 %v1809_v13, %v1798_v54  ;;  %v1831_v25 = vmul.f32 %v1830_v47, %v1821_v0  ;;  %v1832_v27 = vmul.f32 %v1830_v47, %v1822_v60  ;;  %v4512_v13 = vld [vmem:[#allocation9 + $0x51] ss:$8 sm:$0x3] }
 0x208   :  { %v1885_v30 = vrot.slane %v4495_v52, %v2896_v6  ;;  %v1889_v53 = vrot.slane %v4495_v52, %v2899_v7  ;;  %v1914_v50 = vstv %s4483_s11  ;;  %v1954_v0 = vstv %s4489_s13 }
 0x209   :  { %v4441_v17 = vpop.permute.xlu1 %1858  ;;  %v1814_v38 = vadd.f32 %v1812_v41, %v1774_v16  ;;  %v1815_v14 = vadd.f32 %v1813_v58, %v1775_v15  ;;  %v1824_v62 = vpop.permute.xlu0 %1823  ;;  %v1870_v16 = vstv %s4473_s7  ;;  %v1874_v15 = vstv %s4477_s3  ;;  %v4544_v58 = vld [vmem:[#allocation9 + $0x53] ss:$8 sm:$0x3] }
 0x20a   :  { %v1827_v10 = vsel %vm1820_vm10, %v1824_v62, %v1826_v39  ;;  %v1828_v31 = vsel %vm1820_vm10, %v1826_v39, %v1824_v62  ;;  %v1965_v60 = vrot.slane %v4512_v13, %v2896_v6  ;;  %v1969_v41 = vrot.slane %v4512_v13, %v2899_v7 }
 0x20b   :  { %v1835_v40 = vmul.f32 %v1834_v32, %v1827_v10  ;;  %v1836_v42 = vmul.f32 %v1834_v32, %v1828_v31  ;;  %v1990_v32 = vstv %s4491_s12  ;;  %v1994_v31 = vstv %s4497_s24 }
 0x20d   :  { %v1866_v34 = vpop.permute.xlu1 %1865  ;;  %v1837_v37 = vadd.f32 %v1835_v40, %v1831_v25  ;;  %v1838_v44 = vadd.f32 %v1836_v42, %v1832_v27  ;;  %v1857_v26 = vpop.permute.xlu0 %1856  ;;  %v2030_v25 = vstv %s4501_s30  ;;  %v2045_v27 = vrot.slane %v4544_v58, %v2896_v6  ;;  %v4570_v40 = vld [vmem:[#allocation9 + $0x54] ss:$8 sm:$0x3] }
 0x20e   :  { %v1861_v29 = vsel %vm1860_vm11, %v1857_v26, %v4441_v17  ;;  %v1862_v47 = vsel %vm1860_vm11, %v4441_v17, %v1857_v26  ;;  %v2009_v17 = vrot.slane %v4524_v5, %v2899_v7 }
 0x20f   :  { %v1852_v9 = vmul.f32 %v1845_v56, %v1837_v37  ;;  %v1853_v59 = vmul.f32 %v1849_v2, %v1838_v44  ;;  %v1872_v37 = vmul.f32 %v1870_v16, %v1862_v47 }
 0x211   :  { %v4451_v63 = vpop.permute.xlu1 %1898  ;;  %v4453_v23 = vadd.f32 %v1852_v9, %v1814_v38  ;;  %v4455_v55 = vadd.f32 %v1853_v59, %v1815_v14  ;;  %v1864_v36 = vpop.permute.xlu0 %1863  ;;  %v2005_v38 = vrot.slane %v4524_v5, %v2896_v6 }
 0x212   :  { %v1867_v4 = vsel %vm1860_vm11, %v1864_v36, %v1866_v34  ;;  %v1868_v39 = vsel %vm1860_vm11, %v1866_v34, %v1864_v36  ;;  %v1871_v34 = vmul.f32 %v1870_v16, %v1861_v29  ;;  %v2034_v36 = vstv %s4514_s15  ;;  %v4589_v16 = vld [vmem:[#allocation9 + $0x55] ss:$8 sm:$0x3] }
 0x213   :  { %v1875_v62 = vmul.f32 %v1874_v15, %v1867_v4  ;;  %v1876_v56 = vmul.f32 %v1874_v15, %v1868_v39  ;;  %v2070_v39 = vstv %s4526_s17 }
 0x215   :  { %v1906_v21 = vpop.permute.xlu1 %1905  ;;  %v4457_v19 = vpop.permute.xlu0 %1896  ;;  %v1877_v15 = vadd.f32 %v1875_v62, %v1871_v34  ;;  %v1878_v4 = vadd.f32 %v1876_v56, %v1872_v37  ;;  %v2074_v56 = vstv %s4536_s16 }
 0x216   :  { %v1901_v44 = vsel %vm1900_vm12, %v4457_v19, %v4451_v63  ;;  %v1902_v26 = vsel %vm1900_vm12, %v4451_v63, %v4457_v19  ;;  %v2085_v63 = vrot.slane %v4570_v40, %v2896_v6 }
 0x217   :  { %v1911_v19 = vmul.f32 %v1910_v1, %v1901_v44 }
 0x219   :  { %v4459_v57 = vpop.permute.xlu1 %1938  ;;  %v1904_v33 = vpop.permute.xlu0 %1903 }
 0x21a   :  { %v1907_v2 = vsel %vm1900_vm12, %v1904_v33, %v1906_v21  ;;  %v1908_v10 = vsel %vm1900_vm12, %v1906_v21, %v1904_v33  ;;  %v2049_v21 = vrot.slane %v4544_v58, %v2899_v7 }
 0x21b   :  { %v1915_v9 = vmul.f32 %v1914_v50, %v1907_v2  ;;  %v1916_v59 = vmul.f32 %v1914_v50, %v1908_v10  ;;  %v1912_v50 = vmul.f32 %v1910_v1, %v1902_v26  ;;  %v2089_v2 = vrot.slane %v4570_v40, %v2899_v7  ;;  %v2240_v40 = vld [vmem:[#allocation9 + $0x60] ss:$8 sm:$0x3] }
 0x21c   :  { %v2110_v10 = vstv %s4546_s18 }
 0x21d   :  { %v4461_v49 = vpop.permute.xlu1 %1945  ;;  %v4463_v61 = vpop.permute.xlu0 %1936  ;;  %v1917_v34 = vadd.f32 %v1915_v9, %v1911_v19  ;;  %v1918_v37 = vadd.f32 %v1916_v59, %v1912_v50  ;;  %v4634_v19 = vld [vmem:[#allocation9 + $0x56] ss:$8 sm:$0x3] }
 0x221   :  { %v4465_v20 = vpop.permute.xlu1 %1978  ;;  %v4467_v24 = vpop.permute.xlu0 %1943 }
 0x222   :  { %v1947_v29 = vsel %vm1940_vm13, %v4467_v24, %v4461_v49  ;;  %v1948_v47 = vsel %vm1940_vm13, %v4461_v49, %v4467_v24  ;;  %v1941_v49 = vsel %vm1940_vm13, %v4463_v61, %v4459_v57  ;;  %v1942_v24 = vsel %vm1940_vm13, %v4459_v57, %v4463_v61 }
 0x223   :  { %v1955_v26 = vmul.f32 %v1954_v0, %v1947_v29  ;;  %v1956_v1 = vmul.f32 %v1954_v0, %v1948_v47  ;;  %v1892_v57 = vmul.f32 %v1885_v30, %v1877_v15  ;;  %v1893_v61 = vmul.f32 %v1889_v53, %v1878_v4 }
 0x224   :  { %v2114_v0 = vstv %s4574_s20  ;;  %v2150_v47 = vstv %s4591_s1 }
 0x225   :  { %v4469_v18 = vpop.permute.xlu1 %1985  ;;  %v4471_v48 = vpop.permute.xlu0 %1976 }
 0x226   :  { %v1981_v30 = vsel %vm1980_vm14, %v4471_v48, %v4465_v20  ;;  %v1982_v52 = vsel %vm1980_vm14, %v4465_v20, %v4471_v48 }
 0x227   :  { %v1991_v48 = vmul.f32 %v1990_v32, %v1981_v30 }
 0x229   :  { %v4475_v46 = vpop.permute.xlu1 %2018  ;;  %v4481_v3 = vpop.permute.xlu0 %1983 }
 0x22a   :  { %v1987_v9 = vsel %vm1980_vm14, %v4481_v3, %v4469_v18  ;;  %v1988_v59 = vsel %vm1980_vm14, %v4469_v18, %v4481_v3  ;;  %v1951_v18 = vmul.f32 %v1950_v43, %v1941_v49  ;;  %v1952_v3 = vmul.f32 %v1950_v43, %v1942_v24 }
 0x22b   :  { %v1995_v53 = vmul.f32 %v1994_v31, %v1987_v9  ;;  %v1996_v15 = vmul.f32 %v1994_v31, %v1988_v59  ;;  %v2165_v43 = vrot.slane %v4634_v19, %v2896_v6  ;;  %v1932_v49 = vmul.f32 %v1925_v35, %v1917_v34 }
 0x22c   :  { %v1933_v24 = vmul.f32 %v1929_v28, %v1918_v37  ;;  %v1957_v50 = vadd.f32 %v1955_v26, %v1951_v18  ;;  %v1958_v20 = vadd.f32 %v1956_v1, %v1952_v3  ;;  %v1992_v31 = vmul.f32 %v1990_v32, %v1982_v52 }
 0x22d   :  { %v4487_v8 = vpop.permute.xlu1 %2025  ;;  %v4493_v51 = vpop.permute.xlu0 %2016  ;;  %v1894_v28 = vadd.f32 %v1892_v57, %v4453_v23  ;;  %v1895_v1 = vadd.f32 %v1893_v61, %v4455_v55  ;;  %v2154_v32 = vstv %s4613_s22  ;;  %v2169_v34 = vrot.slane %v4634_v19, %v2899_v7 }
 0x22e   :  { %v1997_v37 = vadd.f32 %v1995_v53, %v1991_v48  ;;  %v1998_v26 = vadd.f32 %v1996_v15, %v1992_v31  ;;  %v2022_v23 = vsel %vm2020_vm15, %v4475_v46, %v4493_v51  ;;  %v1972_v18 = vmul.f32 %v1965_v60, %v1957_v50 }
 0x22f   :  { %v2032_v52 = vmul.f32 %v2030_v25, %v2022_v23 }
 0x231   :  { %v4503_v12 = vpop.permute.xlu1 %2058  ;;  %v4516_v45 = vpop.permute.xlu0 %2023 }
 0x232   :  { %v2027_v9 = vsel %vm2020_vm15, %v4516_v45, %v4487_v8  ;;  %v2028_v35 = vsel %vm2020_vm15, %v4487_v8, %v4516_v45  ;;  %v2021_v8 = vsel %vm2020_vm15, %v4493_v51, %v4475_v46  ;;  %v1934_v46 = vadd.f32 %v1932_v49, %v1894_v28 }
 0x233   :  { %v2035_v45 = vmul.f32 %v2034_v36, %v2027_v9  ;;  %v2036_v59 = vmul.f32 %v2034_v36, %v2028_v35  ;;  %v1935_v51 = vadd.f32 %v1933_v24, %v1895_v1  ;;  %v1973_v36 = vmul.f32 %v1969_v41, %v1958_v20 }
 0x234   :  { %v2031_v30 = vmul.f32 %v2030_v25, %v2021_v8  ;;  %v2190_v24 = vstv %s4681_s21  ;;  %v2194_v20 = vstv %s4688_s10  ;;  %v1974_v48 = vadd.f32 %v1972_v18, %v1934_v46 }
 0x235   :  { %v4534_v54 = vpop.permute.xlu1 %2065  ;;  %v4558_v14 = vpop.permute.xlu0 %2056  ;;  %v1975_v31 = vadd.f32 %v1973_v36, %v1935_v51  ;;  %v2200_v36 = vld [vmem:[#allocation9 + $0x57] ss:$8 sm:$0x3] }
 0x236   :  { %v2062_v60 = vsel %vm2060_vm0, %v4503_v12, %v4558_v14  ;;  %v2037_v53 = vadd.f32 %v2035_v45, %v2031_v30 }
 0x237   :  { %v2072_v49 = vmul.f32 %v2070_v39, %v2062_v60 }
 0x239   :  { %v4572_v42 = vpop.permute.xlu1 %2098  ;;  %v4587_v33 = vpop.permute.xlu0 %2063 }
 0x23a   :  { %v2067_v57 = vsel %vm2060_vm0, %v4587_v33, %v4534_v54  ;;  %v2068_v61 = vsel %vm2060_vm0, %v4534_v54, %v4587_v33  ;;  %v2061_v54 = vsel %vm2060_vm0, %v4558_v14, %v4503_v12  ;;  %v2012_v12 = vmul.f32 %v2005_v38, %v1997_v37 }
 0x23b   :  { %v2075_v13 = vmul.f32 %v2074_v56, %v2067_v57  ;;  %v2076_v41 = vmul.f32 %v2074_v56, %v2068_v61  ;;  %v2013_v14 = vmul.f32 %v2009_v17, %v1998_v26  ;;  %v2038_v56 = vadd.f32 %v2036_v59, %v2032_v52 }
 0x23c   :  { %v2071_v15 = vmul.f32 %v2070_v39, %v2061_v54  ;;  %v2052_v26 = vmul.f32 %v2045_v27, %v2037_v53 }
 0x23d   :  { %v4605_v62 = vpop.permute.xlu1 %2105  ;;  %v4624_v44 = vpop.permute.xlu0 %2096  ;;  %v2078_v9 = vadd.f32 %v2076_v41, %v2072_v49  ;;  %v2015_v37 = vadd.f32 %v2013_v14, %v1975_v31  ;;  %v2053_v8 = vmul.f32 %v2049_v21, %v2038_v56  ;;  %v5134_v41 = vrot.slane %v4589_v16, %v2899_v7 }
 0x23e   :  { %v2102_v38 = vsel %vm2100_vm1, %v4572_v42, %v4624_v44  ;;  %v2077_v39 = vadd.f32 %v2075_v13, %v2071_v15  ;;  %v2209_v14 = vrot.slane %v2200_v36, %v2899_v7 }
 0x23f   :  { %v2112_v1 = vmul.f32 %v2110_v10, %v2102_v38 }
 0x240   :  { %v2092_v46 = vmul.f32 %v2085_v63, %v2077_v39  ;;  %v2055_v63 = vadd.f32 %v2053_v8, %v2015_v37 }
 0x241   :  { %v4645_v29 = vpop.permute.xlu1 %2138  ;;  %v2104_v4 = vpop.permute.xlu0 %2103 }
 0x242   :  { %v2107_v25 = vsel %vm2100_vm1, %v2104_v4, %v4605_v62  ;;  %v2108_v33 = vsel %vm2100_vm1, %v4605_v62, %v2104_v4  ;;  %v2101_v62 = vsel %vm2100_vm1, %v4624_v44, %v4572_v42 }
 0x243   :  { %v2115_v17 = vmul.f32 %v2114_v0, %v2107_v25  ;;  %v2116_v4 = vmul.f32 %v2114_v0, %v2108_v33  ;;  %v2111_v28 = vmul.f32 %v2110_v10, %v2101_v62  ;;  %v2014_v0 = vadd.f32 %v2012_v12, %v1974_v48 }
 0x244   :  { %v2205_v12 = vrot.slane %v2200_v36, %v2896_v6  ;;  %v2230_v62 = vstv %s4779_s14 }
 0x245   :  { %v2146_v22 = vpop.permute.xlu1 %2145  ;;  %v2137_v55 = vpop.permute.xlu0 %2136  ;;  %v2117_v10 = vadd.f32 %v2115_v17, %v2111_v28  ;;  %v2118_v23 = vadd.f32 %v2116_v4, %v2112_v1  ;;  %v2054_v52 = vadd.f32 %v2052_v26, %v2014_v0  ;;  %v2234_v4 = vstv %s4787_s4 }
 0x246   :  { %v2142_v45 = vsel %vm2140_vm2, %v4645_v29, %v2137_v55 }
 0x247   :  { %v2152_v18 = vmul.f32 %v2150_v47, %v2142_v45  ;;  %v2133_v25 = vmul.f32 %v5134_v41, %v2118_v23  ;;  %v2094_v15 = vadd.f32 %v2092_v46, %v2054_v52 }
 0x249   :  { %v2179_v3 = vpop.permute.xlu1 %2178  ;;  %v2144_v50 = vpop.permute.xlu0 %2143 }
 0x24a   :  { %v2147_v42 = vsel %vm2140_vm2, %v2144_v50, %v2146_v22  ;;  %v2148_v44 = vsel %vm2140_vm2, %v2146_v22, %v2144_v50  ;;  %v2141_v22 = vsel %vm2140_vm2, %v2137_v55, %v4645_v29  ;;  %v2093_v29 = vmul.f32 %v2089_v2, %v2078_v9 }
 0x24b   :  { %v2155_v27 = vmul.f32 %v2154_v32, %v2147_v42  ;;  %v2156_v59 = vmul.f32 %v2154_v32, %v2148_v44  ;;  %v2151_v51 = vmul.f32 %v2150_v47, %v2141_v22  ;;  %v5133_v2 = vrot.slane %v4589_v16, %v2896_v6 }
 0x24c   :  { %v2095_v49 = vadd.f32 %v2093_v29, %v2055_v63 }
 0x24d   :  { %v2186_v5 = vpop.permute.xlu1 %2185  ;;  %v2177_v35 = vpop.permute.xlu0 %2176  ;;  %v2132_v13 = vmul.f32 %v5133_v2, %v2117_v10  ;;  %v2157_v33 = vadd.f32 %v2155_v27, %v2151_v51  ;;  %v2158_v47 = vadd.f32 %v2156_v59, %v2152_v18 }
 0x24e   :  { %v2181_v58 = vsel %vm2180_vm3, %v2177_v35, %v2179_v3  ;;  %v2182_v21 = vsel %vm2180_vm3, %v2179_v3, %v2177_v35  ;;  %v2135_v48 = vadd.f32 %v2133_v25, %v2095_v49 }
 0x24f   :  { %v2191_v54 = vmul.f32 %v2190_v24, %v2181_v58  ;;  %v2192_v60 = vmul.f32 %v2190_v24, %v2182_v21  ;;  %v2249_v24 = vrot.slane %v2240_v40, %v2899_v7  ;;  %v2172_v31 = vmul.f32 %v2165_v43, %v2157_v33 }
 0x250   :  { %v2173_v39 = vmul.f32 %v2169_v34, %v2158_v47 }
 0x251   :  { %v2184_v57 = vpop.permute.xlu0 %2183  ;;  %v2219_v61 = vpop.permute.xlu1 %2218 }
 0x252   :  { %v2187_v55 = vsel %vm2180_vm3, %v2184_v57, %v2186_v5  ;;  %v2188_v32 = vsel %vm2180_vm3, %v2186_v5, %v2184_v57  ;;  %v2245_v5 = vrot.slane %v2240_v40, %v2896_v6  ;;  %v2175_v6 = vadd.f32 %v2173_v39, %v2135_v48 }
 0x253   :  { %v2195_v3 = vmul.f32 %v2194_v20, %v2187_v55  ;;  %v2196_v30 = vmul.f32 %v2194_v20, %v2188_v32  ;;  %v2134_v20 = vadd.f32 %v2132_v13, %v2094_v15 }
 0x255   :  { %v2217_v50 = vpop.permute.xlu0 %2216  ;;  %v2197_v53 = vadd.f32 %v2195_v3, %v2191_v54  ;;  %v2198_v56 = vadd.f32 %v2196_v30, %v2192_v60  ;;  %v2226_v38 = vpop.permute.xlu1 %2225  ;;  %v2174_v8 = vadd.f32 %v2172_v31, %v2134_v20 }
 0x256   :  { %v2221_v16 = vsel %vm2220_vm4, %v2217_v50, %v2219_v61  ;;  %v2222_v17 = vsel %vm2220_vm4, %v2219_v61, %v2217_v50 }
 0x257   :  { %v2212_v35 = vmul.f32 %v2205_v12, %v2197_v53  ;;  %v2213_v28 = vmul.f32 %v2209_v14, %v2198_v56  ;;  %v2231_v44 = vmul.f32 %v2230_v62, %v2221_v16  ;;  %v2232_v0 = vmul.f32 %v2230_v62, %v2222_v17 }
 0x259   :  { %v2224_v9 = vpop.permute.xlu0 %2223  ;;  %v2214_v23 = vadd.f32 %v2212_v35, %v2174_v8  ;;  %v2215_v7 = vadd.f32 %v2213_v28, %v2175_v6 }
 0x25a   :  { %v2227_v1 = vsel %vm2220_vm4, %v2224_v9, %v2226_v38  ;;  %v2228_v42 = vsel %vm2220_vm4, %v2226_v38, %v2224_v9 }
 0x25b   :  { %v2235_v37 = vmul.f32 %v2234_v4, %v2227_v1  ;;  %v2236_v26 = vmul.f32 %v2234_v4, %v2228_v42 }
 0x25d   :  { %v2237_v43 = vadd.f32 %v2235_v37, %v2231_v44  ;;  %v2238_v10 = vadd.f32 %v2236_v26, %v2232_v0 }
 0x25f   :  { %v2252_v19 = vmul.f32 %v2245_v5, %v2237_v43  ;;  %v2253_v34 = vmul.f32 %v2249_v24, %v2238_v10 }
 0x261   :  { %v2254_v22 = vadd.f32 %v2252_v19, %v2214_v23  ;;  %v2255_v45 = vadd.f32 %v2253_v34, %v2215_v7 }
 0x263   :  { %v2394_v27 = vmul.f32 -1.442695, %v2254_v22  ;;  %v2395_v59 = vmul.f32 -1.442695, %v2255_v45 }
 0x265   :  { %2455 = vpow2.f32 %v2394_v27 }
 0x266   :  { %2457 = vpow2.f32 %v2395_v59 }
 0x272   :  { %v2456_v11 = vpop.eup %2455 }
 0x273   :  { %v2458_v58 = vpop.eup %2457  ;;  %v2262_v21 = vadd.f32 1.0, %v2456_v11 }
 0x274   :  { %v2263_v57 = vadd.f32 1.0, %v2458_v58 }
 0x275   :  { %2459 = vrcp.f32 %v2262_v21 }
 0x276   :  { %2461 = vrcp.f32 %v2263_v57 }
 0x282   :  { %v2460_v61 = vpop.eup %2459 }
 0x283   :  { %v2462_v46 = vpop.eup %2461 }
 0x284   :  { %v2270_v29 = vcombine.low %v2460_v61, %v2462_v46 }
 0x286   :  { %2396 = vst.sshfl [vmem:[#allocation12] sm:$0x33 pattern:$0x76325410] %v2270_v29 }
 0x287   :  { %2530 = shalt.err (!%p2527_p5)
}
 0x288   :  { %s5135_s28 = sld [smem:[#allocation54_spill]] }
 0x28e   :  { %2289 = dma.vmem_to_hbm [thread:$0]  %s2287_s0, 64, %s5135_s28, [#allocation7]  }
 0x28f   :  { %2545 = dma.done.wait [#allocation7], 64  }
 0x290   :  { %2546 = vsyncadd [#allocation7], 4294967232 }
 0x291   :  { %2293 = vsyncpa [#allocation6], 1 }
 0x292   :  { %2294 = vsyncpa [#allocation11], 1 }
 0x293   :  { %2295 = vsyncpa [#allocation7], 1 }
 0x294   :  { %2296 = vsyncpa [#allocation8], 1 }

</bundles_post_ra>
